<compile_context>
chip_gen: v6e
topology: v6e:2x2x1
jax: 0.10.0
libtpu: 0.0.40
codegen_flags: <defaults>
</compile_context>

<pallas_src>
import jax
import jax.numpy as jnp
import numpy as np
from jax.experimental import pallas as pl
from jax.experimental.pallas import tpu as pltpu

BN_EPS = 1e-5
_HALO = 16                       # halo block frames (16 so bf16 blocks tile cleanly)
_VMEM_LIMIT = 48 * 1024 * 1024   # below v7x's 64 MiB/TC physical VMEM


# ----------------------------------------------------------------------------
# In-kernel helpers
# ----------------------------------------------------------------------------
def _taps_matmul_relu(xn, prev_f, next_f, w_ref, b_ref):
    """k=3 Conv1d as three accumulated bf16 MXU matmuls + bias + ReLU.

    xn:     (B, Tt, Cin) f32, BN-scaled input tile
    prev_f: (B, 1, Cin) f32 frame just before the tile (zero at sequence start)
    next_f: (B, 1, Cin) f32 frame just after the tile (zero at sequence end)
    w_ref:  (3, Cin, Cout) bf16, taps ordered [x[t-1], x[t], x[t+1]]
    b_ref:  (1, Cout) f32
    returns (B*Tt, Cout) f32 post-ReLU
    """
    B, Tt, Cin = xn.shape
    # Shifted taps via 1-frame sublane concat (no negative roll, no full-tile
    # iota/where fix-ups, no lane-dim concat).
    xm1 = jnp.concatenate([prev_f, xn[:, :Tt - 1, :]], axis=1)   # holds x[t-1]
    xp1 = jnp.concatenate([xn[:, 1:, :], next_f], axis=1)        # holds x[t+1]

    def tap(v, k):
        return jnp.dot(v.reshape(B * Tt, Cin).astype(jnp.bfloat16), w_ref[k],
                       preferred_element_type=jnp.float32)

    y = tap(xm1, 0) + tap(xn, 1) + tap(xp1, 2) + b_ref[...]
    return jnp.maximum(y, 0.0)


def _store_out_and_stats(y2d, B, Tt, y_ref, stats_ref):
    """Write the activation tile (in y_ref's dtype, e.g. bf16) + BN partials."""
    Cout = y2d.shape[-1]
    y_ref[...] = y2d.reshape(B, Tt, Cout).astype(y_ref.dtype)
    # Single-pass BN partial stats, computed in f32 before any downcast.
    stats_ref[0, 0:1, :] = jnp.sum(y2d, axis=0, keepdims=True)
    stats_ref[0, 1:2, :] = jnp.sum(y2d * y2d, axis=0, keepdims=True)


# ----------------------------------------------------------------------------
# Kernels
# ----------------------------------------------------------------------------
def conv_stage_kernel(x_ref, xprev_ref, xnext_ref, scale_ref, shift_ref,
                      w_ref, b_ref, y_ref, stats_ref):
    """(deferred BN scale/shift) -> Conv1d(k=3,pad=1) -> ReLU -> BN stats."""
    i = pl.program_id(0)
    sc = scale_ref[...]
    sh = shift_ref[...]
    xn = x_ref[...].astype(jnp.float32) * sc + sh                  # (B, Tt, Cin)
    prev_f = xprev_ref[:, _HALO - 1:_HALO, :].astype(jnp.float32) * sc + sh
    next_f = xnext_ref[:, 0:1, :].astype(jnp.float32) * sc + sh
    # Conv1d(padding=1): zero frames at the global sequence boundaries.
    prev_f = jnp.where(i == 0, 0.0, prev_f)
    next_f = jnp.where(i == pl.num_programs(0) - 1, 0.0, next_f)
    B, Tt, _ = xn.shape
    y2d = _taps_matmul_relu(xn, prev_f, next_f, w_ref, b_ref)
    _store_out_and_stats(y2d, B, Tt, y_ref, stats_ref)


def conv_pool_stage_kernel(x_ref, xprev_ref, xnext_ref, scale_ref, shift_ref,
                           w_ref, b_ref, y_ref, stats_ref):
    """(deferred BN) -> MaxPool1d(2) over time -> Conv1d(k=3) -> ReLU -> stats."""
    i = pl.program_id(0)
    sc = scale_ref[...]
    sh = shift_ref[...]
    B, t_in, _ = x_ref.shape
    Tp = t_in // 2
    # MaxPool over time via stride-2 sublane loads (x_ref is f32 for this).
    # Normalize before the max: BN gamma may be negative in general.
    x_even = x_ref[:, pl.ds(0, Tp, stride=2), :].astype(jnp.float32) * sc + sh
    x_odd = x_ref[:, pl.ds(1, Tp, stride=2), :].astype(jnp.float32) * sc + sh
    xp = jnp.maximum(x_even, x_odd)                                 # (B, Tp, Cin)
    pe = xprev_ref[:, _HALO - 2:_HALO, :].astype(jnp.float32) * sc + sh
    ne = xnext_ref[:, 0:2, :].astype(jnp.float32) * sc + sh
    prev_f = jnp.maximum(pe[:, 0:1, :], pe[:, 1:2, :])              # pooled t'-1
    next_f = jnp.maximum(ne[:, 0:1, :], ne[:, 1:2, :])              # pooled t'+1
    prev_f = jnp.where(i == 0, 0.0, prev_f)
    next_f = jnp.where(i == pl.num_programs(0) - 1, 0.0, next_f)
    y2d = _taps_matmul_relu(xp, prev_f, next_f, w_ref, b_ref)
    _store_out_and_stats(y2d, B, Tp, y_ref, stats_ref)


def finalize_kernel(y_ref, scale_ref, shift_ref, iv_ref, feat_ref, comb_ref):
    """Apply cnn4's BN (scale/shift) and write feat + [feat | ivector] concat."""
    feat = y_ref[...].astype(jnp.float32) * scale_ref[...] + shift_ref[...]
    feat_ref[...] = feat
    B, Tt, C = feat.shape
    Div = comb_ref.shape[-1] - C
    comb_ref[:, :, 0:C] = feat
    comb_ref[:, :, C:C + Div] = jnp.broadcast_to(iv_ref[...], (B, Tt, Div))


# ----------------------------------------------------------------------------
# Wrappers
# ----------------------------------------------------------------------------
def _conv_stage(x, scale_in, shift_in, w_bf16, b, t_tile, *, pool, out_dtype):
    """One CNN_ReLU_BatchNorm stage (BN deferred): returns (y_raw, stats)."""
    B, T, Cin = x.shape
    Cout = w_bf16.shape[-1]
    t_in = 2 * t_tile if pool else t_tile      # input frames per grid step
    T_out = T // 2 if pool else T
    num_t = T_out // t_tile
    n_edge = T // _HALO                        # halo blocks along the input
    eb = t_in // _HALO                         # halo-block stride per grid step

    kernel = conv_pool_stage_kernel if pool else conv_stage_kernel
    itm_in = jnp.dtype(x.dtype).itemsize
    itm_out = jnp.dtype(out_dtype).itemsize
    flops = int(2 * B * T_out * 3 * Cin * Cout)
    bytes_accessed = int(
        B * T * Cin * itm_in                          # main input stream
        + num_t * 2 * B * _HALO * Cin * itm_in        # halo refetch
        + B * T_out * Cout * itm_out                  # activation output
        + num_t * 2 * Cout * 4                        # stats output
        + num_t * (3 * Cin * Cout * 2 + Cout * 4 + 2 * Cin * 4))

    y, stats = pl.pallas_call(
        kernel,
        grid=(num_t,),
        in_specs=[
            pl.BlockSpec((B, t_in, Cin), lambda i: (0, i, 0)),
            # previous / next 16-frame halo blocks of the same input array;
            # clamped at the ends and masked to the conv zero padding in-kernel.
            pl.BlockSpec((B, _HALO, Cin),
                         lambda i: (0, jnp.maximum(i * eb - 1, 0), 0)),
            pl.BlockSpec((B, _HALO, Cin),
                         lambda i: (0, jnp.minimum((i + 1) * eb, n_edge - 1), 0)),
            pl.BlockSpec((1, Cin), lambda i: (0, 0)),
            pl.BlockSpec((1, Cin), lambda i: (0, 0)),
            pl.BlockSpec((3, Cin, Cout), lambda i: (0, 0, 0)),
            pl.BlockSpec((1, Cout), lambda i: (0, 0)),
        ],
        out_specs=[
            pl.BlockSpec((B, t_tile, Cout), lambda i: (0, i, 0)),
            pl.BlockSpec((1, 2, Cout), lambda i: (i, 0, 0)),
        ],
        out_shape=[
            jax.ShapeDtypeStruct((B, T_out, Cout), out_dtype),
            jax.ShapeDtypeStruct((num_t, 2, Cout), jnp.float32),
        ],
        compiler_params=pltpu.CompilerParams(
            dimension_semantics=("parallel",),
            vmem_limit_bytes=_VMEM_LIMIT),
        cost_estimate=pl.CostEstimate(flops=flops, transcendentals=0,
                                      bytes_accessed=bytes_accessed),
    )(x, x, x, scale_in, shift_in, w_bf16, b)
    return y, stats


def _bn_scale_shift(stats, gamma, beta, count):
    """Fold training-mode BatchNorm into per-channel scale/shift (tiny op)."""
    tot = jnp.sum(stats, axis=0)                                # (2, C)
    mean = tot[0:1, :] / count                                  # (1, C)
    var = jnp.maximum(tot[1:2, :] / count - mean * mean, 0.0)   # biased variance
    scale = gamma * jax.lax.rsqrt(var + BN_EPS)
    shift = beta - mean * scale
    return scale, shift


def _pick_tile(total, max_tile):
    """Largest multiple of 16 that divides `total` and is <= max_tile."""
    best = 0
    t = 16
    while t <= min(total, max_tile):
        if total % t == 0:
            best = t
        t += 16
    if best == 0:
        raise ValueError(f"no multiple-of-16 tile divides {total}")
    return best


def init_params(key):
    """Deterministic synthetic parameters for cnn1..cnn4 (taps, Cin, Cout)."""
    dims = [(40, 64), (64, 64), (64, 128), (128, 128)]
    params = []
    keys = jax.random.split(key, len(dims))
    for k, (cin, cout) in zip(keys, dims):
        kw, kb = jax.random.split(k)
        w = jax.random.normal(kw, (3, cin, cout), jnp.float32) / jnp.sqrt(3.0 * cin)
        b = jax.random.normal(kb, (1, cout), jnp.float32) * 0.01
        gamma = jnp.ones((1, cout), jnp.float32)
        beta = jnp.zeros((1, cout), jnp.float32)
        params.append((w, b, gamma, beta))
    return params


def tsvad_forward(ivectors, feature, params, *, t_tile=None):
    """feature: (B, T, 40), ivectors: (n_spk, B, 100)."""
    B, T, Cin0 = feature.shape
    if T % 32 != 0:
        # TODO(synk): PyTorch MaxPool1d(2) floors odd lengths; this kernel
        # needs T % 32 == 0 so pre- and post-pool time tiles are multiples of
        # 16 (bf16 native sublane tiling).
        raise ValueError("T must be a multiple of 32")
    t_tile = _pick_tile(T, 512 if t_tile is None else t_tile)
    tp_tile = _pick_tile(T // 2, t_tile)

    (w1, b1, g1, be1), (w2, b2, g2, be2), \
        (w3, b3, g3, be3), (w4, b4, g4, be4) = params

    def prep_w(w):
        return w.astype(jnp.bfloat16)     # (3, Cin, Cout) bf16 for the MXU

    one = jnp.ones((1, Cin0), jnp.float32)
    zero = jnp.zeros((1, Cin0), jnp.float32)
    n_full = float(B * T)
    n_half = float(B * (T // 2))

    # cnn1..cnn3: each layer's BN is applied inside the NEXT layer's kernel as
    # a per-channel scale/shift, so every layer is one pass over the data
    # while BN statistics stay global over (B, T).
    # y1, y2, y4 are stored in bf16 (memory-bound pipeline); y3 stays f32
    # because the pool stage reads it with stride-2 sublane loads.
    y1, s1 = _conv_stage(feature, one, zero, prep_w(w1), b1, t_tile,
                         pool=False, out_dtype=jnp.bfloat16)
    sc1, sh1 = _bn_scale_shift(s1, g1, be1, n_full)
    y2, s2 = _conv_stage(y1, sc1, sh1, prep_w(w2), b2, t_tile,
                         pool=False, out_dtype=jnp.bfloat16)
    sc2, sh2 = _bn_scale_shift(s2, g2, be2, n_full)
    y3, s3 = _conv_stage(y2, sc2, sh2, prep_w(w3), b3, t_tile,
                         pool=False, out_dtype=jnp.float32)
    sc3, sh3 = _bn_scale_shift(s3, g3, be3, n_full)
    # MaxPool1d(2) over time fused with cnn4.
    y4, s4 = _conv_stage(y3, sc3, sh3, prep_w(w4), b4, tp_tile,
                         pool=True, out_dtype=jnp.bfloat16)
    sc4, sh4 = _bn_scale_shift(s4, g4, be4, n_half)

    # Finalize: apply cnn4's BN and emit both feat and the ivector concat in a
    # single pass over y4 (no separate scale/shift kernel).
    Tp_total = T // 2
    num_tp = Tp_total // tp_tile
    Div = ivectors.shape[-1]
    iv_last = ivectors[-1].reshape(B, 1, Div).astype(jnp.float32)
    feat, combine = pl.pallas_call(
        finalize_kernel,
        grid=(num_tp,),
        in_specs=[
            pl.BlockSpec((B, tp_tile, 128), lambda i: (0, i, 0)),
            pl.BlockSpec((1, 128), lambda i: (0, 0)),
            pl.BlockSpec((1, 128), lambda i: (0, 0)),
            pl.BlockSpec((B, 1, Div), lambda i: (0, 0, 0)),
        ],
        out_specs=[
            pl.BlockSpec((B, tp_tile, 128), lambda i: (0, i, 0)),
            pl.BlockSpec((B, tp_tile, 128 + Div), lambda i: (0, i, 0)),
        ],
        out_shape=[
            jax.ShapeDtypeStruct((B, Tp_total, 128), jnp.float32),
            jax.ShapeDtypeStruct((B, Tp_total, 128 + Div), jnp.float32),
        ],
        compiler_params=pltpu.CompilerParams(
            dimension_semantics=("parallel",),
            vmem_limit_bytes=_VMEM_LIMIT),
    )(y4, sc4, sh4, iv_last)

    # TODO(synk): the LSTMs / Linear of the reference are never invoked in its
    # forward(), and its torch.cat loop is malformed; `combine` is the
    # [feat | ivector] concat for the last speaker (last dim 228).
    return feat, combine


# ----------------------------------------------------------------------------
# Pure-JAX reference (same bf16-matmul numerics) for validation
# ----------------------------------------------------------------------------
def _ref_forward(feature, params):
    def conv_relu_bn(x, w, b, gamma, beta):
        B, T, Cin = x.shape
        zero = jnp.zeros((B, 1, Cin), x.dtype)
        xm1 = jnp.concatenate([zero, x[:, :-1, :]], axis=1)
        xp1 = jnp.concatenate([x[:, 1:, :], zero], axis=1)
        lhs = jnp.concatenate([xm1, x, xp1], axis=-1).reshape(B * T, 3 * Cin)
        wr = w.reshape(3 * Cin, -1).astype(jnp.bfloat16)
        y = jnp.dot(lhs.astype(jnp.bfloat16), wr,
                    preferred_element_type=jnp.float32) + b
        y = jnp.maximum(y, 0.0)
        mean = jnp.mean(y, axis=0, keepdims=True)
        var = jnp.mean((y - mean) ** 2, axis=0, keepdims=True)
        y = (y - mean) * jax.lax.rsqrt(var + BN_EPS) * gamma + beta
        return y.reshape(B, T, -1)

    (w1, b1, g1, be1), (w2, b2, g2, be2), \
        (w3, b3, g3, be3), (w4, b4, g4, be4) = params
    h = conv_relu_bn(feature, w1, b1, g1, be1)
    h = conv_relu_bn(h, w2, b2, g2, be2)
    h = conv_relu_bn(h, w3, b3, g3, be3)
    h = jnp.maximum(h[:, 0::2, :], h[:, 1::2, :])    # MaxPool1d(2) over time
    h = conv_relu_bn(h, w4, b4, g4, be4)
    return h


if __name__ == "__main__":
    key = jax.random.PRNGKey(0)
    k_feat, k_iv, k_param = jax.random.split(key, 3)

    B, T, F = 2, 32, 40            # feature: (batch, time, 40 mel bins)
    n_spk, iv_dim = 3, 100         # 128 (CNN out) + 100 (ivector) = 228

    feature = jax.random.normal(k_feat, (B, T, F), jnp.float32)
    ivectors = jax.random.normal(k_iv, (n_spk, B, iv_dim), jnp.float32)
    params = init_params(k_param)

    # t_tile=16 -> 2 time tiles for cnn1..cnn3, exercising the cross-tile halo.
    fwd = jax.jit(lambda iv, ft, ps: tsvad_forward(iv, ft, ps, t_tile=16))
    feat_out, combine = fwd(ivectors, feature, params)
    jax.block_until_ready((feat_out, combine))

    assert feat_out.shape == (B, T // 2, 128)
    assert combine.shape == (B, T // 2, 228)

    ref = _ref_forward(feature, params)
    np.testing.assert_allclose(np.asarray(feat_out), np.asarray(ref),
                               atol=5e-2, rtol=5e-2)
    np.testing.assert_allclose(np.asarray(combine)[..., :128],
                               np.asarray(feat_out), atol=1e-5, rtol=1e-5)
    iv_b = np.broadcast_to(np.asarray(ivectors)[-1][:, None, :],
                           (B, T // 2, iv_dim))
    np.testing.assert_allclose(np.asarray(combine)[..., 128:], iv_b,
                               atol=1e-5, rtol=1e-5)
    print("KERNEL_OK")
</pallas_src>

<mosaic_0001>
module attributes {stable_mosaic.version = 11 : i64} {
  func.func @conv_stage_kernel(%arg0: i32, %arg1: memref<2x16x40xf32, #tpu.memory_space<vmem>>, %arg2: memref<2x16x40xf32, #tpu.memory_space<vmem>>, %arg3: memref<2x16x40xf32, #tpu.memory_space<vmem>>, %arg4: memref<1x40xf32, #tpu.memory_space<vmem>>, %arg5: memref<1x40xf32, #tpu.memory_space<vmem>>, %arg6: memref<3x40x64xbf16, #tpu.memory_space<vmem>>, %arg7: memref<1x64xf32, #tpu.memory_space<vmem>>, %arg8: memref<2x16x64xbf16, #tpu.memory_space<vmem>>, %arg9: memref<1x2x64xf32, #tpu.memory_space<vmem>>) attributes {dimension_semantics = [#tpu.dimension_semantics<parallel>], iteration_bounds = array<i64: 2>, scalar_prefetch = 0 : i64, scratch_operands = 0 : i64, tpu.core_type = #tpu.core_type<tc>, window_params = [{transform_indices = @transform_0, window_bounds = array<i64: 2, 16, 40>}, {transform_indices = @transform_1, window_bounds = array<i64: 2, 16, 40>}, {transform_indices = @transform_2, window_bounds = array<i64: 2, 16, 40>}, {pipeline_mode = #tpu.pipeline_mode<synchronous>, transform_indices = @transform_3, window_bounds = array<i64: 1, 40>}, {pipeline_mode = #tpu.pipeline_mode<synchronous>, transform_indices = @transform_4, window_bounds = array<i64: 1, 40>}, {pipeline_mode = #tpu.pipeline_mode<synchronous>, transform_indices = @transform_5, window_bounds = array<i64: 3, 40, 64>}, {pipeline_mode = #tpu.pipeline_mode<synchronous>, transform_indices = @transform_6, window_bounds = array<i64: 1, 64>}, {transform_indices = @transform_7, window_bounds = array<i64: 2, 16, 64>}, {transform_indices = @transform_8, window_bounds = array<i64: 1, 2, 64>}]} {
    %c0 = arith.constant 0 : index
    %c0_0 = arith.constant 0 : index
    %0 = vector.load %arg4[%c0, %c0_0] : memref<1x40xf32, #tpu.memory_space<vmem>>, vector<1x40xf32>
    %c0_1 = arith.constant 0 : index
    %c0_2 = arith.constant 0 : index
    %1 = vector.load %arg5[%c0_1, %c0_2] : memref<1x40xf32, #tpu.memory_space<vmem>>, vector<1x40xf32>
    %c0_3 = arith.constant 0 : index
    %c0_4 = arith.constant 0 : index
    %c0_5 = arith.constant 0 : index
    %2 = vector.load %arg1[%c0_3, %c0_4, %c0_5] : memref<2x16x40xf32, #tpu.memory_space<vmem>>, vector<2x16x40xf32>
    %3 = vector.shape_cast %0 : vector<1x40xf32> to vector<1x1x40xf32>
    %4 = vector.broadcast %3 : vector<1x1x40xf32> to vector<2x16x40xf32>
    %5 = arith.mulf %2, %4 : vector<2x16x40xf32>
    %6 = vector.shape_cast %1 : vector<1x40xf32> to vector<1x1x40xf32>
    %7 = vector.broadcast %6 : vector<1x1x40xf32> to vector<2x16x40xf32>
    %8 = arith.addf %5, %7 : vector<2x16x40xf32>
    %c0_6 = arith.constant 0 : index
    %c15 = arith.constant 15 : index
    %c0_7 = arith.constant 0 : index
    %9 = vector.load %arg2[%c0_6, %c15, %c0_7] : memref<2x16x40xf32, #tpu.memory_space<vmem>>, vector<2x1x40xf32>
    %10 = vector.shape_cast %0 : vector<1x40xf32> to vector<1x1x40xf32>
    %11 = vector.broadcast %10 : vector<1x1x40xf32> to vector<2x1x40xf32>
    %12 = arith.mulf %9, %11 : vector<2x1x40xf32>
    %13 = vector.shape_cast %1 : vector<1x40xf32> to vector<1x1x40xf32>
    %14 = vector.broadcast %13 : vector<1x1x40xf32> to vector<2x1x40xf32>
    %15 = arith.addf %12, %14 : vector<2x1x40xf32>
    %c0_8 = arith.constant 0 : index
    %c0_9 = arith.constant 0 : index
    %c0_10 = arith.constant 0 : index
    %16 = vector.load %arg3[%c0_8, %c0_9, %c0_10] : memref<2x16x40xf32, #tpu.memory_space<vmem>>, vector<2x1x40xf32>
    %17 = vector.shape_cast %0 : vector<1x40xf32> to vector<1x1x40xf32>
    %18 = vector.broadcast %17 : vector<1x1x40xf32> to vector<2x1x40xf32>
    %19 = arith.mulf %16, %18 : vector<2x1x40xf32>
    %20 = vector.shape_cast %1 : vector<1x40xf32> to vector<1x1x40xf32>
    %21 = vector.broadcast %20 : vector<1x1x40xf32> to vector<2x1x40xf32>
    %22 = arith.addf %19, %21 : vector<2x1x40xf32>
    %c0_i32 = arith.constant 0 : i32
    %23 = arith.cmpi eq, %arg0, %c0_i32 : i32
    %cst = arith.constant 0.000000e+00 : f32
    %24 = vector.broadcast %cst : f32 to vector<2x1x40xf32>
    %25 = arith.select %23, %24, %15 : vector<2x1x40xf32>
    %c1_i32 = arith.constant 1 : i32
    %26 = arith.cmpi eq, %arg0, %c1_i32 : i32
    %cst_11 = arith.constant 0.000000e+00 : f32
    %27 = vector.broadcast %cst_11 : f32 to vector<2x1x40xf32>
    %28 = arith.select %26, %27, %22 : vector<2x1x40xf32>
    %29 = vector.extract_strided_slice %8 {offsets = [0, 0, 0], sizes = [2, 15, 40], strides = [1, 1, 1]} : vector<2x16x40xf32> to vector<2x15x40xf32>
    %30 = tpu.concatenate %25, %29 in 1 : vector<2x1x40xf32>, vector<2x15x40xf32> -> vector<2x16x40xf32>
    %31 = vector.extract_strided_slice %8 {offsets = [0, 1, 0], sizes = [2, 15, 40], strides = [1, 1, 1]} : vector<2x16x40xf32> to vector<2x15x40xf32>
    %32 = tpu.concatenate %31, %28 in 1 : vector<2x15x40xf32>, vector<2x1x40xf32> -> vector<2x16x40xf32>
    %33 = vector.shape_cast %30 : vector<2x16x40xf32> to vector<32x40xf32>
    %34 = arith.truncf %33 : vector<32x40xf32> to vector<32x40xbf16>
    %c0_12 = arith.constant 0 : index
    %c0_13 = arith.constant 0 : index
    %c0_14 = arith.constant 0 : index
    %35 = vector.load %arg6[%c0_12, %c0_13, %c0_14] : memref<3x40x64xbf16, #tpu.memory_space<vmem>>, vector<1x40x64xbf16>
    %36 = vector.shape_cast %35 : vector<1x40x64xbf16> to vector<40x64xbf16>
    %cst_15 = arith.constant dense<0.000000e+00> : vector<32x64xf32>
    %37 = tpu.matmul %34, %36, %cst_15 {dimension_numbers = #tpu.dot_dimension_numbers<[1], [0], [0], [1], [0, 0, 1, 1], [], []>} : vector<32x40xbf16>, vector<40x64xbf16>, vector<32x64xf32> -> vector<32x64xf32>
    %38 = vector.shape_cast %8 : vector<2x16x40xf32> to vector<32x40xf32>
    %39 = arith.truncf %38 : vector<32x40xf32> to vector<32x40xbf16>
    %c1 = arith.constant 1 : index
    %c0_16 = arith.constant 0 : index
    %c0_17 = arith.constant 0 : index
    %40 = vector.load %arg6[%c1, %c0_16, %c0_17] : memref<3x40x64xbf16, #tpu.memory_space<vmem>>, vector<1x40x64xbf16>
    %41 = vector.shape_cast %40 : vector<1x40x64xbf16> to vector<40x64xbf16>
    %cst_18 = arith.constant dense<0.000000e+00> : vector<32x64xf32>
    %42 = tpu.matmul %39, %41, %cst_18 {dimension_numbers = #tpu.dot_dimension_numbers<[1], [0], [0], [1], [0, 0, 1, 1], [], []>} : vector<32x40xbf16>, vector<40x64xbf16>, vector<32x64xf32> -> vector<32x64xf32>
    %43 = arith.addf %37, %42 : vector<32x64xf32>
    %44 = vector.shape_cast %32 : vector<2x16x40xf32> to vector<32x40xf32>
    %45 = arith.truncf %44 : vector<32x40xf32> to vector<32x40xbf16>
    %c2 = arith.constant 2 : index
    %c0_19 = arith.constant 0 : index
    %c0_20 = arith.constant 0 : index
    %46 = vector.load %arg6[%c2, %c0_19, %c0_20] : memref<3x40x64xbf16, #tpu.memory_space<vmem>>, vector<1x40x64xbf16>
    %47 = vector.shape_cast %46 : vector<1x40x64xbf16> to vector<40x64xbf16>
    %cst_21 = arith.constant dense<0.000000e+00> : vector<32x64xf32>
    %48 = tpu.matmul %45, %47, %cst_21 {dimension_numbers = #tpu.dot_dimension_numbers<[1], [0], [0], [1], [0, 0, 1, 1], [], []>} : vector<32x40xbf16>, vector<40x64xbf16>, vector<32x64xf32> -> vector<32x64xf32>
    %49 = arith.addf %43, %48 : vector<32x64xf32>
    %c0_22 = arith.constant 0 : index
    %c0_23 = arith.constant 0 : index
    %50 = vector.load %arg7[%c0_22, %c0_23] : memref<1x64xf32, #tpu.memory_space<vmem>>, vector<1x64xf32>
    %51 = vector.broadcast %50 : vector<1x64xf32> to vector<32x64xf32>
    %52 = arith.addf %49, %51 : vector<32x64xf32>
    %cst_24 = arith.constant 0.000000e+00 : f32
    %53 = vector.broadcast %cst_24 : f32 to vector<32x64xf32>
    %54 = arith.maximumf %52, %53 : vector<32x64xf32>
    %55 = vector.shape_cast %54 : vector<32x64xf32> to vector<2x16x64xf32>
    %56 = arith.truncf %55 : vector<2x16x64xf32> to vector<2x16x64xbf16>
    %c0_25 = arith.constant 0 : index
    %c0_26 = arith.constant 0 : index
    %c0_27 = arith.constant 0 : index
    %57 = vector.load %arg8[%c0_25, %c0_26, %c0_27] : memref<2x16x64xbf16, #tpu.memory_space<vmem>>, vector<2x16x64xbf16>
    tpu.vector_store %arg8[%c0_25, %c0_26, %c0_27], %56 {strides = array<i32>} : memref<2x16x64xbf16, #tpu.memory_space<vmem>>, vector<2x16x64xbf16>,
    %cst_28 = arith.constant dense<0.000000e+00> : vector<64xf32>
    %58 = vector.multi_reduction <add>, %54, %cst_28 [0] : vector<32x64xf32> to vector<64xf32>
    %59 = vector.shape_cast %58 : vector<64xf32> to vector<1x64xf32>
    %c0_29 = arith.constant 0 : index
    %c0_30 = arith.constant 0 : index
    %c0_31 = arith.constant 0 : index
    %60 = vector.load %arg9[%c0_29, %c0_30, %c0_31] : memref<1x2x64xf32, #tpu.memory_space<vmem>>, vector<1x1x64xf32>
    %61 = vector.shape_cast %60 : vector<1x1x64xf32> to vector<1x64xf32>
    %62 = vector.shape_cast %59 : vector<1x64xf32> to vector<1x1x64xf32>
    tpu.vector_store %arg9[%c0_29, %c0_30, %c0_31], %62 {strides = array<i32>} : memref<1x2x64xf32, #tpu.memory_space<vmem>>, vector<1x1x64xf32>,
    %63 = arith.mulf %54, %54 : vector<32x64xf32>
    %cst_32 = arith.constant dense<0.000000e+00> : vector<64xf32>
    %64 = vector.multi_reduction <add>, %63, %cst_32 [0] : vector<32x64xf32> to vector<64xf32>
    %65 = vector.shape_cast %64 : vector<64xf32> to vector<1x64xf32>
    %c0_33 = arith.constant 0 : index
    %c1_34 = arith.constant 1 : index
    %c0_35 = arith.constant 0 : index
    %66 = vector.load %arg9[%c0_33, %c1_34, %c0_35] : memref<1x2x64xf32, #tpu.memory_space<vmem>>, vector<1x1x64xf32>
    %67 = vector.shape_cast %66 : vector<1x1x64xf32> to vector<1x64xf32>
    %68 = vector.shape_cast %65 : vector<1x64xf32> to vector<1x1x64xf32>
    tpu.vector_store %arg9[%c0_33, %c1_34, %c0_35], %68 {strides = array<i32>} : memref<1x2x64xf32, #tpu.memory_space<vmem>>, vector<1x1x64xf32>,
    return
  }
  func.func @transform_0(%arg0: i32) -> (i32, i32, i32) {
    %c0_i32 = arith.constant 0 : i32
    %c0_i32_0 = arith.constant 0 : i32
    %c0_i32_1 = arith.constant 0 : i32
    return %c0_i32, %arg0, %c0_i32_0 : i32, i32, i32
  }
  func.func @transform_1(%arg0: i32) -> (i32, i32, i32) {
    %c1_i32 = arith.constant 1 : i32
    %0 = arith.muli %arg0, %c1_i32 : i32
    %c1_i32_0 = arith.constant 1 : i32
    %1 = arith.subi %0, %c1_i32_0 : i32
    %c0_i32 = arith.constant 0 : i32
    %2 = arith.maxsi %1, %c0_i32 : i32
    %c0_i32_1 = arith.constant 0 : i32
    %c0_i32_2 = arith.constant 0 : i32
    %c0_i32_3 = arith.constant 0 : i32
    return %c0_i32_1, %2, %c0_i32_2 : i32, i32, i32
  }
  func.func @transform_2(%arg0: i32) -> (i32, i32, i32) {
    %c1_i32 = arith.constant 1 : i32
    %0 = arith.addi %arg0, %c1_i32 : i32
    %c1_i32_0 = arith.constant 1 : i32
    %1 = arith.muli %0, %c1_i32_0 : i32
    %c1_i32_1 = arith.constant 1 : i32
    %2 = arith.minsi %1, %c1_i32_1 : i32
    %c0_i32 = arith.constant 0 : i32
    %c0_i32_2 = arith.constant 0 : i32
    %c0_i32_3 = arith.constant 0 : i32
    return %c0_i32, %2, %c0_i32_2 : i32, i32, i32
  }
  func.func @transform_3(%arg0: i32) -> (i32, i32) {
    %c0_i32 = arith.constant 0 : i32
    %c0_i32_0 = arith.constant 0 : i32
    %c0_i32_1 = arith.constant 0 : i32
    return %c0_i32, %c0_i32_0 : i32, i32
  }
  func.func @transform_4(%arg0: i32) -> (i32, i32) {
    %c0_i32 = arith.constant 0 : i32
    %c0_i32_0 = arith.constant 0 : i32
    %c0_i32_1 = arith.constant 0 : i32
    return %c0_i32, %c0_i32_0 : i32, i32
  }
  func.func @transform_5(%arg0: i32) -> (i32, i32, i32) {
    %c0_i32 = arith.constant 0 : i32
    %c0_i32_0 = arith.constant 0 : i32
    %c0_i32_1 = arith.constant 0 : i32
    %c0_i32_2 = arith.constant 0 : i32
    return %c0_i32, %c0_i32_0, %c0_i32_1 : i32, i32, i32
  }
  func.func @transform_6(%arg0: i32) -> (i32, i32) {
    %c0_i32 = arith.constant 0 : i32
    %c0_i32_0 = arith.constant 0 : i32
    %c0_i32_1 = arith.constant 0 : i32
    return %c0_i32, %c0_i32_0 : i32, i32
  }
  func.func @transform_7(%arg0: i32) -> (i32, i32, i32) {
    %c0_i32 = arith.constant 0 : i32
    %c0_i32_0 = arith.constant 0 : i32
    %c0_i32_1 = arith.constant 0 : i32
    return %c0_i32, %arg0, %c0_i32_0 : i32, i32, i32
  }
  func.func @transform_8(%arg0: i32) -> (i32, i32, i32) {
    %c0_i32 = arith.constant 0 : i32
    %c0_i32_0 = arith.constant 0 : i32
    %c0_i32_1 = arith.constant 0 : i32
    return %arg0, %c0_i32, %c0_i32_0 : i32, i32, i32
  }
}

module attributes {stable_mosaic.version = 11 : i64} {
  func.func @conv_stage_kernel(%arg0: i32, %arg1: memref<2x16x64xbf16, #tpu.memory_space<vmem>>, %arg2: memref<2x16x64xbf16, #tpu.memory_space<vmem>>, %arg3: memref<2x16x64xbf16, #tpu.memory_space<vmem>>, %arg4: memref<1x64xf32, #tpu.memory_space<vmem>>, %arg5: memref<1x64xf32, #tpu.memory_space<vmem>>, %arg6: memref<3x64x64xbf16, #tpu.memory_space<vmem>>, %arg7: memref<1x64xf32, #tpu.memory_space<vmem>>, %arg8: memref<2x16x64xbf16, #tpu.memory_space<vmem>>, %arg9: memref<1x2x64xf32, #tpu.memory_space<vmem>>) attributes {dimension_semantics = [#tpu.dimension_semantics<parallel>], iteration_bounds = array<i64: 2>, scalar_prefetch = 0 : i64, scratch_operands = 0 : i64, tpu.core_type = #tpu.core_type<tc>, window_params = [{transform_indices = @transform_0, window_bounds = array<i64: 2, 16, 64>}, {transform_indices = @transform_1, window_bounds = array<i64: 2, 16, 64>}, {transform_indices = @transform_2, window_bounds = array<i64: 2, 16, 64>}, {pipeline_mode = #tpu.pipeline_mode<synchronous>, transform_indices = @transform_3, window_bounds = array<i64: 1, 64>}, {pipeline_mode = #tpu.pipeline_mode<synchronous>, transform_indices = @transform_4, window_bounds = array<i64: 1, 64>}, {pipeline_mode = #tpu.pipeline_mode<synchronous>, transform_indices = @transform_5, window_bounds = array<i64: 3, 64, 64>}, {pipeline_mode = #tpu.pipeline_mode<synchronous>, transform_indices = @transform_6, window_bounds = array<i64: 1, 64>}, {transform_indices = @transform_7, window_bounds = array<i64: 2, 16, 64>}, {transform_indices = @transform_8, window_bounds = array<i64: 1, 2, 64>}]} {
    %c0 = arith.constant 0 : index
    %c0_0 = arith.constant 0 : index
    %0 = vector.load %arg4[%c0, %c0_0] : memref<1x64xf32, #tpu.memory_space<vmem>>, vector<1x64xf32>
    %c0_1 = arith.constant 0 : index
    %c0_2 = arith.constant 0 : index
    %1 = vector.load %arg5[%c0_1, %c0_2] : memref<1x64xf32, #tpu.memory_space<vmem>>, vector<1x64xf32>
    %c0_3 = arith.constant 0 : index
    %c0_4 = arith.constant 0 : index
    %c0_5 = arith.constant 0 : index
    %2 = vector.load %arg1[%c0_3, %c0_4, %c0_5] : memref<2x16x64xbf16, #tpu.memory_space<vmem>>, vector<2x16x64xbf16>
    %3 = arith.extf %2 : vector<2x16x64xbf16> to vector<2x16x64xf32>
    %4 = vector.shape_cast %0 : vector<1x64xf32> to vector<1x1x64xf32>
    %5 = vector.broadcast %4 : vector<1x1x64xf32> to vector<2x16x64xf32>
    %6 = arith.mulf %3, %5 : vector<2x16x64xf32>
    %7 = vector.shape_cast %1 : vector<1x64xf32> to vector<1x1x64xf32>
    %8 = vector.broadcast %7 : vector<1x1x64xf32> to vector<2x16x64xf32>
    %9 = arith.addf %6, %8 : vector<2x16x64xf32>
    %c0_6 = arith.constant 0 : index
    %c15 = arith.constant 15 : index
    %c0_7 = arith.constant 0 : index
    %10 = vector.load %arg2[%c0_6, %c15, %c0_7] : memref<2x16x64xbf16, #tpu.memory_space<vmem>>, vector<2x1x64xbf16>
    %11 = arith.extf %10 : vector<2x1x64xbf16> to vector<2x1x64xf32>
    %12 = vector.shape_cast %0 : vector<1x64xf32> to vector<1x1x64xf32>
    %13 = vector.broadcast %12 : vector<1x1x64xf32> to vector<2x1x64xf32>
    %14 = arith.mulf %11, %13 : vector<2x1x64xf32>
    %15 = vector.shape_cast %1 : vector<1x64xf32> to vector<1x1x64xf32>
    %16 = vector.broadcast %15 : vector<1x1x64xf32> to vector<2x1x64xf32>
    %17 = arith.addf %14, %16 : vector<2x1x64xf32>
    %c0_8 = arith.constant 0 : index
    %c0_9 = arith.constant 0 : index
    %c0_10 = arith.constant 0 : index
    %18 = vector.load %arg3[%c0_8, %c0_9, %c0_10] : memref<2x16x64xbf16, #tpu.memory_space<vmem>>, vector<2x1x64xbf16>
    %19 = arith.extf %18 : vector<2x1x64xbf16> to vector<2x1x64xf32>
    %20 = vector.shape_cast %0 : vector<1x64xf32> to vector<1x1x64xf32>
    %21 = vector.broadcast %20 : vector<1x1x64xf32> to vector<2x1x64xf32>
    %22 = arith.mulf %19, %21 : vector<2x1x64xf32>
    %23 = vector.shape_cast %1 : vector<1x64xf32> to vector<1x1x64xf32>
    %24 = vector.broadcast %23 : vector<1x1x64xf32> to vector<2x1x64xf32>
    %25 = arith.addf %22, %24 : vector<2x1x64xf32>
    %c0_i32 = arith.constant 0 : i32
    %26 = arith.cmpi eq, %arg0, %c0_i32 : i32
    %cst = arith.constant 0.000000e+00 : f32
    %27 = vector.broadcast %cst : f32 to vector<2x1x64xf32>
    %28 = arith.select %26, %27, %17 : vector<2x1x64xf32>
    %c1_i32 = arith.constant 1 : i32
    %29 = arith.cmpi eq, %arg0, %c1_i32 : i32
    %cst_11 = arith.constant 0.000000e+00 : f32
    %30 = vector.broadcast %cst_11 : f32 to vector<2x1x64xf32>
    %31 = arith.select %29, %30, %25 : vector<2x1x64xf32>
    %32 = vector.extract_strided_slice %9 {offsets = [0, 0, 0], sizes = [2, 15, 64], strides = [1, 1, 1]} : vector<2x16x64xf32> to vector<2x15x64xf32>
    %33 = tpu.concatenate %28, %32 in 1 : vector<2x1x64xf32>, vector<2x15x64xf32> -> vector<2x16x64xf32>
    %34 = vector.extract_strided_slice %9 {offsets = [0, 1, 0], sizes = [2, 15, 64], strides = [1, 1, 1]} : vector<2x16x64xf32> to vector<2x15x64xf32>
    %35 = tpu.concatenate %34, %31 in 1 : vector<2x15x64xf32>, vector<2x1x64xf32> -> vector<2x16x64xf32>
    %36 = vector.shape_cast %33 : vector<2x16x64xf32> to vector<32x64xf32>
    %37 = arith.truncf %36 : vector<32x64xf32> to vector<32x64xbf16>
    %c0_12 = arith.constant 0 : index
    %c0_13 = arith.constant 0 : index
    %c0_14 = arith.constant 0 : index
    %38 = vector.load %arg6[%c0_12, %c0_13, %c0_14] : memref<3x64x64xbf16, #tpu.memory_space<vmem>>, vector<1x64x64xbf16>
    %39 = vector.shape_cast %38 : vector<1x64x64xbf16> to vector<64x64xbf16>
    %cst_15 = arith.constant dense<0.000000e+00> : vector<32x64xf32>
    %40 = tpu.matmul %37, %39, %cst_15 {dimension_numbers = #tpu.dot_dimension_numbers<[1], [0], [0], [1], [0, 0, 1, 1], [], []>} : vector<32x64xbf16>, vector<64x64xbf16>, vector<32x64xf32> -> vector<32x64xf32>
    %41 = vector.shape_cast %9 : vector<2x16x64xf32> to vector<32x64xf32>
    %42 = arith.truncf %41 : vector<32x64xf32> to vector<32x64xbf16>
    %c1 = arith.constant 1 : index
    %c0_16 = arith.constant 0 : index
    %c0_17 = arith.constant 0 : index
    %43 = vector.load %arg6[%c1, %c0_16, %c0_17] : memref<3x64x64xbf16, #tpu.memory_space<vmem>>, vector<1x64x64xbf16>
    %44 = vector.shape_cast %43 : vector<1x64x64xbf16> to vector<64x64xbf16>
    %cst_18 = arith.constant dense<0.000000e+00> : vector<32x64xf32>
    %45 = tpu.matmul %42, %44, %cst_18 {dimension_numbers = #tpu.dot_dimension_numbers<[1], [0], [0], [1], [0, 0, 1, 1], [], []>} : vector<32x64xbf16>, vector<64x64xbf16>, vector<32x64xf32> -> vector<32x64xf32>
    %46 = arith.addf %40, %45 : vector<32x64xf32>
    %47 = vector.shape_cast %35 : vector<2x16x64xf32> to vector<32x64xf32>
    %48 = arith.truncf %47 : vector<32x64xf32> to vector<32x64xbf16>
    %c2 = arith.constant 2 : index
    %c0_19 = arith.constant 0 : index
    %c0_20 = arith.constant 0 : index
    %49 = vector.load %arg6[%c2, %c0_19, %c0_20] : memref<3x64x64xbf16, #tpu.memory_space<vmem>>, vector<1x64x64xbf16>
    %50 = vector.shape_cast %49 : vector<1x64x64xbf16> to vector<64x64xbf16>
    %cst_21 = arith.constant dense<0.000000e+00> : vector<32x64xf32>
    %51 = tpu.matmul %48, %50, %cst_21 {dimension_numbers = #tpu.dot_dimension_numbers<[1], [0], [0], [1], [0, 0, 1, 1], [], []>} : vector<32x64xbf16>, vector<64x64xbf16>, vector<32x64xf32> -> vector<32x64xf32>
    %52 = arith.addf %46, %51 : vector<32x64xf32>
    %c0_22 = arith.constant 0 : index
    %c0_23 = arith.constant 0 : index
    %53 = vector.load %arg7[%c0_22, %c0_23] : memref<1x64xf32, #tpu.memory_space<vmem>>, vector<1x64xf32>
    %54 = vector.broadcast %53 : vector<1x64xf32> to vector<32x64xf32>
    %55 = arith.addf %52, %54 : vector<32x64xf32>
    %cst_24 = arith.constant 0.000000e+00 : f32
    %56 = vector.broadcast %cst_24 : f32 to vector<32x64xf32>
    %57 = arith.maximumf %55, %56 : vector<32x64xf32>
    %58 = vector.shape_cast %57 : vector<32x64xf32> to vector<2x16x64xf32>
    %59 = arith.truncf %58 : vector<2x16x64xf32> to vector<2x16x64xbf16>
    %c0_25 = arith.constant 0 : index
    %c0_26 = arith.constant 0 : index
    %c0_27 = arith.constant 0 : index
    %60 = vector.load %arg8[%c0_25, %c0_26, %c0_27] : memref<2x16x64xbf16, #tpu.memory_space<vmem>>, vector<2x16x64xbf16>
    tpu.vector_store %arg8[%c0_25, %c0_26, %c0_27], %59 {strides = array<i32>} : memref<2x16x64xbf16, #tpu.memory_space<vmem>>, vector<2x16x64xbf16>,
    %cst_28 = arith.constant dense<0.000000e+00> : vector<64xf32>
    %61 = vector.multi_reduction <add>, %57, %cst_28 [0] : vector<32x64xf32> to vector<64xf32>
    %62 = vector.shape_cast %61 : vector<64xf32> to vector<1x64xf32>
    %c0_29 = arith.constant 0 : index
    %c0_30 = arith.constant 0 : index
    %c0_31 = arith.constant 0 : index
    %63 = vector.load %arg9[%c0_29, %c0_30, %c0_31] : memref<1x2x64xf32, #tpu.memory_space<vmem>>, vector<1x1x64xf32>
    %64 = vector.shape_cast %63 : vector<1x1x64xf32> to vector<1x64xf32>
    %65 = vector.shape_cast %62 : vector<1x64xf32> to vector<1x1x64xf32>
    tpu.vector_store %arg9[%c0_29, %c0_30, %c0_31], %65 {strides = array<i32>} : memref<1x2x64xf32, #tpu.memory_space<vmem>>, vector<1x1x64xf32>,
    %66 = arith.mulf %57, %57 : vector<32x64xf32>
    %cst_32 = arith.constant dense<0.000000e+00> : vector<64xf32>
    %67 = vector.multi_reduction <add>, %66, %cst_32 [0] : vector<32x64xf32> to vector<64xf32>
    %68 = vector.shape_cast %67 : vector<64xf32> to vector<1x64xf32>
    %c0_33 = arith.constant 0 : index
    %c1_34 = arith.constant 1 : index
    %c0_35 = arith.constant 0 : index
    %69 = vector.load %arg9[%c0_33, %c1_34, %c0_35] : memref<1x2x64xf32, #tpu.memory_space<vmem>>, vector<1x1x64xf32>
    %70 = vector.shape_cast %69 : vector<1x1x64xf32> to vector<1x64xf32>
    %71 = vector.shape_cast %68 : vector<1x64xf32> to vector<1x1x64xf32>
    tpu.vector_store %arg9[%c0_33, %c1_34, %c0_35], %71 {strides = array<i32>} : memref<1x2x64xf32, #tpu.memory_space<vmem>>, vector<1x1x64xf32>,
    return
  }
  func.func @transform_0(%arg0: i32) -> (i32, i32, i32) {
    %c0_i32 = arith.constant 0 : i32
    %c0_i32_0 = arith.constant 0 : i32
    %c0_i32_1 = arith.constant 0 : i32
    return %c0_i32, %arg0, %c0_i32_0 : i32, i32, i32
  }
  func.func @transform_1(%arg0: i32) -> (i32, i32, i32) {
    %c1_i32 = arith.constant 1 : i32
    %0 = arith.muli %arg0, %c1_i32 : i32
    %c1_i32_0 = arith.constant 1 : i32
    %1 = arith.subi %0, %c1_i32_0 : i32
    %c0_i32 = arith.constant 0 : i32
    %2 = arith.maxsi %1, %c0_i32 : i32
    %c0_i32_1 = arith.constant 0 : i32
    %c0_i32_2 = arith.constant 0 : i32
    %c0_i32_3 = arith.constant 0 : i32
    return %c0_i32_1, %2, %c0_i32_2 : i32, i32, i32
  }
  func.func @transform_2(%arg0: i32) -> (i32, i32, i32) {
    %c1_i32 = arith.constant 1 : i32
    %0 = arith.addi %arg0, %c1_i32 : i32
    %c1_i32_0 = arith.constant 1 : i32
    %1 = arith.muli %0, %c1_i32_0 : i32
    %c1_i32_1 = arith.constant 1 : i32
    %2 = arith.minsi %1, %c1_i32_1 : i32
    %c0_i32 = arith.constant 0 : i32
    %c0_i32_2 = arith.constant 0 : i32
    %c0_i32_3 = arith.constant 0 : i32
    return %c0_i32, %2, %c0_i32_2 : i32, i32, i32
  }
  func.func @transform_3(%arg0: i32) -> (i32, i32) {
    %c0_i32 = arith.constant 0 : i32
    %c0_i32_0 = arith.constant 0 : i32
    %c0_i32_1 = arith.constant 0 : i32
    return %c0_i32, %c0_i32_0 : i32, i32
  }
  func.func @transform_4(%arg0: i32) -> (i32, i32) {
    %c0_i32 = arith.constant 0 : i32
    %c0_i32_0 = arith.constant 0 : i32
    %c0_i32_1 = arith.constant 0 : i32
    return %c0_i32, %c0_i32_0 : i32, i32
  }
  func.func @transform_5(%arg0: i32) -> (i32, i32, i32) {
    %c0_i32 = arith.constant 0 : i32
    %c0_i32_0 = arith.constant 0 : i32
    %c0_i32_1 = arith.constant 0 : i32
    %c0_i32_2 = arith.constant 0 : i32
    return %c0_i32, %c0_i32_0, %c0_i32_1 : i32, i32, i32
  }
  func.func @transform_6(%arg0: i32) -> (i32, i32) {
    %c0_i32 = arith.constant 0 : i32
    %c0_i32_0 = arith.constant 0 : i32
    %c0_i32_1 = arith.constant 0 : i32
    return %c0_i32, %c0_i32_0 : i32, i32
  }
  func.func @transform_7(%arg0: i32) -> (i32, i32, i32) {
    %c0_i32 = arith.constant 0 : i32
    %c0_i32_0 = arith.constant 0 : i32
    %c0_i32_1 = arith.constant 0 : i32
    return %c0_i32, %arg0, %c0_i32_0 : i32, i32, i32
  }
  func.func @transform_8(%arg0: i32) -> (i32, i32, i32) {
    %c0_i32 = arith.constant 0 : i32
    %c0_i32_0 = arith.constant 0 : i32
    %c0_i32_1 = arith.constant 0 : i32
    return %arg0, %c0_i32, %c0_i32_0 : i32, i32, i32
  }
}

module attributes {stable_mosaic.version = 11 : i64} {
  func.func @conv_stage_kernel(%arg0: i32, %arg1: memref<2x16x64xbf16, #tpu.memory_space<vmem>>, %arg2: memref<2x16x64xbf16, #tpu.memory_space<vmem>>, %arg3: memref<2x16x64xbf16, #tpu.memory_space<vmem>>, %arg4: memref<1x64xf32, #tpu.memory_space<vmem>>, %arg5: memref<1x64xf32, #tpu.memory_space<vmem>>, %arg6: memref<3x64x128xbf16, #tpu.memory_space<vmem>>, %arg7: memref<1x128xf32, #tpu.memory_space<vmem>>, %arg8: memref<2x16x128xf32, #tpu.memory_space<vmem>>, %arg9: memref<1x2x128xf32, #tpu.memory_space<vmem>>) attributes {dimension_semantics = [#tpu.dimension_semantics<parallel>], iteration_bounds = array<i64: 2>, scalar_prefetch = 0 : i64, scratch_operands = 0 : i64, tpu.core_type = #tpu.core_type<tc>, window_params = [{transform_indices = @transform_0, window_bounds = array<i64: 2, 16, 64>}, {transform_indices = @transform_1, window_bounds = array<i64: 2, 16, 64>}, {transform_indices = @transform_2, window_bounds = array<i64: 2, 16, 64>}, {pipeline_mode = #tpu.pipeline_mode<synchronous>, transform_indices = @transform_3, window_bounds = array<i64: 1, 64>}, {pipeline_mode = #tpu.pipeline_mode<synchronous>, transform_indices = @transform_4, window_bounds = array<i64: 1, 64>}, {pipeline_mode = #tpu.pipeline_mode<synchronous>, transform_indices = @transform_5, window_bounds = array<i64: 3, 64, 128>}, {pipeline_mode = #tpu.pipeline_mode<synchronous>, transform_indices = @transform_6, window_bounds = array<i64: 1, 128>}, {transform_indices = @transform_7, window_bounds = array<i64: 2, 16, 128>}, {transform_indices = @transform_8, window_bounds = array<i64: 1, 2, 128>}]} {
    %c0 = arith.constant 0 : index
    %c0_0 = arith.constant 0 : index
    %0 = vector.load %arg4[%c0, %c0_0] : memref<1x64xf32, #tpu.memory_space<vmem>>, vector<1x64xf32>
    %c0_1 = arith.constant 0 : index
    %c0_2 = arith.constant 0 : index
    %1 = vector.load %arg5[%c0_1, %c0_2] : memref<1x64xf32, #tpu.memory_space<vmem>>, vector<1x64xf32>
    %c0_3 = arith.constant 0 : index
    %c0_4 = arith.constant 0 : index
    %c0_5 = arith.constant 0 : index
    %2 = vector.load %arg1[%c0_3, %c0_4, %c0_5] : memref<2x16x64xbf16, #tpu.memory_space<vmem>>, vector<2x16x64xbf16>
    %3 = arith.extf %2 : vector<2x16x64xbf16> to vector<2x16x64xf32>
    %4 = vector.shape_cast %0 : vector<1x64xf32> to vector<1x1x64xf32>
    %5 = vector.broadcast %4 : vector<1x1x64xf32> to vector<2x16x64xf32>
    %6 = arith.mulf %3, %5 : vector<2x16x64xf32>
    %7 = vector.shape_cast %1 : vector<1x64xf32> to vector<1x1x64xf32>
    %8 = vector.broadcast %7 : vector<1x1x64xf32> to vector<2x16x64xf32>
    %9 = arith.addf %6, %8 : vector<2x16x64xf32>
    %c0_6 = arith.constant 0 : index
    %c15 = arith.constant 15 : index
    %c0_7 = arith.constant 0 : index
    %10 = vector.load %arg2[%c0_6, %c15, %c0_7] : memref<2x16x64xbf16, #tpu.memory_space<vmem>>, vector<2x1x64xbf16>
    %11 = arith.extf %10 : vector<2x1x64xbf16> to vector<2x1x64xf32>
    %12 = vector.shape_cast %0 : vector<1x64xf32> to vector<1x1x64xf32>
    %13 = vector.broadcast %12 : vector<1x1x64xf32> to vector<2x1x64xf32>
    %14 = arith.mulf %11, %13 : vector<2x1x64xf32>
    %15 = vector.shape_cast %1 : vector<1x64xf32> to vector<1x1x64xf32>
    %16 = vector.broadcast %15 : vector<1x1x64xf32> to vector<2x1x64xf32>
    %17 = arith.addf %14, %16 : vector<2x1x64xf32>
    %c0_8 = arith.constant 0 : index
    %c0_9 = arith.constant 0 : index
    %c0_10 = arith.constant 0 : index
    %18 = vector.load %arg3[%c0_8, %c0_9, %c0_10] : memref<2x16x64xbf16, #tpu.memory_space<vmem>>, vector<2x1x64xbf16>
    %19 = arith.extf %18 : vector<2x1x64xbf16> to vector<2x1x64xf32>
    %20 = vector.shape_cast %0 : vector<1x64xf32> to vector<1x1x64xf32>
    %21 = vector.broadcast %20 : vector<1x1x64xf32> to vector<2x1x64xf32>
    %22 = arith.mulf %19, %21 : vector<2x1x64xf32>
    %23 = vector.shape_cast %1 : vector<1x64xf32> to vector<1x1x64xf32>
    %24 = vector.broadcast %23 : vector<1x1x64xf32> to vector<2x1x64xf32>
    %25 = arith.addf %22, %24 : vector<2x1x64xf32>
    %c0_i32 = arith.constant 0 : i32
    %26 = arith.cmpi eq, %arg0, %c0_i32 : i32
    %cst = arith.constant 0.000000e+00 : f32
    %27 = vector.broadcast %cst : f32 to vector<2x1x64xf32>
    %28 = arith.select %26, %27, %17 : vector<2x1x64xf32>
    %c1_i32 = arith.constant 1 : i32
    %29 = arith.cmpi eq, %arg0, %c1_i32 : i32
    %cst_11 = arith.constant 0.000000e+00 : f32
    %30 = vector.broadcast %cst_11 : f32 to vector<2x1x64xf32>
    %31 = arith.select %29, %30, %25 : vector<2x1x64xf32>
    %32 = vector.extract_strided_slice %9 {offsets = [0, 0, 0], sizes = [2, 15, 64], strides = [1, 1, 1]} : vector<2x16x64xf32> to vector<2x15x64xf32>
    %33 = tpu.concatenate %28, %32 in 1 : vector<2x1x64xf32>, vector<2x15x64xf32> -> vector<2x16x64xf32>
    %34 = vector.extract_strided_slice %9 {offsets = [0, 1, 0], sizes = [2, 15, 64], strides = [1, 1, 1]} : vector<2x16x64xf32> to vector<2x15x64xf32>
    %35 = tpu.concatenate %34, %31 in 1 : vector<2x15x64xf32>, vector<2x1x64xf32> -> vector<2x16x64xf32>
    %36 = vector.shape_cast %33 : vector<2x16x64xf32> to vector<32x64xf32>
    %37 = arith.truncf %36 : vector<32x64xf32> to vector<32x64xbf16>
    %c0_12 = arith.constant 0 : index
    %c0_13 = arith.constant 0 : index
    %c0_14 = arith.constant 0 : index
    %38 = vector.load %arg6[%c0_12, %c0_13, %c0_14] : memref<3x64x128xbf16, #tpu.memory_space<vmem>>, vector<1x64x128xbf16>
    %39 = vector.shape_cast %38 : vector<1x64x128xbf16> to vector<64x128xbf16>
    %cst_15 = arith.constant dense<0.000000e+00> : vector<32x128xf32>
    %40 = tpu.matmul %37, %39, %cst_15 {dimension_numbers = #tpu.dot_dimension_numbers<[1], [0], [0], [1], [0, 0, 1, 1], [], []>} : vector<32x64xbf16>, vector<64x128xbf16>, vector<32x128xf32> -> vector<32x128xf32>
    %41 = vector.shape_cast %9 : vector<2x16x64xf32> to vector<32x64xf32>
    %42 = arith.truncf %41 : vector<32x64xf32> to vector<32x64xbf16>
    %c1 = arith.constant 1 : index
    %c0_16 = arith.constant 0 : index
    %c0_17 = arith.constant 0 : index
    %43 = vector.load %arg6[%c1, %c0_16, %c0_17] : memref<3x64x128xbf16, #tpu.memory_space<vmem>>, vector<1x64x128xbf16>
    %44 = vector.shape_cast %43 : vector<1x64x128xbf16> to vector<64x128xbf16>
    %cst_18 = arith.constant dense<0.000000e+00> : vector<32x128xf32>
    %45 = tpu.matmul %42, %44, %cst_18 {dimension_numbers = #tpu.dot_dimension_numbers<[1], [0], [0], [1], [0, 0, 1, 1], [], []>} : vector<32x64xbf16>, vector<64x128xbf16>, vector<32x128xf32> -> vector<32x128xf32>
    %46 = arith.addf %40, %45 : vector<32x128xf32>
    %47 = vector.shape_cast %35 : vector<2x16x64xf32> to vector<32x64xf32>
    %48 = arith.truncf %47 : vector<32x64xf32> to vector<32x64xbf16>
    %c2 = arith.constant 2 : index
    %c0_19 = arith.constant 0 : index
    %c0_20 = arith.constant 0 : index
    %49 = vector.load %arg6[%c2, %c0_19, %c0_20] : memref<3x64x128xbf16, #tpu.memory_space<vmem>>, vector<1x64x128xbf16>
    %50 = vector.shape_cast %49 : vector<1x64x128xbf16> to vector<64x128xbf16>
    %cst_21 = arith.constant dense<0.000000e+00> : vector<32x128xf32>
    %51 = tpu.matmul %48, %50, %cst_21 {dimension_numbers = #tpu.dot_dimension_numbers<[1], [0], [0], [1], [0, 0, 1, 1], [], []>} : vector<32x64xbf16>, vector<64x128xbf16>, vector<32x128xf32> -> vector<32x128xf32>
    %52 = arith.addf %46, %51 : vector<32x128xf32>
    %c0_22 = arith.constant 0 : index
    %c0_23 = arith.constant 0 : index
    %53 = vector.load %arg7[%c0_22, %c0_23] : memref<1x128xf32, #tpu.memory_space<vmem>>, vector<1x128xf32>
    %54 = vector.broadcast %53 : vector<1x128xf32> to vector<32x128xf32>
    %55 = arith.addf %52, %54 : vector<32x128xf32>
    %cst_24 = arith.constant 0.000000e+00 : f32
    %56 = vector.broadcast %cst_24 : f32 to vector<32x128xf32>
    %57 = arith.maximumf %55, %56 : vector<32x128xf32>
    %58 = vector.shape_cast %57 : vector<32x128xf32> to vector<2x16x128xf32>
    %c0_25 = arith.constant 0 : index
    %c0_26 = arith.constant 0 : index
    %c0_27 = arith.constant 0 : index
    %59 = vector.load %arg8[%c0_25, %c0_26, %c0_27] : memref<2x16x128xf32, #tpu.memory_space<vmem>>, vector<2x16x128xf32>
    tpu.vector_store %arg8[%c0_25, %c0_26, %c0_27], %58 {strides = array<i32>} : memref<2x16x128xf32, #tpu.memory_space<vmem>>, vector<2x16x128xf32>,
    %cst_28 = arith.constant dense<0.000000e+00> : vector<128xf32>
    %60 = vector.multi_reduction <add>, %57, %cst_28 [0] : vector<32x128xf32> to vector<128xf32>
    %61 = vector.shape_cast %60 : vector<128xf32> to vector<1x128xf32>
    %c0_29 = arith.constant 0 : index
    %c0_30 = arith.constant 0 : index
    %c0_31 = arith.constant 0 : index
    %62 = vector.load %arg9[%c0_29, %c0_30, %c0_31] : memref<1x2x128xf32, #tpu.memory_space<vmem>>, vector<1x1x128xf32>
    %63 = vector.shape_cast %62 : vector<1x1x128xf32> to vector<1x128xf32>
    %64 = vector.shape_cast %61 : vector<1x128xf32> to vector<1x1x128xf32>
    tpu.vector_store %arg9[%c0_29, %c0_30, %c0_31], %64 {strides = array<i32>} : memref<1x2x128xf32, #tpu.memory_space<vmem>>, vector<1x1x128xf32>,
    %65 = arith.mulf %57, %57 : vector<32x128xf32>
    %cst_32 = arith.constant dense<0.000000e+00> : vector<128xf32>
    %66 = vector.multi_reduction <add>, %65, %cst_32 [0] : vector<32x128xf32> to vector<128xf32>
    %67 = vector.shape_cast %66 : vector<128xf32> to vector<1x128xf32>
    %c0_33 = arith.constant 0 : index
    %c1_34 = arith.constant 1 : index
    %c0_35 = arith.constant 0 : index
    %68 = vector.load %arg9[%c0_33, %c1_34, %c0_35] : memref<1x2x128xf32, #tpu.memory_space<vmem>>, vector<1x1x128xf32>
    %69 = vector.shape_cast %68 : vector<1x1x128xf32> to vector<1x128xf32>
    %70 = vector.shape_cast %67 : vector<1x128xf32> to vector<1x1x128xf32>
    tpu.vector_store %arg9[%c0_33, %c1_34, %c0_35], %70 {strides = array<i32>} : memref<1x2x128xf32, #tpu.memory_space<vmem>>, vector<1x1x128xf32>,
    return
  }
  func.func @transform_0(%arg0: i32) -> (i32, i32, i32) {
    %c0_i32 = arith.constant 0 : i32
    %c0_i32_0 = arith.constant 0 : i32
    %c0_i32_1 = arith.constant 0 : i32
    return %c0_i32, %arg0, %c0_i32_0 : i32, i32, i32
  }
  func.func @transform_1(%arg0: i32) -> (i32, i32, i32) {
    %c1_i32 = arith.constant 1 : i32
    %0 = arith.muli %arg0, %c1_i32 : i32
    %c1_i32_0 = arith.constant 1 : i32
    %1 = arith.subi %0, %c1_i32_0 : i32
    %c0_i32 = arith.constant 0 : i32
    %2 = arith.maxsi %1, %c0_i32 : i32
    %c0_i32_1 = arith.constant 0 : i32
    %c0_i32_2 = arith.constant 0 : i32
    %c0_i32_3 = arith.constant 0 : i32
    return %c0_i32_1, %2, %c0_i32_2 : i32, i32, i32
  }
  func.func @transform_2(%arg0: i32) -> (i32, i32, i32) {
    %c1_i32 = arith.constant 1 : i32
    %0 = arith.addi %arg0, %c1_i32 : i32
    %c1_i32_0 = arith.constant 1 : i32
    %1 = arith.muli %0, %c1_i32_0 : i32
    %c1_i32_1 = arith.constant 1 : i32
    %2 = arith.minsi %1, %c1_i32_1 : i32
    %c0_i32 = arith.constant 0 : i32
    %c0_i32_2 = arith.constant 0 : i32
    %c0_i32_3 = arith.constant 0 : i32
    return %c0_i32, %2, %c0_i32_2 : i32, i32, i32
  }
  func.func @transform_3(%arg0: i32) -> (i32, i32) {
    %c0_i32 = arith.constant 0 : i32
    %c0_i32_0 = arith.constant 0 : i32
    %c0_i32_1 = arith.constant 0 : i32
    return %c0_i32, %c0_i32_0 : i32, i32
  }
  func.func @transform_4(%arg0: i32) -> (i32, i32) {
    %c0_i32 = arith.constant 0 : i32
    %c0_i32_0 = arith.constant 0 : i32
    %c0_i32_1 = arith.constant 0 : i32
    return %c0_i32, %c0_i32_0 : i32, i32
  }
  func.func @transform_5(%arg0: i32) -> (i32, i32, i32) {
    %c0_i32 = arith.constant 0 : i32
    %c0_i32_0 = arith.constant 0 : i32
    %c0_i32_1 = arith.constant 0 : i32
    %c0_i32_2 = arith.constant 0 : i32
    return %c0_i32, %c0_i32_0, %c0_i32_1 : i32, i32, i32
  }
  func.func @transform_6(%arg0: i32) -> (i32, i32) {
    %c0_i32 = arith.constant 0 : i32
    %c0_i32_0 = arith.constant 0 : i32
    %c0_i32_1 = arith.constant 0 : i32
    return %c0_i32, %c0_i32_0 : i32, i32
  }
  func.func @transform_7(%arg0: i32) -> (i32, i32, i32) {
    %c0_i32 = arith.constant 0 : i32
    %c0_i32_0 = arith.constant 0 : i32
    %c0_i32_1 = arith.constant 0 : i32
    return %c0_i32, %arg0, %c0_i32_0 : i32, i32, i32
  }
  func.func @transform_8(%arg0: i32) -> (i32, i32, i32) {
    %c0_i32 = arith.constant 0 : i32
    %c0_i32_0 = arith.constant 0 : i32
    %c0_i32_1 = arith.constant 0 : i32
    return %arg0, %c0_i32, %c0_i32_0 : i32, i32, i32
  }
}

module attributes {stable_mosaic.version = 11 : i64} {
  func.func @conv_pool_stage_kernel(%arg0: i32, %arg1: memref<2x32x128xf32, #tpu.memory_space<vmem>>, %arg2: memref<2x16x128xf32, #tpu.memory_space<vmem>>, %arg3: memref<2x16x128xf32, #tpu.memory_space<vmem>>, %arg4: memref<1x128xf32, #tpu.memory_space<vmem>>, %arg5: memref<1x128xf32, #tpu.memory_space<vmem>>, %arg6: memref<3x128x128xbf16, #tpu.memory_space<vmem>>, %arg7: memref<1x128xf32, #tpu.memory_space<vmem>>, %arg8: memref<2x16x128xbf16, #tpu.memory_space<vmem>>, %arg9: memref<1x2x128xf32, #tpu.memory_space<vmem>>) attributes {dimension_semantics = [#tpu.dimension_semantics<parallel>], iteration_bounds = array<i64: 1>, scalar_prefetch = 0 : i64, scratch_operands = 0 : i64, tpu.core_type = #tpu.core_type<tc>, window_params = [{transform_indices = @transform_0, window_bounds = array<i64: 2, 32, 128>}, {transform_indices = @transform_1, window_bounds = array<i64: 2, 16, 128>}, {transform_indices = @transform_2, window_bounds = array<i64: 2, 16, 128>}, {pipeline_mode = #tpu.pipeline_mode<synchronous>, transform_indices = @transform_3, window_bounds = array<i64: 1, 128>}, {pipeline_mode = #tpu.pipeline_mode<synchronous>, transform_indices = @transform_4, window_bounds = array<i64: 1, 128>}, {pipeline_mode = #tpu.pipeline_mode<synchronous>, transform_indices = @transform_5, window_bounds = array<i64: 3, 128, 128>}, {pipeline_mode = #tpu.pipeline_mode<synchronous>, transform_indices = @transform_6, window_bounds = array<i64: 1, 128>}, {transform_indices = @transform_7, window_bounds = array<i64: 2, 16, 128>}, {transform_indices = @transform_8, window_bounds = array<i64: 1, 2, 128>}]} {
    %c0 = arith.constant 0 : index
    %c0_0 = arith.constant 0 : index
    %0 = vector.load %arg4[%c0, %c0_0] : memref<1x128xf32, #tpu.memory_space<vmem>>, vector<1x128xf32>
    %c0_1 = arith.constant 0 : index
    %c0_2 = arith.constant 0 : index
    %1 = vector.load %arg5[%c0_1, %c0_2] : memref<1x128xf32, #tpu.memory_space<vmem>>, vector<1x128xf32>
    %c0_3 = arith.constant 0 : index
    %c0_4 = arith.constant 0 : index
    %c0_5 = arith.constant 0 : index
    %2 = tpu.strided_load %arg1[%c0_3, %c0_4, %c0_5] {strides = array<i32: 1, 2, 1>} : memref<2x32x128xf32, #tpu.memory_space<vmem>>, vector<2x16x128xf32>
    %3 = vector.shape_cast %0 : vector<1x128xf32> to vector<1x1x128xf32>
    %4 = vector.broadcast %3 : vector<1x1x128xf32> to vector<2x16x128xf32>
    %5 = arith.mulf %2, %4 : vector<2x16x128xf32>
    %6 = vector.shape_cast %1 : vector<1x128xf32> to vector<1x1x128xf32>
    %7 = vector.broadcast %6 : vector<1x1x128xf32> to vector<2x16x128xf32>
    %8 = arith.addf %5, %7 : vector<2x16x128xf32>
    %c0_6 = arith.constant 0 : index
    %c1 = arith.constant 1 : index
    %c0_7 = arith.constant 0 : index
    %9 = tpu.strided_load %arg1[%c0_6, %c1, %c0_7] {strides = array<i32: 1, 2, 1>} : memref<2x32x128xf32, #tpu.memory_space<vmem>>, vector<2x16x128xf32>
    %10 = vector.shape_cast %0 : vector<1x128xf32> to vector<1x1x128xf32>
    %11 = vector.broadcast %10 : vector<1x1x128xf32> to vector<2x16x128xf32>
    %12 = arith.mulf %9, %11 : vector<2x16x128xf32>
    %13 = vector.shape_cast %1 : vector<1x128xf32> to vector<1x1x128xf32>
    %14 = vector.broadcast %13 : vector<1x1x128xf32> to vector<2x16x128xf32>
    %15 = arith.addf %12, %14 : vector<2x16x128xf32>
    %16 = arith.maximumf %8, %15 : vector<2x16x128xf32>
    %c0_8 = arith.constant 0 : index
    %c14 = arith.constant 14 : index
    %c0_9 = arith.constant 0 : index
    %17 = vector.load %arg2[%c0_8, %c14, %c0_9] : memref<2x16x128xf32, #tpu.memory_space<vmem>>, vector<2x2x128xf32>
    %18 = vector.shape_cast %0 : vector<1x128xf32> to vector<1x1x128xf32>
    %19 = vector.broadcast %18 : vector<1x1x128xf32> to vector<2x2x128xf32>
    %20 = arith.mulf %17, %19 : vector<2x2x128xf32>
    %21 = vector.shape_cast %1 : vector<1x128xf32> to vector<1x1x128xf32>
    %22 = vector.broadcast %21 : vector<1x1x128xf32> to vector<2x2x128xf32>
    %23 = arith.addf %20, %22 : vector<2x2x128xf32>
    %c0_10 = arith.constant 0 : index
    %c0_11 = arith.constant 0 : index
    %c0_12 = arith.constant 0 : index
    %24 = vector.load %arg3[%c0_10, %c0_11, %c0_12] : memref<2x16x128xf32, #tpu.memory_space<vmem>>, vector<2x2x128xf32>
    %25 = vector.shape_cast %0 : vector<1x128xf32> to vector<1x1x128xf32>
    %26 = vector.broadcast %25 : vector<1x1x128xf32> to vector<2x2x128xf32>
    %27 = arith.mulf %24, %26 : vector<2x2x128xf32>
    %28 = vector.shape_cast %1 : vector<1x128xf32> to vector<1x1x128xf32>
    %29 = vector.broadcast %28 : vector<1x1x128xf32> to vector<2x2x128xf32>
    %30 = arith.addf %27, %29 : vector<2x2x128xf32>
    %31 = vector.extract_strided_slice %23 {offsets = [0, 0, 0], sizes = [2, 1, 128], strides = [1, 1, 1]} : vector<2x2x128xf32> to vector<2x1x128xf32>
    %32 = vector.extract_strided_slice %23 {offsets = [0, 1, 0], sizes = [2, 1, 128], strides = [1, 1, 1]} : vector<2x2x128xf32> to vector<2x1x128xf32>
    %33 = arith.maximumf %31, %32 : vector<2x1x128xf32>
    %34 = vector.extract_strided_slice %30 {offsets = [0, 0, 0], sizes = [2, 1, 128], strides = [1, 1, 1]} : vector<2x2x128xf32> to vector<2x1x128xf32>
    %35 = vector.extract_strided_slice %30 {offsets = [0, 1, 0], sizes = [2, 1, 128], strides = [1, 1, 1]} : vector<2x2x128xf32> to vector<2x1x128xf32>
    %36 = arith.maximumf %34, %35 : vector<2x1x128xf32>
    %c0_i32 = arith.constant 0 : i32
    %37 = arith.cmpi eq, %arg0, %c0_i32 : i32
    %cst = arith.constant 0.000000e+00 : f32
    %38 = vector.broadcast %cst : f32 to vector<2x1x128xf32>
    %39 = arith.select %37, %38, %33 : vector<2x1x128xf32>
    %c0_i32_13 = arith.constant 0 : i32
    %40 = arith.cmpi eq, %arg0, %c0_i32_13 : i32
    %cst_14 = arith.constant 0.000000e+00 : f32
    %41 = vector.broadcast %cst_14 : f32 to vector<2x1x128xf32>
    %42 = arith.select %40, %41, %36 : vector<2x1x128xf32>
    %43 = vector.extract_strided_slice %16 {offsets = [0, 0, 0], sizes = [2, 15, 128], strides = [1, 1, 1]} : vector<2x16x128xf32> to vector<2x15x128xf32>
    %44 = tpu.concatenate %39, %43 in 1 : vector<2x1x128xf32>, vector<2x15x128xf32> -> vector<2x16x128xf32>
    %45 = vector.extract_strided_slice %16 {offsets = [0, 1, 0], sizes = [2, 15, 128], strides = [1, 1, 1]} : vector<2x16x128xf32> to vector<2x15x128xf32>
    %46 = tpu.concatenate %45, %42 in 1 : vector<2x15x128xf32>, vector<2x1x128xf32> -> vector<2x16x128xf32>
    %47 = vector.shape_cast %44 : vector<2x16x128xf32> to vector<32x128xf32>
    %48 = arith.truncf %47 : vector<32x128xf32> to vector<32x128xbf16>
    %c0_15 = arith.constant 0 : index
    %c0_16 = arith.constant 0 : index
    %c0_17 = arith.constant 0 : index
    %49 = vector.load %arg6[%c0_15, %c0_16, %c0_17] : memref<3x128x128xbf16, #tpu.memory_space<vmem>>, vector<1x128x128xbf16>
    %50 = vector.shape_cast %49 : vector<1x128x128xbf16> to vector<128x128xbf16>
    %cst_18 = arith.constant dense<0.000000e+00> : vector<32x128xf32>
    %51 = tpu.matmul %48, %50, %cst_18 {dimension_numbers = #tpu.dot_dimension_numbers<[1], [0], [0], [1], [0, 0, 1, 1], [], []>} : vector<32x128xbf16>, vector<128x128xbf16>, vector<32x128xf32> -> vector<32x128xf32>
    %52 = vector.shape_cast %16 : vector<2x16x128xf32> to vector<32x128xf32>
    %53 = arith.truncf %52 : vector<32x128xf32> to vector<32x128xbf16>
    %c1_19 = arith.constant 1 : index
    %c0_20 = arith.constant 0 : index
    %c0_21 = arith.constant 0 : index
    %54 = vector.load %arg6[%c1_19, %c0_20, %c0_21] : memref<3x128x128xbf16, #tpu.memory_space<vmem>>, vector<1x128x128xbf16>
    %55 = vector.shape_cast %54 : vector<1x128x128xbf16> to vector<128x128xbf16>
    %cst_22 = arith.constant dense<0.000000e+00> : vector<32x128xf32>
    %56 = tpu.matmul %53, %55, %cst_22 {dimension_numbers = #tpu.dot_dimension_numbers<[1], [0], [0], [1], [0, 0, 1, 1], [], []>} : vector<32x128xbf16>, vector<128x128xbf16>, vector<32x128xf32> -> vector<32x128xf32>
    %57 = arith.addf %51, %56 : vector<32x128xf32>
    %58 = vector.shape_cast %46 : vector<2x16x128xf32> to vector<32x128xf32>
    %59 = arith.truncf %58 : vector<32x128xf32> to vector<32x128xbf16>
    %c2 = arith.constant 2 : index
    %c0_23 = arith.constant 0 : index
    %c0_24 = arith.constant 0 : index
    %60 = vector.load %arg6[%c2, %c0_23, %c0_24] : memref<3x128x128xbf16, #tpu.memory_space<vmem>>, vector<1x128x128xbf16>
    %61 = vector.shape_cast %60 : vector<1x128x128xbf16> to vector<128x128xbf16>
    %cst_25 = arith.constant dense<0.000000e+00> : vector<32x128xf32>
    %62 = tpu.matmul %59, %61, %cst_25 {dimension_numbers = #tpu.dot_dimension_numbers<[1], [0], [0], [1], [0, 0, 1, 1], [], []>} : vector<32x128xbf16>, vector<128x128xbf16>, vector<32x128xf32> -> vector<32x128xf32>
    %63 = arith.addf %57, %62 : vector<32x128xf32>
    %c0_26 = arith.constant 0 : index
    %c0_27 = arith.constant 0 : index
    %64 = vector.load %arg7[%c0_26, %c0_27] : memref<1x128xf32, #tpu.memory_space<vmem>>, vector<1x128xf32>
    %65 = vector.broadcast %64 : vector<1x128xf32> to vector<32x128xf32>
    %66 = arith.addf %63, %65 : vector<32x128xf32>
    %cst_28 = arith.constant 0.000000e+00 : f32
    %67 = vector.broadcast %cst_28 : f32 to vector<32x128xf32>
    %68 = arith.maximumf %66, %67 : vector<32x128xf32>
    %69 = vector.shape_cast %68 : vector<32x128xf32> to vector<2x16x128xf32>
    %70 = arith.truncf %69 : vector<2x16x128xf32> to vector<2x16x128xbf16>
    %c0_29 = arith.constant 0 : index
    %c0_30 = arith.constant 0 : index
    %c0_31 = arith.constant 0 : index
    %71 = vector.load %arg8[%c0_29, %c0_30, %c0_31] : memref<2x16x128xbf16, #tpu.memory_space<vmem>>, vector<2x16x128xbf16>
    tpu.vector_store %arg8[%c0_29, %c0_30, %c0_31], %70 {strides = array<i32>} : memref<2x16x128xbf16, #tpu.memory_space<vmem>>, vector<2x16x128xbf16>,
    %cst_32 = arith.constant dense<0.000000e+00> : vector<128xf32>
    %72 = vector.multi_reduction <add>, %68, %cst_32 [0] : vector<32x128xf32> to vector<128xf32>
    %73 = vector.shape_cast %72 : vector<128xf32> to vector<1x128xf32>
    %c0_33 = arith.constant 0 : index
    %c0_34 = arith.constant 0 : index
    %c0_35 = arith.constant 0 : index
    %74 = vector.load %arg9[%c0_33, %c0_34, %c0_35] : memref<1x2x128xf32, #tpu.memory_space<vmem>>, vector<1x1x128xf32>
    %75 = vector.shape_cast %74 : vector<1x1x128xf32> to vector<1x128xf32>
    %76 = vector.shape_cast %73 : vector<1x128xf32> to vector<1x1x128xf32>
    tpu.vector_store %arg9[%c0_33, %c0_34, %c0_35], %76 {strides = array<i32>} : memref<1x2x128xf32, #tpu.memory_space<vmem>>, vector<1x1x128xf32>,
    %77 = arith.mulf %68, %68 : vector<32x128xf32>
    %cst_36 = arith.constant dense<0.000000e+00> : vector<128xf32>
    %78 = vector.multi_reduction <add>, %77, %cst_36 [0] : vector<32x128xf32> to vector<128xf32>
    %79 = vector.shape_cast %78 : vector<128xf32> to vector<1x128xf32>
    %c0_37 = arith.constant 0 : index
    %c1_38 = arith.constant 1 : index
    %c0_39 = arith.constant 0 : index
    %80 = vector.load %arg9[%c0_37, %c1_38, %c0_39] : memref<1x2x128xf32, #tpu.memory_space<vmem>>, vector<1x1x128xf32>
    %81 = vector.shape_cast %80 : vector<1x1x128xf32> to vector<1x128xf32>
    %82 = vector.shape_cast %79 : vector<1x128xf32> to vector<1x1x128xf32>
    tpu.vector_store %arg9[%c0_37, %c1_38, %c0_39], %82 {strides = array<i32>} : memref<1x2x128xf32, #tpu.memory_space<vmem>>, vector<1x1x128xf32>,
    return
  }
  func.func @transform_0(%arg0: i32) -> (i32, i32, i32) {
    %c0_i32 = arith.constant 0 : i32
    %c0_i32_0 = arith.constant 0 : i32
    %c0_i32_1 = arith.constant 0 : i32
    return %c0_i32, %arg0, %c0_i32_0 : i32, i32, i32
  }
  func.func @transform_1(%arg0: i32) -> (i32, i32, i32) {
    %c2_i32 = arith.constant 2 : i32
    %0 = arith.muli %arg0, %c2_i32 : i32
    %c1_i32 = arith.constant 1 : i32
    %1 = arith.subi %0, %c1_i32 : i32
    %c0_i32 = arith.constant 0 : i32
    %2 = arith.maxsi %1, %c0_i32 : i32
    %c0_i32_0 = arith.constant 0 : i32
    %c0_i32_1 = arith.constant 0 : i32
    %c0_i32_2 = arith.constant 0 : i32
    return %c0_i32_0, %2, %c0_i32_1 : i32, i32, i32
  }
  func.func @transform_2(%arg0: i32) -> (i32, i32, i32) {
    %c1_i32 = arith.constant 1 : i32
    %0 = arith.addi %arg0, %c1_i32 : i32
    %c2_i32 = arith.constant 2 : i32
    %1 = arith.muli %0, %c2_i32 : i32
    %c1_i32_0 = arith.constant 1 : i32
    %2 = arith.minsi %1, %c1_i32_0 : i32
    %c0_i32 = arith.constant 0 : i32
    %c0_i32_1 = arith.constant 0 : i32
    %c0_i32_2 = arith.constant 0 : i32
    return %c0_i32, %2, %c0_i32_1 : i32, i32, i32
  }
  func.func @transform_3(%arg0: i32) -> (i32, i32) {
    %c0_i32 = arith.constant 0 : i32
    %c0_i32_0 = arith.constant 0 : i32
    %c0_i32_1 = arith.constant 0 : i32
    return %c0_i32, %c0_i32_0 : i32, i32
  }
  func.func @transform_4(%arg0: i32) -> (i32, i32) {
    %c0_i32 = arith.constant 0 : i32
    %c0_i32_0 = arith.constant 0 : i32
    %c0_i32_1 = arith.constant 0 : i32
    return %c0_i32, %c0_i32_0 : i32, i32
  }
  func.func @transform_5(%arg0: i32) -> (i32, i32, i32) {
    %c0_i32 = arith.constant 0 : i32
    %c0_i32_0 = arith.constant 0 : i32
    %c0_i32_1 = arith.constant 0 : i32
    %c0_i32_2 = arith.constant 0 : i32
    return %c0_i32, %c0_i32_0, %c0_i32_1 : i32, i32, i32
  }
  func.func @transform_6(%arg0: i32) -> (i32, i32) {
    %c0_i32 = arith.constant 0 : i32
    %c0_i32_0 = arith.constant 0 : i32
    %c0_i32_1 = arith.constant 0 : i32
    return %c0_i32, %c0_i32_0 : i32, i32
  }
  func.func @transform_7(%arg0: i32) -> (i32, i32, i32) {
    %c0_i32 = arith.constant 0 : i32
    %c0_i32_0 = arith.constant 0 : i32
    %c0_i32_1 = arith.constant 0 : i32
    return %c0_i32, %arg0, %c0_i32_0 : i32, i32, i32
  }
  func.func @transform_8(%arg0: i32) -> (i32, i32, i32) {
    %c0_i32 = arith.constant 0 : i32
    %c0_i32_0 = arith.constant 0 : i32
    %c0_i32_1 = arith.constant 0 : i32
    return %arg0, %c0_i32, %c0_i32_0 : i32, i32, i32
  }
}

module attributes {stable_mosaic.version = 11 : i64} {
  func.func @finalize_kernel(%arg0: i32, %arg1: memref<2x16x128xbf16, #tpu.memory_space<vmem>>, %arg2: memref<1x128xf32, #tpu.memory_space<vmem>>, %arg3: memref<1x128xf32, #tpu.memory_space<vmem>>, %arg4: memref<2x1x100xf32, #tpu.memory_space<vmem>>, %arg5: memref<2x16x128xf32, #tpu.memory_space<vmem>>, %arg6: memref<2x16x228xf32, #tpu.memory_space<vmem>>) attributes {dimension_semantics = [#tpu.dimension_semantics<parallel>], iteration_bounds = array<i64: 1>, scalar_prefetch = 0 : i64, scratch_operands = 0 : i64, tpu.core_type = #tpu.core_type<tc>, window_params = [{transform_indices = @transform_0, window_bounds = array<i64: 2, 16, 128>}, {pipeline_mode = #tpu.pipeline_mode<synchronous>, transform_indices = @transform_1, window_bounds = array<i64: 1, 128>}, {pipeline_mode = #tpu.pipeline_mode<synchronous>, transform_indices = @transform_2, window_bounds = array<i64: 1, 128>}, {pipeline_mode = #tpu.pipeline_mode<synchronous>, transform_indices = @transform_3, window_bounds = array<i64: 2, 1, 100>}, {transform_indices = @transform_4, window_bounds = array<i64: 2, 16, 128>}, {transform_indices = @transform_5, window_bounds = array<i64: 2, 16, 228>}]} {
    %c0 = arith.constant 0 : index
    %c0_0 = arith.constant 0 : index
    %c0_1 = arith.constant 0 : index
    %0 = vector.load %arg1[%c0, %c0_0, %c0_1] : memref<2x16x128xbf16, #tpu.memory_space<vmem>>, vector<2x16x128xbf16>
    %1 = arith.extf %0 : vector<2x16x128xbf16> to vector<2x16x128xf32>
    %c0_2 = arith.constant 0 : index
    %c0_3 = arith.constant 0 : index
    %2 = vector.load %arg2[%c0_2, %c0_3] : memref<1x128xf32, #tpu.memory_space<vmem>>, vector<1x128xf32>
    %3 = vector.shape_cast %2 : vector<1x128xf32> to vector<1x1x128xf32>
    %4 = vector.broadcast %3 : vector<1x1x128xf32> to vector<2x16x128xf32>
    %5 = arith.mulf %1, %4 : vector<2x16x128xf32>
    %c0_4 = arith.constant 0 : index
    %c0_5 = arith.constant 0 : index
    %6 = vector.load %arg3[%c0_4, %c0_5] : memref<1x128xf32, #tpu.memory_space<vmem>>, vector<1x128xf32>
    %7 = vector.shape_cast %6 : vector<1x128xf32> to vector<1x1x128xf32>
    %8 = vector.broadcast %7 : vector<1x1x128xf32> to vector<2x16x128xf32>
    %9 = arith.addf %5, %8 : vector<2x16x128xf32>
    %c0_6 = arith.constant 0 : index
    %c0_7 = arith.constant 0 : index
    %c0_8 = arith.constant 0 : index
    %10 = vector.load %arg5[%c0_6, %c0_7, %c0_8] : memref<2x16x128xf32, #tpu.memory_space<vmem>>, vector<2x16x128xf32>
    tpu.vector_store %arg5[%c0_6, %c0_7, %c0_8], %9 {strides = array<i32>} : memref<2x16x128xf32, #tpu.memory_space<vmem>>, vector<2x16x128xf32>,
    %c0_9 = arith.constant 0 : index
    %c0_10 = arith.constant 0 : index
    %c0_11 = arith.constant 0 : index
    %11 = vector.load %arg6[%c0_9, %c0_10, %c0_11] : memref<2x16x228xf32, #tpu.memory_space<vmem>>, vector<2x16x128xf32>
    tpu.vector_store %arg6[%c0_9, %c0_10, %c0_11], %9 {strides = array<i32>} : memref<2x16x228xf32, #tpu.memory_space<vmem>>, vector<2x16x128xf32>,
    %c0_12 = arith.constant 0 : index
    %c0_13 = arith.constant 0 : index
    %c0_14 = arith.constant 0 : index
    %12 = vector.load %arg4[%c0_12, %c0_13, %c0_14] : memref<2x1x100xf32, #tpu.memory_space<vmem>>, vector<2x1x100xf32>
    %13 = vector.shape_cast %12 : vector<2x1x100xf32> to vector<2x1x100xf32>
    %14 = vector.broadcast %13 : vector<2x1x100xf32> to vector<2x16x100xf32>
    %c0_15 = arith.constant 0 : index
    %c0_16 = arith.constant 0 : index
    %c128 = arith.constant 128 : index
    %15 = vector.load %arg6[%c0_15, %c0_16, %c128] : memref<2x16x228xf32, #tpu.memory_space<vmem>>, vector<2x16x100xf32>
    tpu.vector_store %arg6[%c0_15, %c0_16, %c128], %14 {strides = array<i32>} : memref<2x16x228xf32, #tpu.memory_space<vmem>>, vector<2x16x100xf32>,
    return
  }
  func.func @transform_0(%arg0: i32) -> (i32, i32, i32) {
    %c0_i32 = arith.constant 0 : i32
    %c0_i32_0 = arith.constant 0 : i32
    %c0_i32_1 = arith.constant 0 : i32
    return %c0_i32, %arg0, %c0_i32_0 : i32, i32, i32
  }
  func.func @transform_1(%arg0: i32) -> (i32, i32) {
    %c0_i32 = arith.constant 0 : i32
    %c0_i32_0 = arith.constant 0 : i32
    %c0_i32_1 = arith.constant 0 : i32
    return %c0_i32, %c0_i32_0 : i32, i32
  }
  func.func @transform_2(%arg0: i32) -> (i32, i32) {
    %c0_i32 = arith.constant 0 : i32
    %c0_i32_0 = arith.constant 0 : i32
    %c0_i32_1 = arith.constant 0 : i32
    return %c0_i32, %c0_i32_0 : i32, i32
  }
  func.func @transform_3(%arg0: i32) -> (i32, i32, i32) {
    %c0_i32 = arith.constant 0 : i32
    %c0_i32_0 = arith.constant 0 : i32
    %c0_i32_1 = arith.constant 0 : i32
    %c0_i32_2 = arith.constant 0 : i32
    return %c0_i32, %c0_i32_0, %c0_i32_1 : i32, i32, i32
  }
  func.func @transform_4(%arg0: i32) -> (i32, i32, i32) {
    %c0_i32 = arith.constant 0 : i32
    %c0_i32_0 = arith.constant 0 : i32
    %c0_i32_1 = arith.constant 0 : i32
    return %c0_i32, %arg0, %c0_i32_0 : i32, i32, i32
  }
  func.func @transform_5(%arg0: i32) -> (i32, i32, i32) {
    %c0_i32 = arith.constant 0 : i32
    %c0_i32_0 = arith.constant 0 : i32
    %c0_i32_1 = arith.constant 0 : i32
    return %c0_i32, %arg0, %c0_i32_0 : i32, i32, i32
  }
}

</mosaic_0001>

<bundles_post_ra>
// kernel: _lambda_.5
= control target key start
LH: loop header
LB: loop body
LE: loop exit
PB: predicated region body
PF: predicated region fallthrough
CT: control target
= control target key end

     0   :  { %s1393_s27 = smov 0   ;;  %s1395_s28 = smov 0   ;;  %s1665_s0 = inlined_call_operand.vmem [shape: f32[2,32,40], index: 0, kind: input, shape index: {}, may-alias: {0,1,2}]   ;;  %s1666_s1 = inlined_call_operand.vmem [shape: f32[2,32,40], index: 1, kind: input, shape index: {}, may-alias: {0,1,2}]   ;;  %s1667_s2 = inlined_call_operand.vmem [shape: f32[2,32,40], index: 2, kind: input, shape index: {}, may-alias: {0,1,2}]   ;;  %s1668_s3 = inlined_call_operand.vmem [shape: f32[1,40], index: 3, kind: input, shape index: {}]   ;;  %s1669_s4 = inlined_call_operand.vmem [shape: f32[1,40], index: 4, kind: input, shape index: {}]   ;;  %s1670_s5 = inlined_call_operand.vmem [shape: bf16[3,40,64], index: 5, kind: input, shape index: {}]   ;;  %s1671_s6 = inlined_call_operand.vmem [shape: f32[1,64], index: 6, kind: input, shape index: {}]   ;;  %s1672_s7 = inlined_call_operand.vmem [shape: bf16[2,32,64], index: 7, kind: output, shape index: {0}]   ;;  %s1673_s8 = inlined_call_operand.vmem [shape: f32[2,2,64], index: 8, kind: output, shape index: {1}]  }
   0x1   :  { %s1397_s29 = smov 0   ;;  %s1399_s30 = smov 0  }
   0x2   :  { %s1401_s9 = smov 0   ;;  %s1403_s10 = smov 0  }
   0x3   :  { %s1405_s11 = smov 0  }
   0x4 LB: > { %1677 = sst [smem:[#allocation6_spill]] %s1342_s10  ;;  %s1429_s12 = sadd.s32 4294967295, %s1346_s11   ;;  %s1346_s11 = sphi %s1405_s11, %s1687_s11   ;;  %s1342_s10 = sphi %s1403_s10, %s1690_s10   ;;  %s1338_s9 = sphi %s1401_s9, %s1689_s9   ;;  %s1334_s30 = sphi %s1399_s30, %s1694_s30   ;;  %s1330_s29 = sphi %s1397_s29, %s1693_s29   ;;  %s1326_s28 = sphi %s1395_s28, %s1692_s28   ;;  %s1322_s27 = sphi %s1393_s27, %s1691_s27  }
   0x5   : > { %s1432_s13 = sadd.s32 1, %s1346_s11   ;;  %s26_s15 = sadd.s32 1, %s1342_s10 }
   0x6   : > { %1678 = sst [smem:[#allocation7_spill]] %s1432_s13  ;;  %s23_s14 = ssub.s32 %s1346_s11, %s1432_s13 }
   0x7   : > { %p24_p0 = scmp.eq.s32.totalorder %s23_s14, 0  ;;  %p33_p1 = scmp.ne.s32.totalorder %s1342_s10, %s1338_s9 }
   0x8   : > { %p34_p2 = scmp.eq.s32.totalorder %s1346_s11, 0  ;;  %p50_p3 = scmp.gt.s32.totalorder %s1429_s12, 0 }
   0x9   : > { %s1442_s16 = scalar_select %p24_p0, %s1342_s10, %s26_s15  }
   0xa   : > { %p1449_p4 = por %p34_p2, %p33_p1  ;;  %s1117_s18 = sadd.s32 4294967295, %s1432_s13 }
   0xb   : > { %1679 = sst [smem:[#allocation8_spill]] %s1442_s16  ;;  %p53_p5 = scmp.gt.s32.totalorder %s1117_s18, 0 }
   0xc   : > { %s1455_s19 = scalar_select %p50_p3, %s1429_s12, 0 }
   0xd   : > { %s58_s20 = sadd.s32 1, %s1334_s30  ;;  %p65_p6 = scmp.ne.s32.totalorder %s1334_s30, %s1330_s29 }
   0xe   : > { %p82_p7 = scmp.lt.s32.totalorder %s1432_s13, 1  ;;  %s1696_s18 = smov (!%p53_p5, %s1117_s18), 0 }
   0xf   : > { %p1463_p8 = por %p65_p6, %p34_p2  ;;  %s84_s22 = sadd.s32 1, %s1432_s13 }
  0x10   : > { %s55_s23 = ssub.s32 %s1455_s19, %s1696_s18  ;;  %p85_p9 = scmp.lt.s32.totalorder %s84_s22, 1 }
  0x11   : > { %p56_p10 = scmp.eq.s32.totalorder %s55_s23, 0  ;;  %p97_p11 = scmp.ne.s32.totalorder %s1326_s28, %s1322_s27 }
  0x12   : > { %s1470_s24 = scalar_select %p82_p7, %s1432_s13, 1 }
  0x13   : > { %s1473_s25 = scalar_select %p56_p10, %s1334_s30, %s58_s20  }
  0x14   : > { %s1698_s22 = smov (!%p85_p9, %s84_s22), 1  ;;  %p211_p12 = scmp.eq.s32.totalorder %s1429_s12, 1 }
  0x15   : > { %1682 = sst [smem:[#allocation9_spill]] %s1473_s25  ;;  %s87_s26 = ssub.s32 %s1470_s24, %s1698_s22 }
  0x16   : > { %s90_s14 = sadd.s32 1, %s1326_s28  ;;  %p88_p13 = scmp.eq.s32.totalorder %s87_s26, 0 }
  0x17   : > { %p1482_p0 = por %p97_p11, %p34_p2  ;;  %p1491_p3 = por %p211_p12, %p33_p1 }
  0x18   : > { %s1496_s23 = scalar_select %p88_p13, %s1326_s28, %s90_s14  }
  0x19   : > { %p1119_p5 = scmp.ge.s32.totalorder %s1346_s11, 2 }
  0x1b   : > { %271 = sbr.rel (%p1119_p5) target bundleno = 50 (0x32), region = 32 }
  0x20   : > { %274 = sbr.rel (!%p1449_p4) target bundleno = 38 (0x26), region = 36  ;;  %s276_s20 = sand.u32 (%p1449_p4), 1, %s1342_s10  }
  0x21   : > { %s1171_s22 = sshll.u32 (%p1449_p4), %s1346_s11, 4  ;;  %s1120_s26 = sshll.u32 (%p1449_p4), %s276_s20, 5 }
  0x22   : > { %s281_s13 = scalar_lea.vmem (%p1449_p4), %s1665_s0, %s1171_s22  ;;  %s278_s14 = scalar_lea.vmem (%p1449_p4), [#allocation2], %s1120_s26 }
  0x23   : > { %v316_v0 = vld [vmem:[%s281_s13] sm:$0xff] (%p1449_p4)  ;;  %v318_v1 = vld [vmem:[%s281_s13 + $0x8] sm:$0xff] (%p1449_p4) }
  0x24   : > { %v320_v2 = vld [vmem:[%s281_s13 + $0x20] sm:$0xff] (%p1449_p4)  ;;  %317 = vst [vmem:[%s278_s14] sm:$0xff] (%p1449_p4), %v316_v0  ;;  %319 = vst [vmem:[%s278_s14 + $0x8] sm:$0xff] (%p1449_p4), %v318_v1  ;;  %v322_v3 = vld [vmem:[%s281_s13 + $0x28] sm:$0xff] (%p1449_p4) }
  0x25   : > { %321 = vst [vmem:[%s278_s14 + $0x10] sm:$0xff] %v320_v2  ;;  %323 = vst [vmem:[%s278_s14 + $0x18] sm:$0xff] %v322_v3 }
  0x26 PF: > { %329 = sbr.rel (!%p1463_p8) target bundleno = 44 (0x2c), region = 74  ;;  %s331_s17 = sand.u32 (%p1463_p8), 1, %s1334_s30  }
  0x27   : > { %s1172_s20 = sshll.u32 (%p1463_p8), %s1455_s19, 4  ;;  %s1123_s10 = sshll.u32 (%p1463_p8), %s331_s17, 5 }
  0x28   : > { %s339_s22 = scalar_lea.vmem (%p1463_p8), %s1666_s1, %s1172_s20  ;;  %s333_s26 = scalar_lea.vmem (%p1463_p8), [#allocation3], %s1123_s10 }
  0x29   : > { %v374_v4 = vld [vmem:[%s339_s22] sm:$0xff] (%p1463_p8)  ;;  %v376_v5 = vld [vmem:[%s339_s22 + $0x8] sm:$0xff] (%p1463_p8) }
  0x2a   : > { %v378_v6 = vld [vmem:[%s339_s22 + $0x20] sm:$0xff] (%p1463_p8)  ;;  %375 = vst [vmem:[%s333_s26] sm:$0xff] (%p1463_p8), %v374_v4  ;;  %377 = vst [vmem:[%s333_s26 + $0x8] sm:$0xff] (%p1463_p8), %v376_v5  ;;  %v380_v7 = vld [vmem:[%s339_s22 + $0x28] sm:$0xff] (%p1463_p8) }
  0x2b   : > { %379 = vst [vmem:[%s333_s26 + $0x10] sm:$0xff] %v378_v6  ;;  %381 = vst [vmem:[%s333_s26 + $0x18] sm:$0xff] %v380_v7 }
  0x2c PF: > { %387 = sbr.rel (!%p1482_p0) target bundleno = 50 (0x32), region = 112  ;;  %s389_s13 = sand.u32 (%p1482_p0), 1, %s1326_s28  }
  0x2d   : > { %s1173_s19 = sshll.u32 (%p1482_p0), %s1470_s24, 4  ;;  %s1127_s21 = sshll.u32 (%p1482_p0), %s389_s13, 5 }
  0x2e   : > { %s397_s20 = scalar_lea.vmem (%p1482_p0), %s1667_s2, %s1173_s19  ;;  %s391_s10 = scalar_lea.vmem (%p1482_p0), [#allocation4], %s1127_s21 }
  0x2f   : > { %v432_v8 = vld [vmem:[%s397_s20] sm:$0xff] (%p1482_p0)  ;;  %v434_v9 = vld [vmem:[%s397_s20 + $0x8] sm:$0xff] (%p1482_p0) }
  0x30   : > { %v436_v10 = vld [vmem:[%s397_s20 + $0x20] sm:$0xff] (%p1482_p0)  ;;  %433 = vst [vmem:[%s391_s10] sm:$0xff] (%p1482_p0), %v432_v8  ;;  %435 = vst [vmem:[%s391_s10 + $0x8] sm:$0xff] (%p1482_p0), %v434_v9  ;;  %v438_v11 = vld [vmem:[%s397_s20 + $0x28] sm:$0xff] (%p1482_p0) }
  0x31   : > { %437 = vst [vmem:[%s391_s10 + $0x10] sm:$0xff] %v436_v10  ;;  %439 = vst [vmem:[%s391_s10 + $0x18] sm:$0xff] %v438_v11 }
  0x32 PF: > { %p1130_p1 = scmp.ge.s32.totalorder %s1346_s11, 1  ;;  %p444_p2 = scmp.lt.s32.totalorder %s1346_s11, 3 }
  0x34   : > { %p445_p4 = pnand %p1130_p1, %p444_p2 }
  0x35   : > { %s451_s14 = sand.u32 (!%p445_p4), 1, %s1338_s9   ;;  %s458_s26 = sand.u32 (!%p445_p4), 1, %s1330_s29  }
  0x36   : > { %448 = sbr.rel (%p445_p4) target bundleno = 313 (0x139), region = 150  ;;  %s1131_s17 = sshll.u32 (!%p445_p4), %s451_s14, 5 }
  0x37   : > { %s453_s22 = scalar_lea.vmem (!%p445_p4), [#allocation2], %s1131_s17  ;;  %p562_p6 = scmp.eq.s32.totalorder (!%p445_p4), %s1429_s12, 0 }
  0x38   : > { %s1132_s11 = sshll.u32 (!%p445_p4), %s458_s26, 5  ;;  %s465_s21 = sand.u32 (!%p445_p4), 1, %s1322_s27  }
  0x39   : > { %s460_s29 = scalar_lea.vmem (!%p445_p4), [#allocation3], %s1132_s11  ;;  %s1133_s27 = sshll.u32 (!%p445_p4), %s465_s21, 5 }
  0x3a   : > { %s467_s20 = scalar_lea.vmem (!%p445_p4), [#allocation4], %s1133_s27  ;;  %s1134_s11 = sshll.u32 (!%p445_p4), %s451_s14, 4 }
  0x3b   : > { %v1283_v12 = vld [vmem:[%s1670_s5 + $0x24] ss:$0 sps:$4 sm:$0xff]   ;;  %vm647_vm0 = vcmask 1043456   ;;  %v1285_v13 = vld [vmem:[%s1670_s5 + $0x1c] sm:$0xff]   ;;  %v531_v14 = vlaneseq  ;;  %v1284_v15 = vld [vmem:[%s1670_s5 + $0x10] ss:$0 sps:$4 sm:$0xff]  }
  0x3c   : > { %1224 = vmatprep.subr.msk.bf16.mxu0 %vm647_vm0, %v1283_v12  ;;  %v649_v16 = vsel %vm647_vm0, %v1283_v12, 0  ;;  %v1286_v17 = vld [vmem:[%s1670_s5 + $0x8] sm:$0xff]   ;;  %1225 = vmatprep.subr.msk.bf16.mxu1 %vm647_vm0, %v1284_v15  ;;  %v722_v18 = vsel %vm647_vm0, %v1284_v15, 0  ;;  %v1287_v19 = vld [vmem:[%s1670_s5 + $0x14] sm:$0xff]   ;;  %v1547_v21 = vld [vmem:[%s1668_s3] sm:$0x1] }
  0x3d   : > { %1195 = vmatpush3.bf16.msra.mxu0 %v649_v16  ;;  %1205 = vmatpush3.bf16.msra.mxu1 %v722_v18  ;;  %v532_v20 = vshrl.u32 %v531_v14, 7  ;;  %v1552_v22 = vld [vmem:[%s1669_s4] sm:$0x1]  ;;  %v527_v26 = vld [vmem:[%s453_s22 + $0x8] sm:$0xff]  ;;  %v528_v29 = vld [vmem:[%s453_s22 + $0x10] sm:$0xff]  ;;  %vm640_vm1 = vcmask 326656  }
  0x3e   : > { %1196 = vmatprep.subr.bf16.mxu0 %v1285_v13  ;;  %1206 = vmatprep.subr.bf16.mxu1 %v1286_v17  ;;  %v1288_v23 = vld [vmem:[%s1670_s5] sm:$0xff]   ;;  %v529_v30 = vld [vmem:[%s453_s22 + $0x18] sm:$0xff]  ;;  %v550_v36 = vld [vmem:[%s460_s29 + $0xf] sm:$0x1]  ;;  %s563_s17 = scalar_select %p562_p6, 1, 0 }
  0x3f   : > { %v533_v24 = vsub.s32 0, %v532_v20  ;;  %v526_v25 = vld [vmem:[%s453_s22] sm:$0xff]  ;;  %v1289_v31 = vld [vmem:[%s1670_s5 + $0x38] ss:$0 sps:$4 sm:$0xff]   ;;  %v551_v37 = vld [vmem:[%s460_s29 + $0x1f] sm:$0x1]  ;;  %v552_v38 = vmul.f32 %v550_v36, %v1547_v21 }
  0x40   : > { %v553_v39 = vmul.f32 %v551_v37, %v1547_v21  ;;  %vm578_vm2 = vcmask 1040384   ;;  %v803_v44 = vsel %vm647_vm0, %v1289_v31, 0  ;;  %v564_v47 = vstv %s563_s17  ;;  %v556_v51 = vld [vmem:[%s467_s20] sm:$0x1]  ;;  %v1290_v56 = vld [vmem:[%s1670_s5 + $0x30] sm:$0xff]   ;;  %v1291_v8 = vld [vmem:[%s1670_s5 + $0x28] sm:$0xff]  }
  0x41   : > { %1197 = vmatpush3.bf16.msra.mxu0 %v1285_v13  ;;  %1207 = vmatpush3.bf16.msra.mxu1 %v1286_v17  ;;  %v534_v27 = vrot.slane %v1547_v21, %v533_v24  ;;  %v544_v28 = vrot.slane %v1552_v22, %v533_v24  ;;  %v554_v45 = vadd.f32 %v552_v38, %v1552_v22  ;;  %vm591_vm3 = vcmask 1046528   ;;  %v557_v57 = vld [vmem:[%s467_s20 + $0x10] sm:$0x1]  ;;  %s569_s15 = scalar_select %p211_p12, 1, 0 }
  0x42   : > { %1198 = vmatprep.subr.bf16.mxu0 %v1287_v19  ;;  %1208 = vmatprep.subr.bf16.mxu1 %v1288_v23  ;;  %v555_v46 = vadd.f32 %v553_v39, %v1552_v22  ;;  %vm1573_vm4 = vcmp.eq.s32.totalorder %v564_v47, 1  ;;  %v558_v0 = vmul.f32 %v556_v51, %v1547_v21  ;;  %v559_v1 = vmul.f32 %v557_v57, %v1547_v21  ;;  %s1612_s13 = scalar_lea.vmem [#allocation5], %s1134_s11  ;;  %p519_p7 = scmp.lt.s32.totalorder %s1429_s12, 1 }
  0x43   : > { %v536_v32 = vmul.f32 %v534_v27, %v526_v25  ;;  %v537_v33 = vmul.f32 %v534_v27, %v527_v26  ;;  %v538_v34 = vmul.f32 %v534_v27, %v528_v29  ;;  %v539_v35 = vmul.f32 %v534_v27, %v529_v30  ;;  %s1178_s17 = sshll.u32 (%p1491_p3), %s1429_s12, 3 }
  0x44   : > { %v566_v58 = vsel %vm1573_vm4, 0.0, %v554_v45  ;;  %v567_v59 = vsel %vm1573_vm4, 0.0, %v555_v46  ;;  %v570_v5 = vstv %s569_s15  ;;  %v560_v9 = vadd.f32 %v558_v0, %v1552_v22  ;;  %s520_s9 = scalar_select %p519_p7, %s1429_s12, 1 }
  0x45   : > { %1199 = vmatpush3.bf16.msra.mxu0 %v1287_v19  ;;  %v546_v40 = vadd.f32 %v544_v28, %v536_v32  ;;  %v547_v41 = vadd.f32 %v544_v28, %v537_v33  ;;  %v548_v42 = vadd.f32 %v544_v28, %v538_v34  ;;  %v549_v43 = vadd.f32 %v544_v28, %v539_v35  ;;  %s941_s10 = scalar_lea.vmem (%p1491_p3), %s1672_s7, %s1178_s17 }
  0x46   : > { %1209 = vmatpush3.bf16.msra.mxu1 %v1288_v23  ;;  %1226 = vmatprep.subr.msk.bf16.mxu0 %vm647_vm0, %v1289_v31  ;;  %v561_v10 = vadd.f32 %v559_v1, %v1552_v22  ;;  %vm571_vm5 = vcmp.eq.s32.totalorder %v570_v5, 1  ;;  %v1161_v31 = vld [vmem:[%s1671_s6] ss:$0 sm:$0xff]  ;;  %vm889_vm6 = vcmask 519168   ;;  %vm894_vm7 = vcmask 523264   ;;  %s1135_s14 = sshll.u32 %s520_s9, 1 }
  0x47   : > { %v592_v48 = vrot.slane %v546_v40, 1  ;;  %v593_v49 = vrot.slane %v547_v41, 1  ;;  %v617_v50 = vpack.c.bf16 %v547_v41, %v546_v40  ;;  %v595_v52 = vrot.slane %v548_v42, 1  ;;  %s522_s29 = scalar_lea.vmem %s1673_s8, %s1135_s14 }
  0x48   : > { %v618_v53 = vpack.c.bf16 %v549_v43, %v548_v42  ;;  %v579_v55 = vrot.slane %v546_v40, 7  ;;  %v580_v60 = vrot.slane %v547_v41, 7  ;;  %v582_v61 = vrot.slane %v548_v42, 7 }
  0x49   : > { %1200 = vmatprep.mubr.msk.bf16.mxu0 %vm640_vm1, %v617_v50  ;;  %v583_v63 = vrot.slane %v549_v43, 7  ;;  %v596_v2 = vrot.slane %v549_v43, 1  ;;  %v572_v12 = vsel %vm571_vm5, 0.0, %v560_v9  ;;  %v573_v13 = vsel %vm571_vm5, 0.0, %v561_v10 }
  0x4a   : > { %1201 = vmatmul.mubr.msk.bf16.vlgmr.msra.gmra.mxu0 %vm640_vm1, %v618_v53  ;;  %v589_v62 = vsel %vm578_vm2, %v566_v58, %v579_v55  ;;  %v581_v3 = vsel %vm578_vm2, %v579_v55, %v580_v60  ;;  %v590_v4 = vsel %vm578_vm2, %v567_v59, %v582_v61  ;;  %v594_v14 = vsel %vm591_vm3, %v592_v48, %v593_v49 }
  0x4b   : > { %1215 = vmatpush3.bf16.msra.mxu0 %v803_v44  ;;  %v610_v6 = vpack.c.bf16 %v581_v3, %v589_v62  ;;  %v584_v7 = vsel %vm578_vm2, %v582_v61, %v583_v63  ;;  %v604_v15 = vrot.slane %v572_v12, 1  ;;  %v605_v16 = vrot.slane %v573_v13, 1 }
  0x4c   : > { %1216 = vmatprep.subr.bf16.mxu0 %v1290_v56  ;;  %v611_v11 = vpack.c.bf16 %v584_v7, %v590_v4  ;;  %v597_v17 = vsel %vm591_vm3, %v595_v52, %v596_v2  ;;  %vm908_vm8 = vcmask 516096  }
  0x4d   : > { %1210 = vmatprep.mubr.msk.bf16.mxu1 %vm640_vm1, %v610_v6  ;;  %v608_v18 = vsel %vm591_vm3, %v593_v49, %v604_v15  ;;  %v609_v19 = vsel %vm591_vm3, %v596_v2, %v605_v16 }
  0x4e   : > { %1211 = vmatmul.mubr.msk.bf16.vlgmr.msra.gmra.mxu1 %vm640_vm1, %v611_v11  ;;  %v773_v20 = vpack.c.bf16 %v608_v18, %v594_v14  ;;  %v774_v21 = vpack.c.bf16 %v609_v19, %v597_v17 }
  0x4f   : > { %1217 = vmatpush3.bf16.msra.mxu0 %v1290_v56 }
  0x50   : > { %1218 = vmatprep.subr.bf16.mxu0 %v1291_v8  ;;  %1220 = vmatprep.mubr.msk.bf16.mxu0 %vm640_vm1, %v773_v20 }
  0x53   : > { %1219 = vmatpush3.bf16.msra.mxu0 %v1291_v8 }
  0x56   : > { %1221 = vmatmul.mubr.msk.bf16.vlgmr.msra.gmra.mxu0 %vm640_vm1, %v774_v21 }
 0x10a   : > { %v1202_v22 = vpop.f32.mrf.mxu0 }
 0x10c   : > { %v685_v23 = vpop.f32.mrf.mxu0 }
 0x10e   : > { %v1212_v24 = vpop.f32.mrf.mxu1  ;;  %v1203_v25 = vpop.f32.mrf.mxu0 }
 0x10f   : > { %v767_v28 = vadd.f32 %v1212_v24, %v1202_v22 }
 0x110   : > { %v758_v26 = vpop.f32.mrf.mxu1  ;;  %v688_v27 = vpop.f32.mrf.mxu0 }
 0x111   : > { %v759_v32 = vadd.f32 %v758_v26, %v685_v23 }
 0x112   : > { %v1213_v29 = vpop.f32.mrf.mxu1 }
 0x113   : > { %v770_v35 = vadd.f32 %v1213_v29, %v1203_v25 }
 0x114   : > { %v761_v36 = vpop.f32.mrf.mxu1 }
 0x115   : > { %v762_v43 = vadd.f32 %v761_v36, %v688_v27 }
 0x116   : > { %v1222_v30 = vpop.f32.mrf.mxu0 }
 0x117   : > { %v856_v33 = vadd.f32 %v1222_v30, %v767_v28 }
 0x118   : > { %v839_v34 = vpop.f32.mrf.mxu0 }
 0x119   : > { %v867_v37 = vadd.f32 %v1161_v31, %v856_v33  ;;  %v854_v38 = vadd.f32 %v839_v34, %v759_v32 }
 0x11a   : > { %v1223_v39 = vpop.f32.mrf.mxu0 }
 0x11b   : > { %v871_v40 = vmax.f32 %v867_v37, 0.0  ;;  %v865_v41 = vadd.f32 %v1161_v31, %v854_v38  ;;  %v857_v42 = vadd.f32 %v1223_v39, %v770_v35 }
 0x11c   : > { %v842_v44 = vpop.f32.mrf.mxu0 }
 0x11d   : > { %v1176_v45 = vpack.c.bf16 %v871_v40, %v871_v40  ;;  %v869_v46 = vmax.f32 %v865_v41, 0.0  ;;  %v868_v47 = vadd.f32 %v1161_v31, %v857_v42  ;;  %v855_v48 = vadd.f32 %v842_v44, %v762_v43 }
 0x11e   : > { %v912_v55 = vmul.f32 %v871_v40, %v871_v40  ;;  %v898_v61 = vsel %vm894_vm7, %v871_v40, 0.0 }
 0x11f   : > { %892 = vst.msk [vmem:[%s1612_s13 + $0x8] sm:$0xf] %vm889_vm6, %v1176_v45  ;;  %v1174_v49 = vpack.c.bf16 %v869_v46, %v869_v46  ;;  %v872_v50 = vmax.f32 %v868_v47, 0.0  ;;  %v866_v51 = vadd.f32 %v1161_v31, %v855_v48  ;;  %v910_v52 = vmul.f32 %v869_v46, %v869_v46 }
 0x120   : > { %v895_v56 = vsel %vm894_vm7, %v869_v46, 0.0  ;;  %v917_v3 = vsel %vm894_vm7, %v912_v55, 0.0 }
 0x121   : > { %890 = vst.msk [vmem:[%s1612_s13] sm:$0xf] %vm889_vm6, %v1174_v49  ;;  %v1177_v53 = vpack.c.bf16 %v872_v50, %v872_v50  ;;  %v870_v54 = vmax.f32 %v866_v51, 0.0  ;;  %v914_v62 = vsel %vm894_vm7, %v910_v52, 0.0  ;;  %v913_v63 = vmul.f32 %v872_v50, %v872_v50 }
 0x122   : > { %v900_v4 = vsel %vm894_vm7, %v872_v50, 0.0 }
 0x123   : > { %893 = vst.msk [vmem:[%s1612_s13 + $0xc] sm:$0xf] %vm889_vm6, %v1177_v53  ;;  %v1175_v57 = vpack.c.bf16 %v870_v54, %v870_v54  ;;  %v896_v58 = vsel %vm894_vm7, %v870_v54, 0.0  ;;  %v911_v59 = vmul.f32 %v870_v54, %v870_v54  ;;  %v919_v7 = vsel %vm894_vm7, %v913_v63, 0.0 }
 0x124   : > { %v897_v60 = vadd.f32 %v896_v58, %v895_v56 }
 0x125   : > { %891 = vst.msk [vmem:[%s1612_s13 + $0x4] sm:$0xf] %vm889_vm6, %v1175_v57  ;;  %v915_v0 = vsel %vm894_vm7, %v911_v59, 0.0 }
 0x126   : > { %v899_v1 = vadd.f32 %v898_v61, %v897_v60  ;;  %v916_v2 = vadd.f32 %v915_v0, %v914_v62 }
 0x128   : > { %v901_v5 = vadd.f32 %v900_v4, %v899_v1  ;;  %v918_v6 = vadd.f32 %v917_v3, %v916_v2 }
 0x12a   : > { %v902_v8 = vrot.slane %v901_v5, 4  ;;  %v920_v9 = vadd.f32 %v919_v7, %v918_v6  ;;  %v962_v22 = vld [vmem:[%s1612_s13 + $0x8] sm:$0xff] (%p1491_p3)  }
 0x12b   : > { %963 = vst [vmem:[%s941_s10 + $0x10] sm:$0xff] (%p1491_p3), %v962_v22  }
 0x12c   : > { %v903_v10 = vadd.f32 %v902_v8, %v901_v5  ;;  %v921_v11 = vrot.slane %v920_v9, 4  ;;  %v958_v21 = vld [vmem:[%s1612_s13] sm:$0xff] (%p1491_p3)  }
 0x12d   : > { %959 = vst [vmem:[%s941_s10] sm:$0xff] (%p1491_p3), %v958_v21  }
 0x12e   : > { %v904_v12 = vrot.slane %v903_v10, 2  ;;  %v922_v13 = vadd.f32 %v921_v11, %v920_v9 }
 0x130   : > { %v905_v14 = vadd.f32 %v904_v12, %v903_v10  ;;  %v923_v15 = vrot.slane %v922_v13, 2 }
 0x132   : > { %v906_v16 = vrot.slane %v905_v14, 1  ;;  %v924_v17 = vadd.f32 %v923_v15, %v922_v13 }
 0x134   : > { %v907_v18 = vadd.f32 %v906_v16, %v905_v14  ;;  %v925_v19 = vrot.slane %v924_v17, 1  ;;  %938 = sbr.rel (!%p1491_p3) target bundleno = 313 (0x139), region = 166 }
 0x136   : > { %909 = vst.msk [vmem:[%s522_s29] sm:$0x1] %vm908_vm8, %v907_v18  ;;  %v926_v20 = vadd.f32 %v925_v19, %v924_v17 }
 0x138   : > { %927 = vst.msk [vmem:[%s522_s29 + $0x1] sm:$0x1] %vm908_vm8, %v926_v20 }
 0x139 PF: > { %s1687_s11 = sld [smem:[#allocation7_spill]]  ;;  %s1691_s27 = smov %s1326_s28 }
 0x13a   : > { %s1688_s18 = sld [smem:[#allocation9_spill]]  ;;  %s1692_s28 = smov %s1496_s23 }
 0x13b   : > { %s1689_s9 = sld [smem:[#allocation6_spill]]  ;;  %s1693_s29 = smov %s1334_s30 }
 0x13c   : > { %s1690_s10 = sld [smem:[#allocation8_spill]] }
 0x13f   : > { %p16_p8 = scmp.ge.s32.totalorder %s1687_s11, 4  }
 0x140   : > { %s1694_s30 = smov %s1688_s18 }
 0x141   :  { %18 = sbr.rel (!%p16_p8) target bundleno = 4 (0x4), region = 268 }

// kernel: _lambda_.6
= control target key start
LH: loop header
LB: loop body
LE: loop exit
PB: predicated region body
PF: predicated region fallthrough
CT: control target
= control target key end

     0   :  { %s1767_s0 = inlined_call_operand.vmem [shape: bf16[2,32,64], index: 0, kind: input, shape index: {}, may-alias: {0,1,2}]   ;;  %s1768_s1 = inlined_call_operand.vmem [shape: bf16[2,32,64], index: 1, kind: input, shape index: {}, may-alias: {0,1,2}]   ;;  %s1769_s2 = inlined_call_operand.vmem [shape: bf16[2,32,64], index: 2, kind: input, shape index: {}, may-alias: {0,1,2}]   ;;  %s1770_s3 = inlined_call_operand.vmem [shape: f32[1,64], index: 3, kind: input, shape index: {}]   ;;  %s1771_s4 = inlined_call_operand.vmem [shape: f32[1,64], index: 4, kind: input, shape index: {}]   ;;  %s1772_s5 = inlined_call_operand.vmem [shape: bf16[3,64,64], index: 5, kind: input, shape index: {}]   ;;  %s1773_s6 = inlined_call_operand.vmem [shape: f32[1,64], index: 6, kind: input, shape index: {}]   ;;  %s1774_s7 = inlined_call_operand.vmem [shape: bf16[2,32,64], index: 7, kind: output, shape index: {0}]   ;;  %s1775_s8 = inlined_call_operand.vmem [shape: f32[2,2,64], index: 8, kind: output, shape index: {1}]  }
   0x1   :  { %1780 = sst [smem:[#allocation12_spill]] %s1774_s7 }
   0x2   :  { %s1483_s27 = smov 0   ;;  %s1485_s28 = smov 0  }
   0x3   :  { %s1487_s29 = smov 0   ;;  %s1489_s30 = smov 0  }
   0x4   :  { %s1491_s9 = smov 0   ;;  %s1493_s10 = smov 0  }
   0x5   :  { %s1495_s11 = smov 0  }
   0x6 LB: > { %1781 = sst [smem:[#allocation6_spill]] %s1432_s10  ;;  %s1519_s12 = sadd.s32 4294967295, %s1436_s11   ;;  %s1436_s11 = sphi %s1495_s11, %s1795_s11   ;;  %s1432_s10 = sphi %s1493_s10, %s1799_s10   ;;  %s1428_s9 = sphi %s1491_s9, %s1798_s9   ;;  %s1424_s30 = sphi %s1489_s30, %s1803_s30   ;;  %s1420_s29 = sphi %s1487_s29, %s1802_s29   ;;  %s1416_s28 = sphi %s1485_s28, %s1801_s28   ;;  %s1412_s27 = sphi %s1483_s27, %s1800_s27  }
   0x7   : > { %s1522_s13 = sadd.s32 1, %s1436_s11   ;;  %s26_s15 = sadd.s32 1, %s1432_s10 }
   0x8   : > { %1782 = sst [smem:[#allocation7_spill]] %s1522_s13  ;;  %s23_s14 = ssub.s32 %s1436_s11, %s1522_s13 }
   0x9   : > { %p24_p0 = scmp.eq.s32.totalorder %s23_s14, 0  ;;  %p33_p1 = scmp.ne.s32.totalorder %s1432_s10, %s1428_s9 }
   0xa   : > { %p34_p2 = scmp.eq.s32.totalorder %s1436_s11, 0  ;;  %p50_p3 = scmp.gt.s32.totalorder %s1519_s12, 0 }
   0xb   : > { %s1532_s16 = scalar_select %p24_p0, %s1432_s10, %s26_s15  }
   0xc   : > { %p1539_p4 = por %p34_p2, %p33_p1  ;;  %s1180_s18 = sadd.s32 4294967295, %s1522_s13 }
   0xd   : > { %1783 = sst [smem:[#allocation8_spill]] %s1532_s16  ;;  %p53_p5 = scmp.gt.s32.totalorder %s1180_s18, 0 }
   0xe   : > { %s1545_s19 = scalar_select %p50_p3, %s1519_s12, 0 }
   0xf   : > { %s58_s20 = sadd.s32 1, %s1424_s30  ;;  %p65_p6 = scmp.ne.s32.totalorder %s1424_s30, %s1420_s29 }
  0x10   : > { %p82_p7 = scmp.lt.s32.totalorder %s1522_s13, 1  ;;  %s1805_s18 = smov (!%p53_p5, %s1180_s18), 0 }
  0x11   : > { %p1553_p8 = por %p65_p6, %p34_p2  ;;  %s84_s22 = sadd.s32 1, %s1522_s13 }
  0x12   : > { %s55_s23 = ssub.s32 %s1545_s19, %s1805_s18  ;;  %p85_p9 = scmp.lt.s32.totalorder %s84_s22, 1 }
  0x13   : > { %p56_p10 = scmp.eq.s32.totalorder %s55_s23, 0  ;;  %p97_p11 = scmp.ne.s32.totalorder %s1416_s28, %s1412_s27 }
  0x14   : > { %s1560_s24 = scalar_select %p82_p7, %s1522_s13, 1 }
  0x15   : > { %s1563_s25 = scalar_select %p56_p10, %s1424_s30, %s58_s20  }
  0x16   : > { %s1807_s22 = smov (!%p85_p9, %s84_s22), 1  ;;  %p211_p12 = scmp.eq.s32.totalorder %s1519_s12, 1 }
  0x17   : > { %1786 = sst [smem:[#allocation9_spill]] %s1563_s25  ;;  %s87_s26 = ssub.s32 %s1560_s24, %s1807_s22 }
  0x18   : > { %s90_s14 = sadd.s32 1, %s1416_s28  ;;  %p88_p13 = scmp.eq.s32.totalorder %s87_s26, 0 }
  0x19   : > { %p1572_p0 = por %p97_p11, %p34_p2  ;;  %p1581_p3 = por %p211_p12, %p33_p1 }
  0x1a   : > { %s1586_s23 = scalar_select %p88_p13, %s1416_s28, %s90_s14  }
  0x1b   : > { %s1788_s18 = scalar_select %p1581_p3, 1, 0 }
  0x1c   : > { %1790 = sst [smem:[#allocation11_spill]] %s1586_s23  ;;  %p1182_p5 = scmp.ge.s32.totalorder %s1436_s11, 2 }
  0x1d   : > { %1789 = sst [smem:[#allocation10_spill]] %s1788_s18 }
  0x1e   : > { %271 = sbr.rel (%p1182_p5) target bundleno = 50 (0x32), region = 32 }
  0x23   : > { %274 = sbr.rel (!%p1539_p4) target bundleno = 40 (0x28), region = 36  ;;  %s276_s20 = sand.u32 (%p1539_p4), 1, %s1432_s10  }
  0x24   : > { %s1243_s22 = sshll.u32 (%p1539_p4), %s1436_s11, 3  ;;  %s1183_s26 = sshll.u32 (%p1539_p4), %s276_s20, 4 }
  0x25   : > { %s281_s13 = scalar_lea.vmem (%p1539_p4), %s1767_s0, %s1243_s22  ;;  %s278_s7 = scalar_lea.vmem (%p1539_p4), [#allocation2], %s1183_s26 }
  0x26   : > { %v298_v0 = vld [vmem:[%s281_s13] sm:$0xff] (%p1539_p4)   ;;  %v302_v1 = vld [vmem:[%s281_s13 + $0x10] sm:$0xff] (%p1539_p4)  }
  0x27   : > { %299 = vst [vmem:[%s278_s7] sm:$0xff] (%p1539_p4), %v298_v0   ;;  %303 = vst [vmem:[%s278_s7 + $0x8] sm:$0xff] (%p1539_p4), %v302_v1  }
  0x28 PF: > { %337 = sbr.rel (!%p1553_p8) target bundleno = 45 (0x2d), region = 77  ;;  %s339_s17 = sand.u32 (%p1553_p8), 1, %s1424_s30  }
  0x29   : > { %s1244_s14 = sshll.u32 (%p1553_p8), %s1545_s19, 3  ;;  %s1186_s10 = sshll.u32 (%p1553_p8), %s339_s17, 4 }
  0x2a   : > { %s347_s18 = scalar_lea.vmem (%p1553_p8), %s1768_s1, %s1244_s14  ;;  %s341_s16 = scalar_lea.vmem (%p1553_p8), [#allocation3], %s1186_s10 }
  0x2b   : > { %v364_v2 = vld [vmem:[%s347_s18] sm:$0xff] (%p1553_p8)   ;;  %v368_v3 = vld [vmem:[%s347_s18 + $0x10] sm:$0xff] (%p1553_p8)  }
  0x2c   : > { %365 = vst [vmem:[%s341_s16] sm:$0xff] (%p1553_p8), %v364_v2   ;;  %369 = vst [vmem:[%s341_s16 + $0x8] sm:$0xff] (%p1553_p8), %v368_v3  }
  0x2d PF: > { %403 = sbr.rel (!%p1572_p0) target bundleno = 50 (0x32), region = 118  ;;  %s405_s7 = sand.u32 (%p1572_p0), 1, %s1416_s28  }
  0x2e   : > { %s1245_s13 = sshll.u32 (%p1572_p0), %s1560_s24, 3  ;;  %s1190_s21 = sshll.u32 (%p1572_p0), %s405_s7, 4 }
  0x2f   : > { %s413_s22 = scalar_lea.vmem (%p1572_p0), %s1769_s2, %s1245_s13  ;;  %s407_s23 = scalar_lea.vmem (%p1572_p0), [#allocation4], %s1190_s21 }
  0x30   : > { %v430_v4 = vld [vmem:[%s413_s22] sm:$0xff] (%p1572_p0)   ;;  %v434_v5 = vld [vmem:[%s413_s22 + $0x10] sm:$0xff] (%p1572_p0)  }
  0x31   : > { %431 = vst [vmem:[%s407_s23] sm:$0xff] (%p1572_p0), %v430_v4   ;;  %435 = vst [vmem:[%s407_s23 + $0x8] sm:$0xff] (%p1572_p0), %v434_v5  }
  0x32 PF: > { %p1193_p1 = scmp.ge.s32.totalorder %s1436_s11, 1  ;;  %p468_p2 = scmp.lt.s32.totalorder %s1436_s11, 3 }
  0x34   : > { %p469_p4 = pnand %p1193_p1, %p468_p2 }
  0x35   : > { %s475_s15 = sand.u32 (!%p469_p4), 1, %s1428_s9   ;;  %s482_s22 = sand.u32 (!%p469_p4), 1, %s1420_s29  }
  0x36   : > { %472 = sbr.rel (%p469_p4) target bundleno = 319 (0x13f), region = 159  ;;  %s1622_s11 = sshll.u32 (!%p469_p4), %s475_s15, 4 }
  0x37   : > { %s477_s18 = scalar_lea.vmem (!%p469_p4), [#allocation2], %s1622_s11  ;;  %s1195_s26 = sshll.u32 (!%p469_p4), %s482_s22, 4 }
  0x38   : > { %p594_p6 = scmp.eq.s32.totalorder (!%p469_p4), %s1519_s12, 0  ;;  %s484_s29 = scalar_lea.vmem (!%p469_p4), [#allocation3], %s1195_s26 }
  0x39   : > { %s489_s7 = sand.u32 (!%p469_p4), 1, %s1412_s27   ;;  %s1714_s26 = scalar_lea.vmem (!%p469_p4), [#allocation5], %s1622_s11 }
  0x3a   : > { %s1196_s13 = sshll.u32 (!%p469_p4), %s489_s7, 4  ;;  %p543_p7 = scmp.lt.s32.totalorder (!%p469_p4), %s1519_s12, 1 }
  0x3b   : > { %v1370_v6 = vld [vmem:[%s1772_s5 + $0x38] sm:$0xff]   ;;  %v559_v7 = vlaneseq  ;;  %v1372_v9 = vld [vmem:[%s1772_s5 + $0x30] sm:$0xff]   ;;  %v1374_v11 = vld [vmem:[%s1772_s5 + $0x28] sm:$0xff]   ;;  %s595_s9 = scalar_select %p594_p6, 1, 0  ;;  %vm693_vm0 = vcmask 523264  }
  0x3c   : > { %v1371_v8 = vld [vmem:[%s1772_s5 + $0x18] sm:$0xff]   ;;  %1278 = vmatprep.subr.bf16.mxu0 %v1370_v6  ;;  %v1373_v10 = vld [vmem:[%s1772_s5 + $0x10] sm:$0xff]   ;;  %v1375_v13 = vld [vmem:[%s1772_s5 + $0x8] sm:$0xff]   ;;  %vm616_vm1 = vcmask 1040384   ;;  %s491_s27 = scalar_lea.vmem [#allocation4], %s1196_s13  ;;  %vm629_vm4 = vcmask 1046528  }
  0x3d   : > { %1290 = vmatprep.subr.bf16.mxu1 %v1371_v8  ;;  %1279 = vmatpush3.bf16.msra.mxu0 %v1370_v6  ;;  %v560_v12 = vshrl.u32 %v559_v7, 7  ;;  %v1376_v15 = vld [vmem:[%s1772_s5 + $0x20] sm:$0xff]   ;;  %v1259_v22 = vld [vmem:[%s477_s18 + $0x8] sm:$0xff]   ;;  %v596_v40 = vstv %s595_s9  ;;  %v1379_v52 = vld [vmem:[%s1772_s5 + $0x50] sm:$0xff]   ;;  %s601_s25 = scalar_select %p211_p12, 1, 0 }
  0x3e   : > { %1291 = vmatpush3.bf16.msra.mxu1 %v1371_v8  ;;  %1280 = vmatprep.subr.bf16.mxu0 %v1372_v9  ;;  %v1640_v16 = vld [vmem:[%s1770_s3] sm:$0x1]  ;;  %v1257_v25 = vunpack.c.l.bf16 %v1259_v22  ;;  %v1258_v26 = vunpack.c.h.bf16 %v1259_v22  ;;  %v578_v27 = vld [vmem:[%s484_s29 + $0x4] sm:$0x8]  ;;  %v579_v28 = vld [vmem:[%s484_s29 + $0xc] sm:$0x8] }
  0x3f   : > { %1292 = vmatprep.subr.bf16.mxu1 %v1373_v10  ;;  %v561_v14 = vsub.s32 0, %v560_v12  ;;  %v1645_v17 = vld [vmem:[%s1771_s4] sm:$0x1]  ;;  %v1378_v29 = vld [vmem:[%s1772_s5 + $0x58] sm:$0xff]   ;;  %v580_v32 = vunpack.c.l.bf16 %v578_v27  ;;  %v581_v33 = vunpack.c.l.bf16 %v579_v28  ;;  %vm1666_vm2 = vcmp.eq.s32.totalorder %v596_v40, 1  ;;  %v1380_v4 = vld [vmem:[%s1772_s5 + $0x48] sm:$0xff]  }
  0x40   : > { %v1252_v18 = vld [vmem:[%s477_s18] sm:$0xff]   ;;  %v587_v53 = vld [vmem:[%s491_s27 + $0x8] sm:$0x1]  ;;  %v602_v0 = vstv %s601_s25  ;;  %vm953_vm5 = vcmask 519168   ;;  %s544_s11 = scalar_select %p543_p7, %s1519_s12, 1  ;;  %vm971_vm6 = vcmask 516096  }
  0x41   : > { %1281 = vmatpush3.bf16.msra.mxu0 %v1372_v9  ;;  %v1377_v19 = vld [vmem:[%s1772_s5] sm:$0xff]   ;;  %v1253_v20 = vunpack.c.l.bf16 %v1252_v18  ;;  %v1254_v21 = vunpack.c.h.bf16 %v1252_v18  ;;  %v562_v23 = vrot.slane %v1640_v16, %v561_v14  ;;  %v572_v24 = vrot.slane %v1645_v17, %v561_v14  ;;  %s1250_s9 = sshll.u32 (%p1581_p3), %s1519_s12, 3 }
  0x42   : > { %1293 = vmatpush3.bf16.msra.mxu1 %v1373_v10  ;;  %1282 = vmatprep.subr.bf16.mxu0 %v1374_v11  ;;  %v586_v49 = vld [vmem:[%s491_s27] sm:$0x1]  ;;  %v589_v61 = vunpack.c.l.bf16 %v587_v53  ;;  %vm603_vm3 = vcmp.eq.s32.totalorder %v602_v0, 1  ;;  %s1198_s17 = sshll.u32 %s544_s11, 1  ;;  %s1794_s27 = sld [smem:[#allocation12_spill]] (%p1581_p3) }
  0x43   : > { %1294 = vmatprep.subr.bf16.mxu1 %v1375_v13  ;;  %v564_v30 = vmul.f32 %v1253_v20, %v562_v23  ;;  %v565_v31 = vmul.f32 %v1254_v21, %v562_v23  ;;  %v566_v34 = vmul.f32 %v1257_v25, %v562_v23  ;;  %v567_v35 = vmul.f32 %v1258_v26, %v562_v23  ;;  %s546_s20 = scalar_lea.vmem %s1775_s8, %s1198_s17 }
  0x44   : > { %v582_v38 = vmul.f32 %v580_v32, %v562_v23  ;;  %v583_v39 = vmul.f32 %v581_v33, %v562_v23  ;;  %v588_v60 = vunpack.c.l.bf16 %v586_v49  ;;  %v591_v8 = vmul.f32 %v589_v61, %v1640_v16  ;;  %v1233_v33 = vld [vmem:[%s1773_s6] ss:$0 sm:$0xff] }
  0x45   : > { %1283 = vmatpush3.bf16.msra.mxu0 %v1374_v11  ;;  %v1657_v36 = vadd.f32 %v572_v24, %v564_v30  ;;  %v1659_v37 = vadd.f32 %v572_v24, %v565_v31  ;;  %v1662_v41 = vadd.f32 %v572_v24, %v566_v34  ;;  %v577_v44 = vadd.f32 %v572_v24, %v567_v35 }
  0x46   : > { %1295 = vmatpush3.bf16.msra.mxu1 %v1375_v13  ;;  %1284 = vmatprep.subr.bf16.mxu0 %v1376_v15  ;;  %v584_v43 = vadd.f32 %v582_v38, %v572_v24  ;;  %v585_v45 = vadd.f32 %v583_v39, %v572_v24  ;;  %v590_v5 = vmul.f32 %v588_v60, %v1640_v16  ;;  %v1381_v13 = vld [vmem:[%s1772_s5 + $0x40] sm:$0xff]  }
  0x47   : > { %1296 = vmatprep.subr.bf16.mxu1 %v1377_v19  ;;  %v658_v42 = vpack.c.bf16 %v1659_v37, %v1657_v36  ;;  %v617_v47 = vrot.slane %v1657_v36, 7  ;;  %v618_v48 = vrot.slane %v1659_v37, 7  ;;  %v659_v51 = vpack.c.bf16 %v577_v44, %v1662_v41 }
  0x48   : > { %v598_v50 = vsel %vm1666_vm2, 0.0, %v584_v43  ;;  %v599_v54 = vsel %vm1666_vm2, 0.0, %v585_v45  ;;  %v620_v57 = vrot.slane %v1662_v41, 7  ;;  %v621_v59 = vrot.slane %v577_v44, 7  ;;  %s1004_s21 = scalar_lea.vmem (%p1581_p3), %s1794_s27, %s1250_s9 }
  0x49   : > { %1285 = vmatpush3.bf16.msra.mxu0 %v1376_v15  ;;  %1286 = vmatprep.mubr.msk.bf16.mxu0 %vm693_vm0, %v658_v42  ;;  %v608_v55 = vrot.slane %v598_v50, 7  ;;  %v619_v56 = vsel %vm616_vm1, %v617_v47, %v618_v48  ;;  %v609_v58 = vrot.slane %v599_v54, 7  ;;  %v630_v62 = vrot.slane %v1657_v36, 1 }
  0x4a   : > { %1297 = vmatpush3.bf16.msra.mxu1 %v1377_v19  ;;  %1302 = vmatprep.subr.bf16.mxu0 %v1378_v29  ;;  %v622_v2 = vsel %vm616_vm1, %v620_v57, %v621_v59  ;;  %v631_v6 = vrot.slane %v1659_v37, 1  ;;  %v592_v9 = vadd.f32 %v590_v5, %v1645_v17  ;;  %v633_v10 = vrot.slane %v1662_v41, 1 }
  0x4b   : > { %v627_v63 = vsel %vm616_vm1, %v608_v55, %v617_v47  ;;  %v628_v3 = vsel %vm616_vm1, %v609_v58, %v620_v57  ;;  %v634_v11 = vrot.slane %v577_v44, 1  ;;  %v593_v12 = vadd.f32 %v591_v8, %v1645_v17 }
  0x4c   : > { %1287 = vmatmul.mubr.msk.bf16.vlgmr.msra.gmra.mxu0 %vm693_vm0, %v659_v51  ;;  %v648_v1 = vpack.c.bf16 %v619_v56, %v627_v63  ;;  %v649_v7 = vpack.c.bf16 %v622_v2, %v628_v3  ;;  %v604_v14 = vsel %vm603_vm3, 0.0, %v592_v9  ;;  %v632_v16 = vsel %vm629_vm4, %v630_v62, %v631_v6 }
  0x4d   : > { %1303 = vmatpush3.bf16.msra.mxu0 %v1378_v29  ;;  %v605_v15 = vsel %vm603_vm3, 0.0, %v593_v12  ;;  %v642_v18 = vrot.slane %v604_v14, 1  ;;  %v635_v21 = vsel %vm629_vm4, %v633_v10, %v634_v11 }
  0x4e   : > { %1304 = vmatprep.subr.bf16.mxu0 %v1379_v52  ;;  %1298 = vmatprep.mubr.msk.bf16.mxu1 %vm693_vm0, %v648_v1  ;;  %v643_v19 = vrot.slane %v605_v15, 1 }
  0x4f   : > { %1299 = vmatmul.mubr.msk.bf16.vlgmr.msra.gmra.mxu1 %vm693_vm0, %v649_v7  ;;  %v646_v20 = vsel %vm629_vm4, %v631_v6, %v642_v18 }
  0x50   : > { %v828_v22 = vpack.c.bf16 %v646_v20, %v632_v16  ;;  %v647_v17 = vsel %vm629_vm4, %v634_v11, %v643_v19 }
  0x51   : > { %1305 = vmatpush3.bf16.msra.mxu0 %v1379_v52  ;;  %v829_v23 = vpack.c.bf16 %v647_v17, %v635_v21 }
  0x52   : > { %1306 = vmatprep.subr.bf16.mxu0 %v1380_v4  ;;  %1310 = vmatprep.mubr.msk.bf16.mxu0 %vm693_vm0, %v828_v22 }
  0x55   : > { %1307 = vmatpush3.bf16.msra.mxu0 %v1380_v4 }
  0x56   : > { %1308 = vmatprep.subr.bf16.mxu0 %v1381_v13 }
  0x59   : > { %1309 = vmatpush3.bf16.msra.mxu0 %v1381_v13 }
  0x5c   : > { %1311 = vmatmul.mubr.msk.bf16.vlgmr.msra.gmra.mxu0 %vm693_vm0, %v829_v23 }
 0x10c   : > { %v1288_v24 = vpop.f32.mrf.mxu0 }
 0x10e   : > { %v734_v25 = vpop.f32.mrf.mxu0 }
 0x10f   : > { %v1300_v26 = vpop.f32.mrf.mxu1 }
 0x110   : > { %v1289_v27 = vpop.f32.mrf.mxu0  ;;  %v822_v30 = vadd.f32 %v1300_v26, %v1288_v24 }
 0x111   : > { %v813_v28 = vpop.f32.mrf.mxu1 }
 0x112   : > { %v737_v29 = vpop.f32.mrf.mxu0  ;;  %v814_v34 = vadd.f32 %v813_v28, %v734_v25 }
 0x113   : > { %v1301_v31 = vpop.f32.mrf.mxu1 }
 0x114   : > { %v825_v37 = vadd.f32 %v1301_v31, %v1289_v27 }
 0x115   : > { %v816_v38 = vpop.f32.mrf.mxu1 }
 0x116   : > { %v817_v45 = vadd.f32 %v816_v38, %v737_v29 }
 0x11c   : > { %v1312_v32 = vpop.f32.mrf.mxu0 }
 0x11d   : > { %v920_v35 = vadd.f32 %v1312_v32, %v822_v30 }
 0x11e   : > { %v903_v36 = vpop.f32.mrf.mxu0 }
 0x11f   : > { %v931_v39 = vadd.f32 %v1233_v33, %v920_v35  ;;  %v918_v40 = vadd.f32 %v903_v36, %v814_v34 }
 0x120   : > { %v1313_v41 = vpop.f32.mrf.mxu0 }
 0x121   : > { %v935_v42 = vmax.f32 %v931_v39, 0.0  ;;  %v929_v43 = vadd.f32 %v1233_v33, %v918_v40  ;;  %v921_v44 = vadd.f32 %v1313_v41, %v825_v37 }
 0x122   : > { %v906_v46 = vpop.f32.mrf.mxu0 }
 0x123   : > { %v1248_v47 = vpack.c.bf16 %v935_v42, %v935_v42  ;;  %v933_v48 = vmax.f32 %v929_v43, 0.0  ;;  %v932_v49 = vadd.f32 %v1233_v33, %v921_v44  ;;  %v919_v50 = vadd.f32 %v906_v46, %v817_v45 }
 0x124   : > { %v975_v57 = vmul.f32 %v935_v42, %v935_v42  ;;  %v961_v63 = vsel %vm693_vm0, %v935_v42, 0.0 }
 0x125   : > { %956 = vst.msk [vmem:[%s1714_s26 + $0x8] sm:$0xf] %vm953_vm5, %v1248_v47  ;;  %v1246_v51 = vpack.c.bf16 %v933_v48, %v933_v48  ;;  %v936_v52 = vmax.f32 %v932_v49, 0.0  ;;  %v930_v53 = vadd.f32 %v1233_v33, %v919_v50  ;;  %v973_v54 = vmul.f32 %v933_v48, %v933_v48 }
 0x126   : > { %v958_v58 = vsel %vm693_vm0, %v933_v48, 0.0  ;;  %v980_v5 = vsel %vm693_vm0, %v975_v57, 0.0 }
 0x127   : > { %954 = vst.msk [vmem:[%s1714_s26] sm:$0xf] %vm953_vm5, %v1246_v51  ;;  %v1249_v55 = vpack.c.bf16 %v936_v52, %v936_v52  ;;  %v934_v56 = vmax.f32 %v930_v53, 0.0  ;;  %v977_v0 = vsel %vm693_vm0, %v973_v54, 0.0  ;;  %v976_v1 = vmul.f32 %v936_v52, %v936_v52 }
 0x128   : > { %v963_v6 = vsel %vm693_vm0, %v936_v52, 0.0 }
 0x129   : > { %957 = vst.msk [vmem:[%s1714_s26 + $0xc] sm:$0xf] %vm953_vm5, %v1249_v55  ;;  %v1247_v59 = vpack.c.bf16 %v934_v56, %v934_v56  ;;  %v959_v60 = vsel %vm693_vm0, %v934_v56, 0.0  ;;  %v974_v61 = vmul.f32 %v934_v56, %v934_v56  ;;  %v982_v9 = vsel %vm693_vm0, %v976_v1, 0.0 }
 0x12a   : > { %v960_v62 = vadd.f32 %v959_v60, %v958_v58 }
 0x12b   : > { %955 = vst.msk [vmem:[%s1714_s26 + $0x4] sm:$0xf] %vm953_vm5, %v1247_v59  ;;  %v978_v2 = vsel %vm693_vm0, %v974_v61, 0.0 }
 0x12c   : > { %v962_v3 = vadd.f32 %v961_v63, %v960_v62  ;;  %v979_v4 = vadd.f32 %v978_v2, %v977_v0 }
 0x12e   : > { %v964_v7 = vadd.f32 %v963_v6, %v962_v3  ;;  %v981_v8 = vadd.f32 %v980_v5, %v979_v4 }
 0x130   : > { %v965_v10 = vrot.slane %v964_v7, 4  ;;  %v983_v11 = vadd.f32 %v982_v9, %v981_v8  ;;  %v1025_v24 = vld [vmem:[%s1714_s26 + $0x8] sm:$0xff] (%p1581_p3)  }
 0x131   : > { %1026 = vst [vmem:[%s1004_s21 + $0x10] sm:$0xff] (%p1581_p3), %v1025_v24  }
 0x132   : > { %v966_v12 = vadd.f32 %v965_v10, %v964_v7  ;;  %v984_v13 = vrot.slane %v983_v11, 4  ;;  %v1021_v23 = vld [vmem:[%s1714_s26] sm:$0xff] (%p1581_p3)  }
 0x133   : > { %1022 = vst [vmem:[%s1004_s21] sm:$0xff] (%p1581_p3), %v1021_v23  }
 0x134   : > { %v967_v14 = vrot.slane %v966_v12, 2  ;;  %v985_v15 = vadd.f32 %v984_v13, %v983_v11 }
 0x136   : > { %v968_v16 = vadd.f32 %v967_v14, %v966_v12  ;;  %v986_v18 = vrot.slane %v985_v15, 2 }
 0x138   : > { %v969_v19 = vrot.slane %v968_v16, 1  ;;  %v987_v20 = vadd.f32 %v986_v18, %v985_v15 }
 0x13a   : > { %v970_v21 = vadd.f32 %v969_v19, %v968_v16  ;;  %v988_v22 = vrot.slane %v987_v20, 1  ;;  %1001 = sbr.rel (!%p1581_p3) target bundleno = 319 (0x13f), region = 175 }
 0x13c   : > { %972 = vst.msk [vmem:[%s546_s20] sm:$0x1] %vm971_vm6, %v970_v21  ;;  %v989_v17 = vadd.f32 %v988_v22, %v987_v20 }
 0x13e   : > { %990 = vst.msk [vmem:[%s546_s20 + $0x1] sm:$0x1] %vm971_vm6, %v989_v17 }
 0x13f PF: > { %s1795_s11 = sld [smem:[#allocation7_spill]]  ;;  %s1800_s27 = smov %s1416_s28 }
 0x140   : > { %s1796_s19 = sld [smem:[#allocation11_spill]]  ;;  %s1802_s29 = smov %s1424_s30 }
 0x141   : > { %s1797_s25 = sld [smem:[#allocation9_spill]] }
 0x142   : > { %s1798_s9 = sld [smem:[#allocation6_spill]] }
 0x143   : > { %s1799_s10 = sld [smem:[#allocation8_spill]] }
 0x145   : > { %p16_p8 = scmp.ge.s32.totalorder %s1795_s11, 4  }
 0x146   : > { %s1801_s28 = smov %s1796_s19 }
 0x147   : > { %s1803_s30 = smov %s1797_s25  ;;  %18 = sbr.rel (!%p16_p8) target bundleno = 6 (0x6), region = 277 }

// kernel: _lambda_.7
= control target key start
LH: loop header
LB: loop body
LE: loop exit
PB: predicated region body
PF: predicated region fallthrough
CT: control target
= control target key end

     0   :  { %s1701_s0 = inlined_call_operand.vmem [shape: bf16[2,32,64], index: 0, kind: input, shape index: {}, may-alias: {0,1,2}]   ;;  %s1702_s1 = inlined_call_operand.vmem [shape: bf16[2,32,64], index: 1, kind: input, shape index: {}, may-alias: {0,1,2}]   ;;  %s1703_s2 = inlined_call_operand.vmem [shape: bf16[2,32,64], index: 2, kind: input, shape index: {}, may-alias: {0,1,2}]   ;;  %s1704_s3 = inlined_call_operand.vmem [shape: f32[1,64], index: 3, kind: input, shape index: {}]   ;;  %s1705_s4 = inlined_call_operand.vmem [shape: f32[1,64], index: 4, kind: input, shape index: {}]   ;;  %s1706_s5 = inlined_call_operand.vmem [shape: bf16[3,64,128], index: 5, kind: input, shape index: {}]   ;;  %s1707_s6 = inlined_call_operand.vmem [shape: f32[1,128], index: 6, kind: input, shape index: {}]   ;;  %s1708_s7 = inlined_call_operand.vmem [shape: f32[2,32,128], index: 7, kind: output, shape index: {0}]   ;;  %s1709_s8 = inlined_call_operand.vmem [shape: f32[2,2,128], index: 8, kind: output, shape index: {1}]  }
   0x1   :  { %1714 = sst [smem:[#allocation12_spill]] %s1708_s7 }
   0x2   :  { %s1441_s27 = smov 0   ;;  %s1443_s28 = smov 0  }
   0x3   :  { %s1445_s29 = smov 0   ;;  %s1447_s30 = smov 0  }
   0x4   :  { %s1449_s9 = smov 0   ;;  %s1451_s10 = smov 0  }
   0x5   :  { %s1453_s11 = smov 0  }
   0x6 LB: > { %1715 = sst [smem:[#allocation6_spill]] %s1390_s10  ;;  %s1477_s12 = sadd.s32 4294967295, %s1394_s11   ;;  %s1394_s11 = sphi %s1453_s11, %s1729_s11   ;;  %s1390_s10 = sphi %s1451_s10, %s1738_s10   ;;  %s1386_s9 = sphi %s1449_s9, %s1732_s9   ;;  %s1382_s30 = sphi %s1447_s30, %s1737_s30   ;;  %s1378_s29 = sphi %s1445_s29, %s1736_s29   ;;  %s1374_s28 = sphi %s1443_s28, %s1735_s28   ;;  %s1370_s27 = sphi %s1441_s27, %s1734_s27  }
   0x7   : > { %s1480_s13 = sadd.s32 1, %s1394_s11   ;;  %s26_s15 = sadd.s32 1, %s1390_s10 }
   0x8   : > { %1716 = sst [smem:[#allocation7_spill]] %s1480_s13  ;;  %s23_s14 = ssub.s32 %s1394_s11, %s1480_s13 }
   0x9   : > { %p24_p0 = scmp.eq.s32.totalorder %s23_s14, 0  ;;  %p33_p1 = scmp.ne.s32.totalorder %s1390_s10, %s1386_s9 }
   0xa   : > { %p34_p2 = scmp.eq.s32.totalorder %s1394_s11, 0  ;;  %p50_p3 = scmp.gt.s32.totalorder %s1477_s12, 0 }
   0xb   : > { %s1490_s16 = scalar_select %p24_p0, %s1390_s10, %s26_s15  }
   0xc   : > { %p1497_p4 = por %p34_p2, %p33_p1  ;;  %s1146_s18 = sadd.s32 4294967295, %s1480_s13 }
   0xd   : > { %1717 = sst [smem:[#allocation8_spill]] %s1490_s16  ;;  %p53_p5 = scmp.gt.s32.totalorder %s1146_s18, 0 }
   0xe   : > { %s1503_s19 = scalar_select %p50_p3, %s1477_s12, 0 }
   0xf   : > { %s58_s20 = sadd.s32 1, %s1382_s30  ;;  %p65_p6 = scmp.ne.s32.totalorder %s1382_s30, %s1378_s29 }
  0x10   : > { %p82_p7 = scmp.lt.s32.totalorder %s1480_s13, 1  ;;  %s1740_s18 = smov (!%p53_p5, %s1146_s18), 0 }
  0x11   : > { %p1511_p8 = por %p65_p6, %p34_p2  ;;  %s84_s22 = sadd.s32 1, %s1480_s13 }
  0x12   : > { %s55_s23 = ssub.s32 %s1503_s19, %s1740_s18  ;;  %p85_p9 = scmp.lt.s32.totalorder %s84_s22, 1 }
  0x13   : > { %p56_p10 = scmp.eq.s32.totalorder %s55_s23, 0  ;;  %p97_p11 = scmp.ne.s32.totalorder %s1374_s28, %s1370_s27 }
  0x14   : > { %s1518_s24 = scalar_select %p82_p7, %s1480_s13, 1 }
  0x15   : > { %s1521_s25 = scalar_select %p56_p10, %s1382_s30, %s58_s20  }
  0x16   : > { %s1742_s22 = smov (!%p85_p9, %s84_s22), 1  ;;  %p211_p12 = scmp.eq.s32.totalorder %s1477_s12, 1 }
  0x17   : > { %1720 = sst [smem:[#allocation9_spill]] %s1521_s25  ;;  %s87_s26 = ssub.s32 %s1518_s24, %s1742_s22 }
  0x18   : > { %s90_s14 = sadd.s32 1, %s1374_s28  ;;  %p88_p13 = scmp.eq.s32.totalorder %s87_s26, 0 }
  0x19   : > { %p1530_p0 = por %p97_p11, %p34_p2  ;;  %p1539_p3 = por %p211_p12, %p33_p1 }
  0x1a   : > { %s1544_s23 = scalar_select %p88_p13, %s1374_s28, %s90_s14  }
  0x1b   : > { %s1722_s18 = scalar_select %p1539_p3, 1, 0 }
  0x1c   : > { %1724 = sst [smem:[#allocation11_spill]] %s1544_s23  ;;  %p1148_p5 = scmp.ge.s32.totalorder %s1394_s11, 2 }
  0x1d   : > { %1723 = sst [smem:[#allocation10_spill]] %s1722_s18 }
  0x1e   : > { %271 = sbr.rel (%p1148_p5) target bundleno = 50 (0x32), region = 32 }
  0x23   : > { %274 = sbr.rel (!%p1497_p4) target bundleno = 40 (0x28), region = 36  ;;  %s276_s20 = sand.u32 (%p1497_p4), 1, %s1390_s10  }
  0x24   : > { %s1205_s22 = sshll.u32 (%p1497_p4), %s1394_s11, 3  ;;  %s1149_s26 = sshll.u32 (%p1497_p4), %s276_s20, 4 }
  0x25   : > { %s281_s13 = scalar_lea.vmem (%p1497_p4), %s1701_s0, %s1205_s22  ;;  %s278_s7 = scalar_lea.vmem (%p1497_p4), [#allocation2], %s1149_s26 }
  0x26   : > { %v298_v0 = vld [vmem:[%s281_s13] sm:$0xff] (%p1497_p4)   ;;  %v302_v1 = vld [vmem:[%s281_s13 + $0x10] sm:$0xff] (%p1497_p4)  }
  0x27   : > { %299 = vst [vmem:[%s278_s7] sm:$0xff] (%p1497_p4), %v298_v0   ;;  %303 = vst [vmem:[%s278_s7 + $0x8] sm:$0xff] (%p1497_p4), %v302_v1  }
  0x28 PF: > { %337 = sbr.rel (!%p1511_p8) target bundleno = 45 (0x2d), region = 77  ;;  %s339_s17 = sand.u32 (%p1511_p8), 1, %s1382_s30  }
  0x29   : > { %s1206_s14 = sshll.u32 (%p1511_p8), %s1503_s19, 3  ;;  %s1152_s10 = sshll.u32 (%p1511_p8), %s339_s17, 4 }
  0x2a   : > { %s347_s18 = scalar_lea.vmem (%p1511_p8), %s1702_s1, %s1206_s14  ;;  %s341_s16 = scalar_lea.vmem (%p1511_p8), [#allocation3], %s1152_s10 }
  0x2b   : > { %v364_v2 = vld [vmem:[%s347_s18] sm:$0xff] (%p1511_p8)   ;;  %v368_v3 = vld [vmem:[%s347_s18 + $0x10] sm:$0xff] (%p1511_p8)  }
  0x2c   : > { %365 = vst [vmem:[%s341_s16] sm:$0xff] (%p1511_p8), %v364_v2   ;;  %369 = vst [vmem:[%s341_s16 + $0x8] sm:$0xff] (%p1511_p8), %v368_v3  }
  0x2d PF: > { %403 = sbr.rel (!%p1530_p0) target bundleno = 50 (0x32), region = 118  ;;  %s405_s7 = sand.u32 (%p1530_p0), 1, %s1374_s28  }
  0x2e   : > { %s1207_s13 = sshll.u32 (%p1530_p0), %s1518_s24, 3  ;;  %s1156_s21 = sshll.u32 (%p1530_p0), %s405_s7, 4 }
  0x2f   : > { %s413_s22 = scalar_lea.vmem (%p1530_p0), %s1703_s2, %s1207_s13  ;;  %s407_s23 = scalar_lea.vmem (%p1530_p0), [#allocation4], %s1156_s21 }
  0x30   : > { %v430_v4 = vld [vmem:[%s413_s22] sm:$0xff] (%p1530_p0)   ;;  %v434_v5 = vld [vmem:[%s413_s22 + $0x10] sm:$0xff] (%p1530_p0)  }
  0x31   : > { %431 = vst [vmem:[%s407_s23] sm:$0xff] (%p1530_p0), %v430_v4   ;;  %435 = vst [vmem:[%s407_s23 + $0x8] sm:$0xff] (%p1530_p0), %v434_v5  }
  0x32 PF: > { %p1159_p1 = scmp.ge.s32.totalorder %s1394_s11, 1  ;;  %p468_p2 = scmp.lt.s32.totalorder %s1394_s11, 3 }
  0x34   : > { %p469_p4 = pnand %p1159_p1, %p468_p2 }
  0x35   : > { %s475_s15 = sand.u32 (!%p469_p4), 1, %s1386_s9   ;;  %s482_s23 = sand.u32 (!%p469_p4), 1, %s1378_s29  }
  0x36   : > { %472 = sbr.rel (%p469_p4) target bundleno = 318 (0x13e), region = 159  ;;  %s1160_s17 = sshll.u32 (!%p469_p4), %s475_s15, 4 }
  0x37   : > { %s1161_s18 = sshll.u32 (!%p469_p4), %s482_s23, 4  ;;  %s477_s29 = scalar_lea.vmem (!%p469_p4), [#allocation2], %s1160_s17 }
  0x38   : > { %s484_s16 = scalar_lea.vmem (!%p469_p4), [#allocation3], %s1161_s18  ;;  %p594_p6 = scmp.eq.s32.totalorder (!%p469_p4), %s1477_s12, 0 }
  0x39   : > { %s489_s7 = sand.u32 (!%p469_p4), 1, %s1370_s27   ;;  %s1163_s20 = sshll.u32 (!%p469_p4), %s475_s15, 5 }
  0x3a   : > { %s1162_s27 = sshll.u32 (!%p469_p4), %s489_s7, 4  ;;  %p543_p7 = scmp.lt.s32.totalorder (!%p469_p4), %s1477_s12, 1 }
  0x3b   : > { %v1328_v6 = vld [vmem:[%s1706_s5 + $0x38] sm:$0xff]   ;;  %v559_v7 = vlaneseq  ;;  %v1330_v9 = vld [vmem:[%s1706_s5 + $0x30] sm:$0xff]   ;;  %v1332_v12 = vld [vmem:[%s1706_s5 + $0x28] sm:$0xff]   ;;  %vm693_vm0 = vcmask 523264   ;;  %s595_s17 = scalar_select %p594_p6, 1, 0 }
  0x3c   : > { %v1329_v8 = vld [vmem:[%s1706_s5 + $0x18] sm:$0xff]   ;;  %1236 = vmatprep.subr.bf16.mxu0 %v1328_v6  ;;  %v1331_v10 = vld [vmem:[%s1706_s5 + $0x10] sm:$0xff]   ;;  %v1333_v13 = vld [vmem:[%s1706_s5 + $0x8] sm:$0xff]   ;;  %vm616_vm2 = vcmask 1040384   ;;  %s491_s19 = scalar_lea.vmem [#allocation4], %s1162_s27  ;;  %vm629_vm4 = vcmask 1046528  }
  0x3d   : > { %1248 = vmatprep.subr.bf16.mxu1 %v1329_v8  ;;  %1237 = vmatpush3.bf16.msra.mxu0 %v1328_v6  ;;  %v560_v11 = vshrl.u32 %v559_v7, 7  ;;  %v1334_v15 = vld [vmem:[%s1706_s5 + $0x20] sm:$0xff]   ;;  %v1217_v22 = vld [vmem:[%s477_s29 + $0x8] sm:$0xff]   ;;  %v596_v39 = vstv %s595_s17  ;;  %s601_s25 = scalar_select %p211_p12, 1, 0  ;;  %v1337_v59 = vld [vmem:[%s1706_s5 + $0x50] sm:$0xff]  }
  0x3e   : > { %1249 = vmatpush3.bf16.msra.mxu1 %v1329_v8  ;;  %1238 = vmatprep.subr.bf16.mxu0 %v1330_v9  ;;  %v1335_v16 = vld [vmem:[%s1706_s5] sm:$0xff]   ;;  %v579_v26 = vld [vmem:[%s484_s16 + $0xc] sm:$0x8]  ;;  %v1215_v27 = vunpack.c.l.bf16 %v1217_v22  ;;  %v1216_v28 = vunpack.c.h.bf16 %v1217_v22  ;;  %vm1617_vm1 = vcmp.eq.s32.totalorder %v596_v39, 1  ;;  %v587_v52 = vld [vmem:[%s491_s19 + $0x8] sm:$0x1] }
  0x3f   : > { %1250 = vmatprep.subr.bf16.mxu1 %v1331_v10  ;;  %v561_v14 = vsub.s32 0, %v560_v11  ;;  %v1601_v17 = vld [vmem:[%s1704_s3] sm:$0x1]  ;;  %v578_v25 = vld [vmem:[%s484_s16 + $0x4] sm:$0x8]  ;;  %v581_v30 = vunpack.c.l.bf16 %v579_v26  ;;  %v1336_v33 = vld [vmem:[%s1706_s5 + $0x58] sm:$0xff]   ;;  %v589_v63 = vunpack.c.l.bf16 %v587_v52  ;;  %v602_v2 = vstv %s601_s25 }
  0x40   : > { %v1606_v18 = vld [vmem:[%s1705_s4] sm:$0x1]  ;;  %v580_v29 = vunpack.c.l.bf16 %v578_v25  ;;  %v1338_v8 = vld [vmem:[%s1706_s5 + $0x48] sm:$0xff]   ;;  %vm603_vm3 = vcmp.eq.s32.totalorder %v602_v2, 1  ;;  %s544_s9 = scalar_select %p543_p7, %s1477_s12, 1 }
  0x41   : > { %1239 = vmatpush3.bf16.msra.mxu0 %v1330_v9  ;;  %v1210_v19 = vld [vmem:[%s477_s29] sm:$0xff]   ;;  %v562_v23 = vrot.slane %v1601_v17, %v561_v14  ;;  %v572_v24 = vrot.slane %v1606_v18, %v561_v14  ;;  %v591_v5 = vmul.f32 %v589_v63, %v1601_v17  ;;  %s1658_s29 = scalar_lea.vmem [#allocation5], %s1163_s20  ;;  %s1208_s21 = sshll.u32 (%p1539_p3), %s1477_s12, 4 }
  0x42   : > { %1251 = vmatpush3.bf16.msra.mxu1 %v1331_v10  ;;  %1240 = vmatprep.subr.bf16.mxu0 %v1332_v12  ;;  %v1211_v20 = vunpack.c.l.bf16 %v1210_v19  ;;  %v1212_v21 = vunpack.c.h.bf16 %v1210_v19  ;;  %v586_v47 = vld [vmem:[%s491_s19] sm:$0x1]  ;;  %s1164_s15 = sshll.u32 %s544_s9, 1  ;;  %s1728_s25 = sld [smem:[#allocation12_spill]] (%p1539_p3) }
  0x43   : > { %1252 = vmatprep.subr.bf16.mxu1 %v1333_v13  ;;  %v582_v34 = vmul.f32 %v580_v29, %v562_v23  ;;  %v583_v35 = vmul.f32 %v581_v30, %v562_v23  ;;  %v566_v36 = vmul.f32 %v1215_v27, %v562_v23  ;;  %v567_v40 = vmul.f32 %v1216_v28, %v562_v23  ;;  %s546_s17 = scalar_lea.vmem %s1709_s8, %s1164_s15 }
  0x44   : > { %v564_v31 = vmul.f32 %v1211_v20, %v562_v23  ;;  %v565_v32 = vmul.f32 %v1212_v21, %v562_v23  ;;  %v588_v62 = vunpack.c.l.bf16 %v586_v47  ;;  %v593_v10 = vadd.f32 %v591_v5, %v1606_v18 }
  0x45   : > { %1241 = vmatpush3.bf16.msra.mxu0 %v1332_v12  ;;  %v584_v41 = vadd.f32 %v582_v34, %v572_v24  ;;  %v585_v42 = vadd.f32 %v583_v35, %v572_v24  ;;  %v576_v44 = vadd.f32 %v572_v24, %v566_v36  ;;  %v577_v51 = vadd.f32 %v572_v24, %v567_v40 }
  0x46   : > { %1253 = vmatpush3.bf16.msra.mxu1 %v1333_v13  ;;  %1242 = vmatprep.subr.bf16.mxu0 %v1334_v15  ;;  %v574_v37 = vadd.f32 %v572_v24, %v564_v31  ;;  %v1615_v38 = vadd.f32 %v572_v24, %v565_v32  ;;  %v590_v4 = vmul.f32 %v588_v62, %v1601_v17  ;;  %v605_v14 = vsel %vm603_vm3, 0.0, %v593_v10 }
  0x47   : > { %1254 = vmatprep.subr.bf16.mxu1 %v1335_v16  ;;  %v598_v48 = vsel %vm1617_vm1, 0.0, %v584_v41  ;;  %v599_v49 = vsel %vm1617_vm1, 0.0, %v585_v42  ;;  %v620_v55 = vrot.slane %v576_v44, 7  ;;  %v659_v57 = vpack.c.bf16 %v577_v51, %v576_v44 }
  0x48   : > { %v658_v45 = vpack.c.bf16 %v1615_v38, %v574_v37  ;;  %v617_v46 = vrot.slane %v574_v37, 7  ;;  %v618_v50 = vrot.slane %v1615_v38, 7  ;;  %v608_v53 = vrot.slane %v598_v48, 7  ;;  %s978_s22 = scalar_lea.vmem (%p1539_p3), %s1728_s25, %s1208_s21 }
  0x49   : > { %1243 = vmatpush3.bf16.msra.mxu0 %v1334_v15  ;;  %v609_v54 = vrot.slane %v599_v49, 7  ;;  %v621_v58 = vrot.slane %v577_v51, 7  ;;  %v630_v6 = vrot.slane %v574_v37, 1  ;;  %v631_v7 = vrot.slane %v1615_v38, 1  ;;  %v1339_v15 = vld [vmem:[%s1706_s5 + $0x40] sm:$0xff]  }
  0x4a   : > { %1255 = vmatpush3.bf16.msra.mxu1 %v1335_v16  ;;  %1260 = vmatprep.subr.bf16.mxu0 %v1336_v33  ;;  %v619_v56 = vsel %vm616_vm2, %v617_v46, %v618_v50  ;;  %v627_v60 = vsel %vm616_vm2, %v608_v53, %v617_v46  ;;  %v592_v9 = vadd.f32 %v590_v4, %v1606_v18  ;;  %v633_v11 = vrot.slane %v576_v44, 1 }
  0x4b   : > { %1244 = vmatprep.mubr.msk.bf16.mxu0 %vm693_vm0, %v658_v45  ;;  %v628_v61 = vsel %vm616_vm2, %v609_v54, %v620_v55  ;;  %v648_v0 = vpack.c.bf16 %v619_v56, %v627_v60  ;;  %v622_v1 = vsel %vm616_vm2, %v620_v55, %v621_v58  ;;  %v634_v12 = vrot.slane %v577_v51, 1 }
  0x4c   : > { %1245 = vmatmul.mubr.msk.bf16.vlgmr.msra.gmra.mxu0 %vm693_vm0, %v659_v57  ;;  %v649_v3 = vpack.c.bf16 %v622_v1, %v628_v61  ;;  %v604_v13 = vsel %vm603_vm3, 0.0, %v592_v9  ;;  %v632_v16 = vsel %vm629_vm4, %v630_v6, %v631_v7  ;;  %v643_v19 = vrot.slane %v605_v14, 1 }
  0x4d   : > { %1261 = vmatpush3.bf16.msra.mxu0 %v1336_v33  ;;  %1256 = vmatprep.mubr.msk.bf16.mxu1 %vm693_vm0, %v648_v0  ;;  %v642_v17 = vrot.slane %v604_v13, 1  ;;  %v635_v22 = vsel %vm629_vm4, %v633_v11, %v634_v12  ;;  %v1199_v33 = vld [vmem:[%s1707_s6] ss:$0 sm:$0xff] }
  0x4e   : > { %1262 = vmatprep.subr.bf16.mxu0 %v1337_v59  ;;  %1257 = vmatmul.mubr.msk.bf16.vlgmr.msra.gmra.mxu1 %vm693_vm0, %v649_v3  ;;  %v647_v23 = vsel %vm629_vm4, %v634_v12, %v643_v19 }
  0x4f   : > { %v646_v20 = vsel %vm629_vm4, %v631_v7, %v642_v17  ;;  %v829_v18 = vpack.c.bf16 %v647_v23, %v635_v22 }
  0x50   : > { %v828_v21 = vpack.c.bf16 %v646_v20, %v632_v16 }
  0x51   : > { %1263 = vmatpush3.bf16.msra.mxu0 %v1337_v59 }
  0x52   : > { %1264 = vmatprep.subr.bf16.mxu0 %v1338_v8  ;;  %1268 = vmatprep.mubr.msk.bf16.mxu0 %vm693_vm0, %v828_v21 }
  0x55   : > { %1265 = vmatpush3.bf16.msra.mxu0 %v1338_v8 }
  0x56   : > { %1266 = vmatprep.subr.bf16.mxu0 %v1339_v15 }
  0x59   : > { %1267 = vmatpush3.bf16.msra.mxu0 %v1339_v15 }
  0x5c   : > { %1269 = vmatmul.mubr.msk.bf16.vlgmr.msra.gmra.mxu0 %vm693_vm0, %v829_v18 }
 0x10c   : > { %v1246_v24 = vpop.f32.mrf.mxu0 }
 0x10e   : > { %v1258_v25 = vpop.f32.mrf.mxu1  ;;  %v734_v26 = vpop.f32.mrf.mxu0 }
 0x10f   : > { %v822_v31 = vadd.f32 %v1258_v25, %v1246_v24 }
 0x110   : > { %v813_v27 = vpop.f32.mrf.mxu1  ;;  %v1247_v28 = vpop.f32.mrf.mxu0 }
 0x111   : > { %v814_v34 = vadd.f32 %v813_v27, %v734_v26 }
 0x112   : > { %v1259_v29 = vpop.f32.mrf.mxu1  ;;  %v737_v30 = vpop.f32.mrf.mxu0 }
 0x113   : > { %v825_v38 = vadd.f32 %v1259_v29, %v1247_v28 }
 0x114   : > { %v816_v36 = vpop.f32.mrf.mxu1 }
 0x115   : > { %v817_v42 = vadd.f32 %v816_v36, %v737_v30 }
 0x11c   : > { %v1270_v32 = vpop.f32.mrf.mxu0 }
 0x11d   : > { %v920_v35 = vadd.f32 %v1270_v32, %v822_v31 }
 0x11e   : > { %v903_v37 = vpop.f32.mrf.mxu0 }
 0x11f   : > { %v931_v39 = vadd.f32 %v1199_v33, %v920_v35  ;;  %v918_v40 = vadd.f32 %v903_v37, %v814_v34 }
 0x120   : > { %v1271_v41 = vpop.f32.mrf.mxu0 }
 0x121   : > { %v935_v43 = vmax.f32 %v931_v39, 0.0  ;;  %v929_v44 = vadd.f32 %v1199_v33, %v918_v40  ;;  %v921_v45 = vadd.f32 %v1271_v41, %v825_v38 }
 0x122   : > { %v906_v46 = vpop.f32.mrf.mxu0 }
 0x123   : > { %939 = vst [vmem:[%s1658_s29 + $0x10] sm:$0xff] %v935_v43  ;;  %v933_v47 = vmax.f32 %v929_v44, 0.0  ;;  %v932_v48 = vadd.f32 %v1199_v33, %v921_v45  ;;  %v919_v49 = vadd.f32 %v906_v46, %v817_v42  ;;  %v953_v56 = vmul.f32 %v935_v43, %v935_v43 }
 0x125   : > { %937 = vst [vmem:[%s1658_s29] sm:$0xff] %v933_v47  ;;  %v936_v50 = vmax.f32 %v932_v48, 0.0  ;;  %v930_v51 = vadd.f32 %v1199_v33, %v919_v49  ;;  %v951_v53 = vmul.f32 %v933_v47, %v933_v47 }
 0x127   : > { %940 = vst [vmem:[%s1658_s29 + $0x18] sm:$0xff] %v936_v50  ;;  %v934_v52 = vmax.f32 %v930_v51, 0.0  ;;  %v954_v59 = vmul.f32 %v936_v50, %v936_v50 }
 0x129   : > { %938 = vst [vmem:[%s1658_s29 + $0x8] sm:$0xff] %v934_v52  ;;  %v941_v54 = vadd.f32 %v934_v52, %v933_v47  ;;  %v952_v55 = vmul.f32 %v934_v52, %v934_v52 }
 0x12a   : > { %v1017_v13 = vld [vmem:[%s1658_s29 + $0x10] sm:$0xff] (%p1539_p3) }
 0x12b   : > { %v942_v57 = vadd.f32 %v941_v54, %v935_v43  ;;  %v955_v58 = vadd.f32 %v952_v55, %v951_v53  ;;  %1018 = vst [vmem:[%s978_s22 + $0x20] sm:$0xff] (%p1539_p3), %v1017_v13 }
 0x12c   : > { %v1013_v11 = vld [vmem:[%s1658_s29] sm:$0xff] (%p1539_p3) }
 0x12d   : > { %v943_v60 = vadd.f32 %v942_v57, %v936_v50  ;;  %v956_v61 = vadd.f32 %v955_v58, %v953_v56  ;;  %1014 = vst [vmem:[%s978_s22] sm:$0xff] (%p1539_p3), %v1013_v11 }
 0x12e   : > { %v1019_v14 = vld [vmem:[%s1658_s29 + $0x18] sm:$0xff] (%p1539_p3) }
 0x12f   : > { %v944_v62 = vrot.slane %v943_v60, 4  ;;  %v957_v63 = vadd.f32 %v956_v61, %v954_v59  ;;  %1020 = vst [vmem:[%s978_s22 + $0x28] sm:$0xff] (%p1539_p3), %v1019_v14 }
 0x130   : > { %v1015_v12 = vld [vmem:[%s1658_s29 + $0x8] sm:$0xff] (%p1539_p3) }
 0x131   : > { %v945_v0 = vadd.f32 %v944_v62, %v943_v60  ;;  %v958_v1 = vrot.slane %v957_v63, 4  ;;  %1016 = vst [vmem:[%s978_s22 + $0x8] sm:$0xff] (%p1539_p3), %v1015_v12 }
 0x133   : > { %v946_v2 = vrot.slane %v945_v0, 2  ;;  %v959_v3 = vadd.f32 %v958_v1, %v957_v63 }
 0x135   : > { %v947_v4 = vadd.f32 %v946_v2, %v945_v0  ;;  %v960_v5 = vrot.slane %v959_v3, 2 }
 0x137   : > { %v948_v6 = vrot.slane %v947_v4, 1  ;;  %v961_v7 = vadd.f32 %v960_v5, %v959_v3 }
 0x139   : > { %v949_v8 = vadd.f32 %v948_v6, %v947_v4  ;;  %v962_v9 = vrot.slane %v961_v7, 1  ;;  %975 = sbr.rel (!%p1539_p3) target bundleno = 318 (0x13e), region = 175 }
 0x13b   : > { %950 = vst [vmem:[%s546_s17] sm:$0x1] %v949_v8  ;;  %v963_v10 = vadd.f32 %v962_v9, %v961_v7 }
 0x13d   : > { %964 = vst [vmem:[%s546_s17 + $0x1] sm:$0x1] %v963_v10 }
 0x13e PF: > { %s1729_s11 = sld [smem:[#allocation7_spill]]  ;;  %s1734_s27 = smov %s1374_s28 }
 0x13f   : > { %s1730_s23 = sld [smem:[#allocation11_spill]]  ;;  %s1736_s29 = smov %s1382_s30 }
 0x140   : > { %s1731_s10 = sld [smem:[#allocation9_spill]] }
 0x141   : > { %s1732_s9 = sld [smem:[#allocation6_spill]] }
 0x142   : > { %s1733_s12 = sld [smem:[#allocation8_spill]] }
 0x144   : > { %p16_p8 = scmp.ge.s32.totalorder %s1729_s11, 4  }
 0x145   : > { %s1735_s28 = smov %s1730_s23 }
 0x146   : > { %s1737_s30 = smov %s1731_s10  ;;  %18 = sbr.rel (!%p16_p8) target bundleno = 6 (0x6), region = 274 }
 0x148   : > { %s1738_s10 = smov %s1733_s12 }

// kernel: _lambda_.8
= control target key start
LH: loop header
LB: loop body
LE: loop exit
PB: predicated region body
PF: predicated region fallthrough
CT: control target
= control target key end

     0   :  { %vm236_vm0 = vcmask 1040384   ;;  %v911_v44 = vmov 0.0   ;;  %vm249_vm2 = vcmask 1046528   ;;  %vm912_vm3 = vmmov 1   ;;  %s1095_s0 = inlined_call_operand.vmem [shape: f32[2,32,128], index: 0, kind: input, shape index: {}, may-alias: {0,1,2}]   ;;  %s1096_s1 = inlined_call_operand.vmem [shape: f32[2,32,128], index: 1, kind: input, shape index: {}, may-alias: {0,1,2}]   ;;  %s1097_s2 = inlined_call_operand.vmem [shape: f32[2,32,128], index: 2, kind: input, shape index: {}, may-alias: {0,1,2}]   ;;  %s1098_s3 = inlined_call_operand.vmem [shape: f32[1,128], index: 3, kind: input, shape index: {}]   ;;  %s1099_s4 = inlined_call_operand.vmem [shape: f32[1,128], index: 4, kind: input, shape index: {}]   ;;  %s1100_s5 = inlined_call_operand.vmem [shape: bf16[3,128,128], index: 5, kind: input, shape index: {}]   ;;  %s1101_s6 = inlined_call_operand.vmem [shape: f32[1,128], index: 6, kind: input, shape index: {}]   ;;  %s1102_s7 = inlined_call_operand.vmem [shape: bf16[2,16,128], index: 7, kind: output, shape index: {0}]   ;;  %s1103_s8 = inlined_call_operand.vmem [shape: f32[1,2,128], index: 8, kind: output, shape index: {1}]  }
   0x1   :  { %v887_v0 = vld [vmem:[%s1100_s5 + $0x78] sm:$0xff]   ;;  %v889_v2 = vld [vmem:[%s1100_s5 + $0x70] sm:$0xff]   ;;  %v891_v4 = vld [vmem:[%s1100_s5 + $0x68] sm:$0xff]   ;;  %v262_v45 = vrot.slane %v911_v44, 1 }
   0x2   :  { %v888_v1 = vld [vmem:[%s1100_s5 + $0x38] sm:$0xff]   ;;  %825 = vmatprep.subr.bf16.mxu0 %v887_v0  ;;  %v890_v3 = vld [vmem:[%s1100_s5 + $0x30] sm:$0xff]   ;;  %v892_v5 = vld [vmem:[%s1100_s5 + $0x28] sm:$0xff]  }
   0x3   :  { %845 = vmatprep.subr.bf16.mxu1 %v888_v1  ;;  %826 = vmatpush3.bf16.msra.mxu0 %v887_v0  ;;  %v893_v6 = vld [vmem:[%s1100_s5 + $0x60] sm:$0xff]   ;;  %v895_v8 = vld [vmem:[%s1100_s5 + $0x58] sm:$0xff]   ;;  %v897_v10 = vld [vmem:[%s1100_s5 + $0x50] sm:$0xff]  }
   0x4   :  { %846 = vmatpush3.bf16.msra.mxu1 %v888_v1  ;;  %827 = vmatprep.subr.bf16.mxu0 %v889_v2  ;;  %v894_v7 = vld [vmem:[%s1100_s5 + $0x20] sm:$0xff]   ;;  %v896_v9 = vld [vmem:[%s1100_s5 + $0x18] sm:$0xff]   ;;  %v898_v11 = vld [vmem:[%s1100_s5 + $0x10] sm:$0xff]  }
   0x5   :  { %847 = vmatprep.subr.bf16.mxu1 %v890_v3  ;;  %v705_v12 = vld [vmem:[%s1098_s3] ss:$0 sm:$0xff]  ;;  %v702_v15 = vld [vmem:[%s1095_s0 + $0x10] ss:$2 sm:$0xff]  ;;  %v707_v17 = vld [vmem:[%s1095_s0 + $0x1] ss:$2 sm:$0xff] }
   0x6   :  { %v706_v13 = vld [vmem:[%s1099_s4] ss:$0 sm:$0xff]  ;;  %v708_v18 = vld [vmem:[%s1095_s0 + $0x11] ss:$2 sm:$0xff]  ;;  %v163_v19 = vmul.f32 %v705_v12, %v702_v15  ;;  %v184_v20 = vmul.f32 %v707_v17, %v705_v12  ;;  %v704_v23 = vld [vmem:[%s1095_s0 + $0x30] ss:$2 sm:$0xff] }
   0x7   :  { %828 = vmatpush3.bf16.msra.mxu0 %v889_v2  ;;  %v149_v14 = vld [vmem:[%s1095_s0] ss:$2 sm:$0xff]  ;;  %v185_v21 = vmul.f32 %v708_v18, %v705_v12  ;;  %v709_v24 = vld [vmem:[%s1095_s0 + $0x21] ss:$2 sm:$0xff]  ;;  %v165_v27 = vmul.f32 %v705_v12, %v704_v23  ;;  %v710_v28 = vld [vmem:[%s1095_s0 + $0x31] ss:$2 sm:$0xff] }
   0x8   :  { %848 = vmatpush3.bf16.msra.mxu1 %v890_v3  ;;  %829 = vmatprep.subr.bf16.mxu0 %v891_v4  ;;  %v162_v16 = vmul.f32 %v705_v12, %v149_v14  ;;  %v703_v22 = vld [vmem:[%s1095_s0 + $0x20] ss:$2 sm:$0xff]  ;;  %v186_v29 = vmul.f32 %v709_v24, %v705_v12  ;;  %v173_v31 = vadd.f32 %v706_v13, %v163_v19  ;;  %vm743_vm1 = vmneg %vm236_vm0  ;;  %v903_v58 = vld [vmem:[%s1100_s5 + $0xb8] sm:$0xff]  }
   0x9   :  { %849 = vmatprep.subr.bf16.mxu1 %v892_v5  ;;  %v164_v26 = vmul.f32 %v705_v12, %v703_v22  ;;  %v899_v30 = vld [vmem:[%s1100_s5 + $0x48] sm:$0xff]   ;;  %v188_v32 = vadd.f32 %v706_v13, %v184_v20  ;;  %v189_v33 = vadd.f32 %v706_v13, %v185_v21  ;;  %v175_v36 = vadd.f32 %v706_v13, %v165_v27  ;;  %v901_v41 = vld [vmem:[%s1100_s5 + $0x40] sm:$0xff]   ;;  %vm1041_vm4 = vmpackc.low %vm912_vm3, %vm743_vm1 }
   0xa   :  { %v172_v25 = vadd.f32 %v706_v13, %v162_v16  ;;  %v900_v34 = vld [vmem:[%s1100_s5 + $0x8] sm:$0xff]   ;;  %v187_v37 = vmul.f32 %v710_v28, %v705_v12  ;;  %v190_v38 = vadd.f32 %v706_v13, %v186_v29  ;;  %v902_v46 = vld [vmem:[%s1100_s5] sm:$0xff]   ;;  %v904_v0 = vld [vmem:[%s1100_s5 + $0xb0] sm:$0xff]  }
   0xb   :  { %830 = vmatpush3.bf16.msra.mxu0 %v891_v4  ;;  %v174_v35 = vadd.f32 %v706_v13, %v164_v26  ;;  %v193_v40 = vmax.f32 %v173_v31, %v189_v33  ;;  %v905_v2 = vld [vmem:[%s1100_s5 + $0xa8] sm:$0xff]   ;;  %v906_v3 = vld [vmem:[%s1100_s5 + $0xa0] sm:$0xff]   ;;  %v907_v4 = vld [vmem:[%s1100_s5 + $0x98] sm:$0xff]  }
   0xc   :  { %850 = vmatpush3.bf16.msra.mxu1 %v892_v5  ;;  %831 = vmatprep.subr.bf16.mxu0 %v893_v6  ;;  %v192_v39 = vmax.f32 %v172_v25, %v188_v32  ;;  %v191_v42 = vadd.f32 %v706_v13, %v187_v37  ;;  %v908_v5 = vld [vmem:[%s1100_s5 + $0x90] sm:$0xff]   ;;  %v775_v25 = vld [vmem:[%s1101_s6] ss:$0 sm:$0xff] }
   0xd   :  { %851 = vmatprep.subr.bf16.mxu1 %v894_v7  ;;  %v1033_v43 = vmax.f32 %v174_v35, %v190_v38  ;;  %v251_v48 = vrot.slane %v193_v40, 1  ;;  %v238_v52 = vrot.slane %v193_v40, 7 }
   0xe   :  { %v250_v47 = vrot.slane %v192_v39, 1  ;;  %v286_v49 = vpack.c.bf16 %v193_v40, %v192_v39  ;;  %v237_v50 = vrot.slane %v192_v39, 7  ;;  %v195_v51 = vmax.f32 %v175_v36, %v191_v42 }
   0xf   :  { %832 = vmatpush3.bf16.msra.mxu0 %v893_v6  ;;  %v240_v53 = vrot.slane %v1033_v43, 7  ;;  %v266_v61 = vsel %vm249_vm2, %v251_v48, %v262_v45  ;;  %v909_v6 = vld [vmem:[%s1100_s5 + $0x88] sm:$0xff]  }
  0x10   :  { %852 = vmatpush3.bf16.msra.mxu1 %v894_v7  ;;  %833 = vmatprep.subr.bf16.mxu0 %v895_v8  ;;  %v239_v54 = vsel %vm236_vm0, %v237_v50, %v238_v52  ;;  %v241_v55 = vrot.slane %v195_v51, 7  ;;  %v252_v60 = vsel %vm249_vm2, %v250_v47, %v251_v48  ;;  %v287_v62 = vpack.c.bf16 %v195_v51, %v1033_v43 }
  0x11   :  { %853 = vmatprep.subr.bf16.mxu1 %v896_v9  ;;  %841 = vmatprep.mubr.bf16.mxu0 %v286_v49  ;;  %v745_v57 = vpack.c.bf16 %v239_v54, %v237_v50  ;;  %v499_v1 = vpack.c.bf16 %v266_v61, %v252_v60  ;;  %v253_v7 = vrot.slane %v1033_v43, 1 }
  0x12   :  { %v242_v59 = vsel %vm236_vm0, %v240_v53, %v241_v55 }
  0x13   :  { %834 = vmatpush3.bf16.msra.mxu0 %v895_v8  ;;  %861 = vmatprep.mubr.msk.bf16.mxu1 %vm1041_vm4, %v745_v57  ;;  %v749_v63 = vpack.c.bf16 %v242_v59, %v240_v53  ;;  %v254_v8 = vrot.slane %v195_v51, 1 }
  0x14   :  { %854 = vmatpush3.bf16.msra.mxu1 %v896_v9  ;;  %835 = vmatprep.subr.bf16.mxu0 %v897_v10  ;;  %v910_v9 = vld [vmem:[%s1100_s5 + $0x80] sm:$0xff]  }
  0x15   :  { %855 = vmatprep.subr.bf16.mxu1 %v898_v11 }
  0x17   :  { %836 = vmatpush3.bf16.msra.mxu0 %v897_v10  ;;  %v255_v10 = vsel %vm249_vm2, %v253_v7, %v254_v8 }
  0x18   :  { %856 = vmatpush3.bf16.msra.mxu1 %v898_v11  ;;  %837 = vmatprep.subr.bf16.mxu0 %v899_v30  ;;  %v267_v11 = vsel %vm249_vm2, %v254_v8, %v262_v45 }
  0x19   :  { %857 = vmatprep.subr.bf16.mxu1 %v900_v34  ;;  %v500_v12 = vpack.c.bf16 %v267_v11, %v255_v10 }
  0x1b   :  { %838 = vmatpush3.bf16.msra.mxu0 %v899_v30 }
  0x1c   :  { %858 = vmatpush3.bf16.msra.mxu1 %v900_v34  ;;  %839 = vmatprep.subr.bf16.mxu0 %v901_v41 }
  0x1d   :  { %859 = vmatprep.subr.bf16.mxu1 %v902_v46 }
  0x1f   :  { %840 = vmatpush3.bf16.msra.mxu0 %v901_v41 }
  0x20   :  { %860 = vmatpush3.bf16.msra.mxu1 %v902_v46  ;;  %865 = vmatprep.subr.bf16.mxu0 %v903_v58 }
  0x22   :  { %842 = vmatmul.mubr.bf16.vlgmr.msra.gmra.mxu0 %v287_v62 }
  0x23   :  { %862 = vmatmul.mubr.msk.bf16.vlgmr.msra.gmra.mxu1 %vm1041_vm4, %v749_v63  ;;  %866 = vmatpush3.bf16.msra.mxu0 %v903_v58 }
  0x24   :  { %867 = vmatprep.subr.bf16.mxu0 %v904_v0  ;;  %881 = vmatprep.mubr.bf16.mxu0 %v499_v1 }
  0x27   :  { %868 = vmatpush3.bf16.msra.mxu0 %v904_v0 }
  0x28   :  { %869 = vmatprep.subr.bf16.mxu0 %v905_v2 }
  0x2b   :  { %870 = vmatpush3.bf16.msra.mxu0 %v905_v2 }
  0x2c   :  { %871 = vmatprep.subr.bf16.mxu0 %v906_v3 }
  0x2f   :  { %872 = vmatpush3.bf16.msra.mxu0 %v906_v3 }
  0x30   :  { %873 = vmatprep.subr.bf16.mxu0 %v907_v4 }
  0x33   :  { %874 = vmatpush3.bf16.msra.mxu0 %v907_v4 }
  0x34   :  { %875 = vmatprep.subr.bf16.mxu0 %v908_v5 }
  0x37   :  { %876 = vmatpush3.bf16.msra.mxu0 %v908_v5 }
  0x38   :  { %877 = vmatprep.subr.bf16.mxu0 %v909_v6 }
  0x3b   :  { %878 = vmatpush3.bf16.msra.mxu0 %v909_v6 }
  0x3c   :  { %879 = vmatprep.subr.bf16.mxu0 %v910_v9 }
  0x3f   :  { %880 = vmatpush3.bf16.msra.mxu0 %v910_v9 }
  0x42   :  { %882 = vmatmul.mubr.bf16.vlgmr.msra.gmra.mxu0 %v500_v12 }
  0xe2   :  { %v843_v13 = vpop.f32.mrf.mxu0 }
  0xe3   :  { %v863_v14 = vpop.f32.mrf.mxu1 }
  0xe4   :  { %v387_v15 = vpop.f32.mrf.mxu0  ;;  %v493_v20 = vadd.f32 %v863_v14, %v843_v13 }
  0xe5   :  { %v484_v16 = vpop.f32.mrf.mxu1 }
  0xe6   :  { %v844_v17 = vpop.f32.mrf.mxu0  ;;  %v485_v22 = vadd.f32 %v484_v16, %v387_v15 }
  0xe7   :  { %v864_v18 = vpop.f32.mrf.mxu1 }
  0xe8   :  { %v390_v19 = vpop.f32.mrf.mxu0  ;;  %v496_v27 = vadd.f32 %v864_v18, %v844_v17 }
  0xe9   :  { %v487_v24 = vpop.f32.mrf.mxu1 }
  0xea   :  { %v488_v30 = vadd.f32 %v487_v24, %v390_v19 }
 0x102   :  { %v883_v21 = vpop.f32.mrf.mxu0 }
 0x103   :  { %v617_v23 = vadd.f32 %v883_v21, %v493_v20 }
 0x104   :  { %v600_v26 = vpop.f32.mrf.mxu0 }
 0x105   :  { %v615_v28 = vadd.f32 %v600_v26, %v485_v22  ;;  %v628_v31 = vadd.f32 %v775_v25, %v617_v23 }
 0x106   :  { %v884_v29 = vpop.f32.mrf.mxu0 }
 0x107   :  { %v626_v32 = vadd.f32 %v775_v25, %v615_v28  ;;  %v618_v33 = vadd.f32 %v884_v29, %v496_v27  ;;  %v632_v37 = vmax.f32 %v628_v31, 0.0 }
 0x108   :  { %v603_v34 = vpop.f32.mrf.mxu0 }
 0x109   :  { %v629_v35 = vadd.f32 %v775_v25, %v618_v33  ;;  %v616_v36 = vadd.f32 %v603_v34, %v488_v30  ;;  %v630_v38 = vmax.f32 %v626_v32, 0.0  ;;  %v666_v47 = vmul.f32 %v632_v37, %v632_v37 }
 0x10b   :  { %v633_v39 = vmax.f32 %v629_v35, 0.0  ;;  %v627_v40 = vadd.f32 %v775_v25, %v616_v36  ;;  %v664_v43 = vmul.f32 %v630_v38, %v630_v38 }
 0x10d   :  { %v792_v41 = vpack.c.bf16 %v633_v39, %v632_v37  ;;  %v631_v42 = vmax.f32 %v627_v40, 0.0  ;;  %v667_v50 = vmul.f32 %v633_v39, %v633_v39 }
 0x10f   :  { %794 = vst [vmem:[%s1102_s7 + $0x8] sm:$0xff] %v792_v41   ;;  %v787_v44 = vpack.c.bf16 %v631_v42, %v630_v38  ;;  %v654_v45 = vadd.f32 %v631_v42, %v630_v38  ;;  %v665_v46 = vmul.f32 %v631_v42, %v631_v42 }
 0x111   :  { %788 = vst [vmem:[%s1102_s7] sm:$0xff] %v787_v44   ;;  %v655_v48 = vadd.f32 %v654_v45, %v632_v37  ;;  %v668_v49 = vadd.f32 %v665_v46, %v664_v43 }
 0x113   :  { %v656_v51 = vadd.f32 %v655_v48, %v633_v39  ;;  %v669_v52 = vadd.f32 %v668_v49, %v666_v47 }
 0x115   :  { %v657_v53 = vrot.slane %v656_v51, 4  ;;  %v670_v54 = vadd.f32 %v669_v52, %v667_v50 }
 0x117   :  { %v658_v55 = vadd.f32 %v657_v53, %v656_v51  ;;  %v671_v56 = vrot.slane %v670_v54, 4 }
 0x119   :  { %v659_v57 = vrot.slane %v658_v55, 2  ;;  %v672_v58 = vadd.f32 %v671_v56, %v670_v54 }
 0x11b   :  { %v660_v59 = vadd.f32 %v659_v57, %v658_v55  ;;  %v673_v60 = vrot.slane %v672_v58, 2 }
 0x11d   :  { %v661_v61 = vrot.slane %v660_v59, 1  ;;  %v674_v62 = vadd.f32 %v673_v60, %v672_v58 }
 0x11f   :  { %v662_v63 = vadd.f32 %v661_v61, %v660_v59  ;;  %v675_v0 = vrot.slane %v674_v62, 1 }
 0x121   :  { %663 = vst [vmem:[%s1103_s8] sm:$0x1] %v662_v63  ;;  %v676_v1 = vadd.f32 %v675_v0, %v674_v62 }
 0x123   :  { %677 = vst [vmem:[%s1103_s8 + $0x1] sm:$0x1] %v676_v1 }

// kernel: _lambda_.9
= control target key start
LH: loop header
LB: loop body
LE: loop exit
PB: predicated region body
PF: predicated region fallthrough
CT: control target
= control target key end

     0   :  { %11 = vsyncpa [#allocation3], 0  ;;  %vm73_vm0 = vcmask 818176   ;;  %s233_s0 = inlined_call_operand.vmem [shape: bf16[2,16,128], index: 0, kind: input, shape index: {}]   ;;  %s234_s1 = inlined_call_operand.vmem [shape: f32[1,128], index: 1, kind: input, shape index: {}]   ;;  %s235_s2 = inlined_call_operand.vmem [shape: f32[1,128], index: 2, kind: input, shape index: {}]   ;;  %s236_s3 = inlined_call_operand.vmem [shape: f32[2,1,100], index: 3, kind: input, shape index: {}]   ;;  %s237_s4 = inlined_call_operand.hbm [shape: f32[2,16,128], index: 4, kind: output, shape index: {0}]   ;;  %s238_s5 = inlined_call_operand.hbm [shape: f32[2,16,228], index: 5, kind: output, shape index: {1}]  }
   0x1   :  { %v115_v0 = vld [vmem:[%s233_s0] sm:$0xff]   ;;  %v122_v4 = vld [vmem:[%s233_s0 + $0x8] sm:$0xff]  }
   0x2   :  { %v110_v1 = vld [vmem:[%s234_s1] ss:$0 sm:$0xff]  ;;  %v116_v2 = vunpack.c.l.bf16 %v115_v0  ;;  %v117_v3 = vunpack.c.h.bf16 %v115_v0  ;;  %v113_v6 = vld [vmem:[%s236_s3 + $0x1] ss:$0 sm:$0xff]  ;;  %v120_v8 = vunpack.c.l.bf16 %v122_v4  ;;  %v121_v9 = vunpack.c.h.bf16 %v122_v4  ;;  %s173_s1 = smov [#allocation2]  }
   0x3   :  { %v112_v5 = vld [vmem:[%s236_s3] ss:$0 sm:$0xff]  ;;  %76 = vst.msk [vmem:[#allocation4 + $0x28] sm:$0xff] %vm73_vm0, %v113_v6  ;;  %77 = vst.msk [vmem:[#allocation4 + $0x38] sm:$0xff] %vm73_vm0, %v113_v6  ;;  %s83_s0 = sshll.u32 %s173_s1, 4  ;;  %s84_s0 = int_to_ptr.vmem [resolvable:$true] %s83_s0 }
   0x4   :  { %v111_v7 = vld [vmem:[%s235_s2] ss:$0 sm:$0xff]  ;;  %74 = vst.msk [vmem:[#allocation4 + $0x8] sm:$0xff] %vm73_vm0, %v112_v5  ;;  %75 = vst.msk [vmem:[#allocation4 + $0x18] sm:$0xff] %vm73_vm0, %v112_v5 }
   0x5   :  { %12 = vsyncpa [#allocation5], 0  ;;  %v36_v10 = vmul.f32 %v116_v2, %v110_v1  ;;  %v37_v11 = vmul.f32 %v117_v3, %v110_v1  ;;  %v38_v12 = vmul.f32 %v120_v8, %v110_v1  ;;  %v39_v13 = vmul.f32 %v121_v9, %v110_v1  ;;  %s174_s3 = smov [#allocation4]   ;;  %s129_s2 = scalar_lea.vmem %s84_s0, 512 }
   0x6   :  { %s95_s30 = sshll.u32 %s174_s3, 4  ;;  %p130_p0 = scmp.ne.s32.totalorder %s84_s0, %s129_s2  ;;  %s96_s30 = int_to_ptr.vmem [resolvable:$true] %s95_s30 }
   0x7   :  { %v47_v14 = vadd.f32 %v111_v7, %v36_v10  ;;  %v48_v15 = vadd.f32 %v111_v7, %v37_v11  ;;  %v49_v16 = vadd.f32 %v111_v7, %v38_v12  ;;  %v50_v17 = vadd.f32 %v111_v7, %v39_v13  ;;  %p134_p1 = scmp.lt.s32.totalorder %s84_s0, %s84_s0  ;;  %p135_p2 = scmp.lt.s32.totalorder %s129_s2, %s129_s2 }
   0x9   :  { %51 = vst [vmem:[#allocation2] sm:$0xff] %v47_v14  ;;  %55 = vst [vmem:[#allocation4] sm:$0xff] %v47_v14  ;;  %p136_p3 = por %p135_p2, %p134_p1 }
   0xa   :  { %52 = vst [vmem:[#allocation2 + $0x8] sm:$0xff] %v48_v15  ;;  %56 = vst [vmem:[#allocation4 + $0x10] sm:$0xff] %v48_v15 }
   0xb   :  { %53 = vst [vmem:[#allocation2 + $0x10] sm:$0xff] %v49_v16  ;;  %57 = vst [vmem:[#allocation4 + $0x20] sm:$0xff] %v49_v16  ;;  %p137_p4 = pnand %p136_p3, %p130_p0 }
   0xc   :  { %54 = vst [vmem:[#allocation2 + $0x18] sm:$0xff] %v50_v17  ;;  %58 = vst [vmem:[#allocation4 + $0x30] sm:$0xff] %v50_v17 }
   0xd   :  { %140 = shalt.err (!%p137_p4)
}
   0xe   :  { %s175_s6 = smov 128   ;;  %s176_s7 = smov 8  }
   0xf   :  { %89 = dma.vmem_to_hbm [thread:$0]  %s84_s0, 512, %s237_s4, [#allocation3], %s175_s6, %s175_s6, %s176_s7  }
  0x10   :  { %s149_s10 = scalar_lea.vmem %s96_s30, 1024  ;;  %p154_p6 = scmp.lt.s32.totalorder %s96_s30, %s96_s30 }
  0x11   :  { %p150_p5 = scmp.ne.s32.totalorder %s96_s30, %s149_s10  ;;  %p155_p7 = scmp.lt.s32.totalorder %s149_s10, %s149_s10 }
  0x13   :  { %p156_p8 = por %p155_p7, %p154_p6 }
  0x15   :  { %p157_p9 = pnand %p156_p8, %p150_p5 }
  0x17   :  { %160 = shalt.err (!%p157_p9)
}
  0x18   :  { %s177_s11 = smov 256   ;;  %s178_s12 = smov 16  }
  0x19   :  { %101 = dma.vmem_to_hbm [thread:$0]  %s96_s30, 1024, %s238_s5, [#allocation5], %s177_s11, %s177_s11, %s178_s12  }
  0x1a   :  { %169 = dma.done.wait [#allocation3], 512  }
  0x1b   :  { %170 = vsyncadd [#allocation3], 4294966784 }
  0x1c   :  { %171 = dma.done.wait [#allocation5], 1024  }
  0x1d   :  { %172 = vsyncadd [#allocation5], 4294966272 }
  0x1e   :  { %108 = vsyncpa [#allocation3], 1 }
  0x1f   :  { %109 = vsyncpa [#allocation5], 1 }

</bundles_post_ra>
